<compile_context>
chip_gen: v7x
topology: tpu7x:2x2x1
jax: 0.10.0
libtpu: 0.0.40
codegen_flags: <defaults>
</compile_context>

<pallas_src>
import functools

import jax
import jax.numpy as jnp
from jax.experimental import pallas as pl
from jax.experimental.pallas import tpu as pltpu

SELU_ALPHA = 1.6732632423543772
SELU_SCALE = 1.0507009873554805


def _selu(y):
    neg = SELU_ALPHA * (jnp.exp(jnp.minimum(y, 0.0)) - 1.0)
    return SELU_SCALE * jnp.where(y > 0, y, neg)


def _res_block_kernel(x_ref, dw1_ref, db1_ref, pw1_ref, pb1_ref,
                      dw2_ref, db2_ref, pw2_ref, pb2_ref,
                      o_ref, pad_ref, *, H, W, C):
    """out = selu(pw2(dw2(selu(pw1(dw1(x))))) + x) for one image (NHWC)."""
    # Zero the halo scratch once; the 1-pixel border stays zero for both
    # depthwise stages (re-zeroed every grid step -> no cross-step state).
    pad_ref[...] = jnp.zeros_like(pad_ref)

    def dsc(dw_ref, db_ref, pw_ref, pb_ref):
        # Depthwise 3x3 on the VPU: 9 shifted taps, per-channel weights.
        acc = jnp.zeros((H, W, C), jnp.float32)
        for t in range(9):
            di, dj = t // 3, t % 3
            tap = pad_ref[di:di + H, dj:dj + W, :]      # (H, W, C) f32
            acc = acc + tap * dw_ref[t]                 # dw_ref[t]: (1, C)
        acc = acc + db_ref[...]                         # (1, C) broadcast
        # Pointwise 1x1 on the MXU: bf16 inputs, f32 accumulation.
        a2 = acc.reshape(H * W, C).astype(jnp.bfloat16)
        y = jnp.dot(a2, pw_ref[...], preferred_element_type=jnp.float32)
        return y + pb_ref[...]                          # (H*W, C) f32

    # Stage 1: x into the halo buffer, dsc1 + SELU.
    pad_ref[1:H + 1, 1:W + 1, :] = x_ref[0]
    h = _selu(dsc(dw1_ref, db1_ref, pw1_ref, pb1_ref))

    # Stage 2: h into the halo buffer, dsc2 + residual + SELU.
    pad_ref[1:H + 1, 1:W + 1, :] = h.reshape(H, W, C)
    y2 = dsc(dw2_ref, db2_ref, pw2_ref, pb2_ref)

    res = x_ref[0].reshape(H * W, C)
    o_ref[0] = _selu(y2 + res).astype(o_ref.dtype)


def dsc_params_from_torch_layout(dw_w_oihw, dw_b, pw_w_oihw, pw_b):
    """PyTorch-layout params -> kernel layout (tap-major dw, (Cin,Cout) bf16 pw)."""
    C = dw_w_oihw.shape[0]
    dw = jnp.transpose(dw_w_oihw.reshape(C, 9), (1, 0)).reshape(9, 1, C)
    db = dw_b.reshape(1, C).astype(jnp.float32)
    pw = jnp.transpose(pw_w_oihw.reshape(C, C), (1, 0)).astype(jnp.bfloat16)
    pb = pw_b.reshape(1, C).astype(jnp.float32)
    return dw.astype(jnp.float32), db, pw, pb


def rtg_res_block_forward(x_nchw, p1, p2):
    N, C, H, W = x_nchw.shape
    x_nhwc = jnp.transpose(x_nchw, (0, 2, 3, 1)).astype(jnp.float32)
    dw1, db1, pw1, pb1 = p1
    dw2, db2, pw2, pb2 = p2

    kernel = functools.partial(_res_block_kernel, H=H, W=W, C=C)

    def const_spec(shape):
        return pl.BlockSpec(shape, lambda n: (0,) * len(shape))

    out = pl.pallas_call(
        kernel,
        out_shape=jax.ShapeDtypeStruct((N, H * W, C), jnp.float32),
        grid_spec=pltpu.PrefetchScalarGridSpec(
            num_scalar_prefetch=0,
            grid=(N,),
            in_specs=[
                pl.BlockSpec((1, H, W, C), lambda n: (n, 0, 0, 0)),
                const_spec((9, 1, C)),   # dw1 taps
                const_spec((1, C)),      # dw1 bias
                const_spec((C, C)),      # pw1 (Cin, Cout) bf16
                const_spec((1, C)),      # pw1 bias
                const_spec((9, 1, C)),   # dw2 taps
                const_spec((1, C)),      # dw2 bias
                const_spec((C, C)),      # pw2 (Cin, Cout) bf16
                const_spec((1, C)),      # pw2 bias
            ],
            out_specs=pl.BlockSpec((1, H * W, C), lambda n: (n, 0, 0)),
            scratch_shapes=[pltpu.VMEM((H + 2, W + 2, C), jnp.float32)],
        ),
        compiler_params=pltpu.CompilerParams(
            dimension_semantics=("parallel",)),
    )(x_nhwc, dw1, db1, pw1, pb1, dw2, db2, pw2, pb2)

    return jnp.transpose(out.reshape(N, H, W, C), (0, 3, 1, 2))


# ------------------------- pure-JAX reference ------------------------------
def _ref_dsc(x_nchw, dw_w, dw_b, pw_w, pw_b):
    C = x_nchw.shape[1]
    y = jax.lax.conv_general_dilated(
        x_nchw, dw_w, window_strides=(1, 1), padding=((1, 1), (1, 1)),
        feature_group_count=C, dimension_numbers=("NCHW", "OIHW", "NCHW"))
    y = y + dw_b.reshape(1, C, 1, 1)
    y = jax.lax.conv_general_dilated(
        y, pw_w, window_strides=(1, 1), padding="VALID",
        dimension_numbers=("NCHW", "OIHW", "NCHW"))
    return y + pw_b.reshape(1, C, 1, 1)


def _ref_res_block(x_nchw, params1, params2):
    h = jax.nn.selu(_ref_dsc(x_nchw, *params1))
    return jax.nn.selu(_ref_dsc(h, *params2) + x_nchw)


# ----------------------------------------------------------------------------
if __name__ == "__main__":
    N, C, H, W = 2, 128, 16, 16
    key = jax.random.PRNGKey(0)
    keys = jax.random.split(key, 9)
    x = jax.random.normal(keys[0], (N, C, H, W), jnp.float32)

    def conv_init(kw, kb, out_ch, in_ch, k):
        fan_in = in_ch * k * k
        bound = 1.0 / (fan_in ** 0.5)
        w = jax.random.uniform(kw, (out_ch, in_ch, k, k), jnp.float32,
                               -bound, bound)
        b = jax.random.uniform(kb, (out_ch,), jnp.float32, -bound, bound)
        return w, b

    dw_w1, dw_b1 = conv_init(keys[1], keys[2], C, 1, 3)   # depthwise, groups=C
    pw_w1, pw_b1 = conv_init(keys[3], keys[4], C, C, 1)   # pointwise 1x1
    dw_w2, dw_b2 = conv_init(keys[5], keys[6], C, 1, 3)
    pw_w2, pw_b2 = conv_init(keys[7], keys[8], C, C, 1)

    p1 = dsc_params_from_torch_layout(dw_w1, dw_b1, pw_w1, pw_b1)
    p2 = dsc_params_from_torch_layout(dw_w2, dw_b2, pw_w2, pw_b2)

    fwd = jax.jit(rtg_res_block_forward)
    out = jax.block_until_ready(fwd(x, p1, p2))

    assert out.shape == (N, C, H, W), out.shape
    assert bool(jnp.all(jnp.isfinite(out)))

    ref = _ref_res_block(x, (dw_w1, dw_b1, pw_w1, pw_b1),
                         (dw_w2, dw_b2, pw_w2, pw_b2))
    err = float(jnp.max(jnp.abs(out - ref)))
    assert err < 1e-1, f"max abs error vs reference: {err}"
    print("KERNEL_OK")
</pallas_src>

<mosaic_0001>
module attributes {stable_mosaic.version = 11 : i64} {
  func.func @_res_block_kernel(%arg0: i32, %arg1: memref<1x16x16x128xf32, #tpu.memory_space<vmem>>, %arg2: memref<9x1x128xf32, #tpu.memory_space<vmem>>, %arg3: memref<1x128xf32, #tpu.memory_space<vmem>>, %arg4: memref<128x128xbf16, #tpu.memory_space<vmem>>, %arg5: memref<1x128xf32, #tpu.memory_space<vmem>>, %arg6: memref<9x1x128xf32, #tpu.memory_space<vmem>>, %arg7: memref<1x128xf32, #tpu.memory_space<vmem>>, %arg8: memref<128x128xbf16, #tpu.memory_space<vmem>>, %arg9: memref<1x128xf32, #tpu.memory_space<vmem>>, %arg10: memref<1x256x128xf32, #tpu.memory_space<vmem>>, %arg11: memref<18x18x128xf32, #tpu.memory_space<vmem>>) attributes {dimension_semantics = [#tpu.dimension_semantics<parallel>], iteration_bounds = array<i64: 2>, scalar_prefetch = 0 : i64, scratch_operands = 1 : i64, tpu.core_type = #tpu.core_type<tc>, window_params = [{transform_indices = @transform_0, window_bounds = array<i64: 1, 16, 16, 128>}, {pipeline_mode = #tpu.pipeline_mode<synchronous>, transform_indices = @transform_1, window_bounds = array<i64: 9, 1, 128>}, {pipeline_mode = #tpu.pipeline_mode<synchronous>, transform_indices = @transform_2, window_bounds = array<i64: 1, 128>}, {pipeline_mode = #tpu.pipeline_mode<synchronous>, transform_indices = @transform_3, window_bounds = array<i64: 128, 128>}, {pipeline_mode = #tpu.pipeline_mode<synchronous>, transform_indices = @transform_4, window_bounds = array<i64: 1, 128>}, {pipeline_mode = #tpu.pipeline_mode<synchronous>, transform_indices = @transform_5, window_bounds = array<i64: 9, 1, 128>}, {pipeline_mode = #tpu.pipeline_mode<synchronous>, transform_indices = @transform_6, window_bounds = array<i64: 1, 128>}, {pipeline_mode = #tpu.pipeline_mode<synchronous>, transform_indices = @transform_7, window_bounds = array<i64: 128, 128>}, {pipeline_mode = #tpu.pipeline_mode<synchronous>, transform_indices = @transform_8, window_bounds = array<i64: 1, 128>}, {transform_indices = @transform_9, window_bounds = array<i64: 1, 256, 128>}]} {
    %cst = arith.constant 0.000000e+00 : f32
    %0 = vector.broadcast %cst : f32 to vector<18x18x128xf32>
    %c0 = arith.constant 0 : index
    %c0_0 = arith.constant 0 : index
    %c0_1 = arith.constant 0 : index
    %1 = vector.load %arg11[%c0, %c0_0, %c0_1] : memref<18x18x128xf32, #tpu.memory_space<vmem>>, vector<18x18x128xf32>
    tpu.vector_store %arg11[%c0, %c0_0, %c0_1], %0 {strides = array<i32>} : memref<18x18x128xf32, #tpu.memory_space<vmem>>, vector<18x18x128xf32>,
    %c0_2 = arith.constant 0 : index
    %c0_3 = arith.constant 0 : index
    %c0_4 = arith.constant 0 : index
    %c0_5 = arith.constant 0 : index
    %2 = vector.load %arg1[%c0_2, %c0_3, %c0_4, %c0_5] : memref<1x16x16x128xf32, #tpu.memory_space<vmem>>, vector<1x16x16x128xf32>
    %3 = vector.shape_cast %2 : vector<1x16x16x128xf32> to vector<16x16x128xf32>
    %c1 = arith.constant 1 : index
    %c1_6 = arith.constant 1 : index
    %c0_7 = arith.constant 0 : index
    %4 = vector.load %arg11[%c1, %c1_6, %c0_7] : memref<18x18x128xf32, #tpu.memory_space<vmem>>, vector<16x16x128xf32>
    tpu.vector_store %arg11[%c1, %c1_6, %c0_7], %3 {strides = array<i32>} : memref<18x18x128xf32, #tpu.memory_space<vmem>>, vector<16x16x128xf32>,
    %cst_8 = arith.constant 0.000000e+00 : f32
    %5 = vector.broadcast %cst_8 : f32 to vector<16x16x128xf32>
    %c0_9 = arith.constant 0 : index
    %c0_10 = arith.constant 0 : index
    %c0_11 = arith.constant 0 : index
    %6 = vector.load %arg11[%c0_9, %c0_10, %c0_11] : memref<18x18x128xf32, #tpu.memory_space<vmem>>, vector<16x16x128xf32>
    %c0_12 = arith.constant 0 : index
    %c0_13 = arith.constant 0 : index
    %c0_14 = arith.constant 0 : index
    %7 = vector.load %arg2[%c0_12, %c0_13, %c0_14] : memref<9x1x128xf32, #tpu.memory_space<vmem>>, vector<1x1x128xf32>
    %8 = vector.shape_cast %7 : vector<1x1x128xf32> to vector<1x128xf32>
    %9 = vector.shape_cast %8 : vector<1x128xf32> to vector<1x1x128xf32>
    %10 = vector.broadcast %9 : vector<1x1x128xf32> to vector<16x16x128xf32>
    %11 = arith.mulf %6, %10 : vector<16x16x128xf32>
    %12 = arith.addf %5, %11 : vector<16x16x128xf32>
    %c0_15 = arith.constant 0 : index
    %c1_16 = arith.constant 1 : index
    %c0_17 = arith.constant 0 : index
    %13 = vector.load %arg11[%c0_15, %c1_16, %c0_17] : memref<18x18x128xf32, #tpu.memory_space<vmem>>, vector<16x16x128xf32>
    %c1_18 = arith.constant 1 : index
    %c0_19 = arith.constant 0 : index
    %c0_20 = arith.constant 0 : index
    %14 = vector.load %arg2[%c1_18, %c0_19, %c0_20] : memref<9x1x128xf32, #tpu.memory_space<vmem>>, vector<1x1x128xf32>
    %15 = vector.shape_cast %14 : vector<1x1x128xf32> to vector<1x128xf32>
    %16 = vector.shape_cast %15 : vector<1x128xf32> to vector<1x1x128xf32>
    %17 = vector.broadcast %16 : vector<1x1x128xf32> to vector<16x16x128xf32>
    %18 = arith.mulf %13, %17 : vector<16x16x128xf32>
    %19 = arith.addf %12, %18 : vector<16x16x128xf32>
    %c0_21 = arith.constant 0 : index
    %c2 = arith.constant 2 : index
    %c0_22 = arith.constant 0 : index
    %20 = vector.load %arg11[%c0_21, %c2, %c0_22] : memref<18x18x128xf32, #tpu.memory_space<vmem>>, vector<16x16x128xf32>
    %c2_23 = arith.constant 2 : index
    %c0_24 = arith.constant 0 : index
    %c0_25 = arith.constant 0 : index
    %21 = vector.load %arg2[%c2_23, %c0_24, %c0_25] : memref<9x1x128xf32, #tpu.memory_space<vmem>>, vector<1x1x128xf32>
    %22 = vector.shape_cast %21 : vector<1x1x128xf32> to vector<1x128xf32>
    %23 = vector.shape_cast %22 : vector<1x128xf32> to vector<1x1x128xf32>
    %24 = vector.broadcast %23 : vector<1x1x128xf32> to vector<16x16x128xf32>
    %25 = arith.mulf %20, %24 : vector<16x16x128xf32>
    %26 = arith.addf %19, %25 : vector<16x16x128xf32>
    %c1_26 = arith.constant 1 : index
    %c0_27 = arith.constant 0 : index
    %c0_28 = arith.constant 0 : index
    %27 = vector.load %arg11[%c1_26, %c0_27, %c0_28] : memref<18x18x128xf32, #tpu.memory_space<vmem>>, vector<16x16x128xf32>
    %c3 = arith.constant 3 : index
    %c0_29 = arith.constant 0 : index
    %c0_30 = arith.constant 0 : index
    %28 = vector.load %arg2[%c3, %c0_29, %c0_30] : memref<9x1x128xf32, #tpu.memory_space<vmem>>, vector<1x1x128xf32>
    %29 = vector.shape_cast %28 : vector<1x1x128xf32> to vector<1x128xf32>
    %30 = vector.shape_cast %29 : vector<1x128xf32> to vector<1x1x128xf32>
    %31 = vector.broadcast %30 : vector<1x1x128xf32> to vector<16x16x128xf32>
    %32 = arith.mulf %27, %31 : vector<16x16x128xf32>
    %33 = arith.addf %26, %32 : vector<16x16x128xf32>
    %c1_31 = arith.constant 1 : index
    %c1_32 = arith.constant 1 : index
    %c0_33 = arith.constant 0 : index
    %34 = vector.load %arg11[%c1_31, %c1_32, %c0_33] : memref<18x18x128xf32, #tpu.memory_space<vmem>>, vector<16x16x128xf32>
    %c4 = arith.constant 4 : index
    %c0_34 = arith.constant 0 : index
    %c0_35 = arith.constant 0 : index
    %35 = vector.load %arg2[%c4, %c0_34, %c0_35] : memref<9x1x128xf32, #tpu.memory_space<vmem>>, vector<1x1x128xf32>
    %36 = vector.shape_cast %35 : vector<1x1x128xf32> to vector<1x128xf32>
    %37 = vector.shape_cast %36 : vector<1x128xf32> to vector<1x1x128xf32>
    %38 = vector.broadcast %37 : vector<1x1x128xf32> to vector<16x16x128xf32>
    %39 = arith.mulf %34, %38 : vector<16x16x128xf32>
    %40 = arith.addf %33, %39 : vector<16x16x128xf32>
    %c1_36 = arith.constant 1 : index
    %c2_37 = arith.constant 2 : index
    %c0_38 = arith.constant 0 : index
    %41 = vector.load %arg11[%c1_36, %c2_37, %c0_38] : memref<18x18x128xf32, #tpu.memory_space<vmem>>, vector<16x16x128xf32>
    %c5 = arith.constant 5 : index
    %c0_39 = arith.constant 0 : index
    %c0_40 = arith.constant 0 : index
    %42 = vector.load %arg2[%c5, %c0_39, %c0_40] : memref<9x1x128xf32, #tpu.memory_space<vmem>>, vector<1x1x128xf32>
    %43 = vector.shape_cast %42 : vector<1x1x128xf32> to vector<1x128xf32>
    %44 = vector.shape_cast %43 : vector<1x128xf32> to vector<1x1x128xf32>
    %45 = vector.broadcast %44 : vector<1x1x128xf32> to vector<16x16x128xf32>
    %46 = arith.mulf %41, %45 : vector<16x16x128xf32>
    %47 = arith.addf %40, %46 : vector<16x16x128xf32>
    %c2_41 = arith.constant 2 : index
    %c0_42 = arith.constant 0 : index
    %c0_43 = arith.constant 0 : index
    %48 = vector.load %arg11[%c2_41, %c0_42, %c0_43] : memref<18x18x128xf32, #tpu.memory_space<vmem>>, vector<16x16x128xf32>
    %c6 = arith.constant 6 : index
    %c0_44 = arith.constant 0 : index
    %c0_45 = arith.constant 0 : index
    %49 = vector.load %arg2[%c6, %c0_44, %c0_45] : memref<9x1x128xf32, #tpu.memory_space<vmem>>, vector<1x1x128xf32>
    %50 = vector.shape_cast %49 : vector<1x1x128xf32> to vector<1x128xf32>
    %51 = vector.shape_cast %50 : vector<1x128xf32> to vector<1x1x128xf32>
    %52 = vector.broadcast %51 : vector<1x1x128xf32> to vector<16x16x128xf32>
    %53 = arith.mulf %48, %52 : vector<16x16x128xf32>
    %54 = arith.addf %47, %53 : vector<16x16x128xf32>
    %c2_46 = arith.constant 2 : index
    %c1_47 = arith.constant 1 : index
    %c0_48 = arith.constant 0 : index
    %55 = vector.load %arg11[%c2_46, %c1_47, %c0_48] : memref<18x18x128xf32, #tpu.memory_space<vmem>>, vector<16x16x128xf32>
    %c7 = arith.constant 7 : index
    %c0_49 = arith.constant 0 : index
    %c0_50 = arith.constant 0 : index
    %56 = vector.load %arg2[%c7, %c0_49, %c0_50] : memref<9x1x128xf32, #tpu.memory_space<vmem>>, vector<1x1x128xf32>
    %57 = vector.shape_cast %56 : vector<1x1x128xf32> to vector<1x128xf32>
    %58 = vector.shape_cast %57 : vector<1x128xf32> to vector<1x1x128xf32>
    %59 = vector.broadcast %58 : vector<1x1x128xf32> to vector<16x16x128xf32>
    %60 = arith.mulf %55, %59 : vector<16x16x128xf32>
    %61 = arith.addf %54, %60 : vector<16x16x128xf32>
    %c2_51 = arith.constant 2 : index
    %c2_52 = arith.constant 2 : index
    %c0_53 = arith.constant 0 : index
    %62 = vector.load %arg11[%c2_51, %c2_52, %c0_53] : memref<18x18x128xf32, #tpu.memory_space<vmem>>, vector<16x16x128xf32>
    %c8 = arith.constant 8 : index
    %c0_54 = arith.constant 0 : index
    %c0_55 = arith.constant 0 : index
    %63 = vector.load %arg2[%c8, %c0_54, %c0_55] : memref<9x1x128xf32, #tpu.memory_space<vmem>>, vector<1x1x128xf32>
    %64 = vector.shape_cast %63 : vector<1x1x128xf32> to vector<1x128xf32>
    %65 = vector.shape_cast %64 : vector<1x128xf32> to vector<1x1x128xf32>
    %66 = vector.broadcast %65 : vector<1x1x128xf32> to vector<16x16x128xf32>
    %67 = arith.mulf %62, %66 : vector<16x16x128xf32>
    %68 = arith.addf %61, %67 : vector<16x16x128xf32>
    %c0_56 = arith.constant 0 : index
    %c0_57 = arith.constant 0 : index
    %69 = vector.load %arg3[%c0_56, %c0_57] : memref<1x128xf32, #tpu.memory_space<vmem>>, vector<1x128xf32>
    %70 = vector.shape_cast %69 : vector<1x128xf32> to vector<1x1x128xf32>
    %71 = vector.broadcast %70 : vector<1x1x128xf32> to vector<16x16x128xf32>
    %72 = arith.addf %68, %71 : vector<16x16x128xf32>
    %73 = vector.shape_cast %72 : vector<16x16x128xf32> to vector<256x128xf32>
    %74 = arith.truncf %73 : vector<256x128xf32> to vector<256x128xbf16>
    %c0_58 = arith.constant 0 : index
    %c0_59 = arith.constant 0 : index
    %75 = vector.load %arg4[%c0_58, %c0_59] : memref<128x128xbf16, #tpu.memory_space<vmem>>, vector<128x128xbf16>
    %cst_60 = arith.constant dense<0.000000e+00> : vector<256x128xf32>
    %76 = tpu.matmul %74, %75, %cst_60 {dimension_numbers = #tpu.dot_dimension_numbers<[1], [0], [0], [1], [0, 0, 1, 1], [], []>} : vector<256x128xbf16>, vector<128x128xbf16>, vector<256x128xf32> -> vector<256x128xf32>
    %c0_61 = arith.constant 0 : index
    %c0_62 = arith.constant 0 : index
    %77 = vector.load %arg5[%c0_61, %c0_62] : memref<1x128xf32, #tpu.memory_space<vmem>>, vector<1x128xf32>
    %78 = vector.broadcast %77 : vector<1x128xf32> to vector<256x128xf32>
    %79 = arith.addf %76, %78 : vector<256x128xf32>
    %cst_63 = arith.constant 0.000000e+00 : f32
    %80 = vector.broadcast %cst_63 : f32 to vector<256x128xf32>
    %81 = arith.minimumf %79, %80 : vector<256x128xf32>
    %82 = math.exp %81 : vector<256x128xf32>
    %cst_64 = arith.constant 1.000000e+00 : f32
    %83 = vector.broadcast %cst_64 : f32 to vector<256x128xf32>
    %84 = arith.subf %82, %83 : vector<256x128xf32>
    %cst_65 = arith.constant 1.67326319 : f32
    %85 = vector.broadcast %cst_65 : f32 to vector<256x128xf32>
    %86 = arith.mulf %85, %84 : vector<256x128xf32>
    %cst_66 = arith.constant 0.000000e+00 : f32
    %87 = vector.broadcast %cst_66 : f32 to vector<256x128xf32>
    %88 = arith.cmpf ogt, %79, %87 : vector<256x128xf32>
    %89 = arith.select %88, %79, %86 : vector<256x128xi1>, vector<256x128xf32>
    %cst_67 = arith.constant 1.05070102 : f32
    %90 = vector.broadcast %cst_67 : f32 to vector<256x128xf32>
    %91 = arith.mulf %90, %89 : vector<256x128xf32>
    %92 = vector.shape_cast %91 : vector<256x128xf32> to vector<16x16x128xf32>
    %c1_68 = arith.constant 1 : index
    %c1_69 = arith.constant 1 : index
    %c0_70 = arith.constant 0 : index
    %93 = vector.load %arg11[%c1_68, %c1_69, %c0_70] : memref<18x18x128xf32, #tpu.memory_space<vmem>>, vector<16x16x128xf32>
    tpu.vector_store %arg11[%c1_68, %c1_69, %c0_70], %92 {strides = array<i32>} : memref<18x18x128xf32, #tpu.memory_space<vmem>>, vector<16x16x128xf32>,
    %cst_71 = arith.constant 0.000000e+00 : f32
    %94 = vector.broadcast %cst_71 : f32 to vector<16x16x128xf32>
    %c0_72 = arith.constant 0 : index
    %c0_73 = arith.constant 0 : index
    %c0_74 = arith.constant 0 : index
    %95 = vector.load %arg11[%c0_72, %c0_73, %c0_74] : memref<18x18x128xf32, #tpu.memory_space<vmem>>, vector<16x16x128xf32>
    %c0_75 = arith.constant 0 : index
    %c0_76 = arith.constant 0 : index
    %c0_77 = arith.constant 0 : index
    %96 = vector.load %arg6[%c0_75, %c0_76, %c0_77] : memref<9x1x128xf32, #tpu.memory_space<vmem>>, vector<1x1x128xf32>
    %97 = vector.shape_cast %96 : vector<1x1x128xf32> to vector<1x128xf32>
    %98 = vector.shape_cast %97 : vector<1x128xf32> to vector<1x1x128xf32>
    %99 = vector.broadcast %98 : vector<1x1x128xf32> to vector<16x16x128xf32>
    %100 = arith.mulf %95, %99 : vector<16x16x128xf32>
    %101 = arith.addf %94, %100 : vector<16x16x128xf32>
    %c0_78 = arith.constant 0 : index
    %c1_79 = arith.constant 1 : index
    %c0_80 = arith.constant 0 : index
    %102 = vector.load %arg11[%c0_78, %c1_79, %c0_80] : memref<18x18x128xf32, #tpu.memory_space<vmem>>, vector<16x16x128xf32>
    %c1_81 = arith.constant 1 : index
    %c0_82 = arith.constant 0 : index
    %c0_83 = arith.constant 0 : index
    %103 = vector.load %arg6[%c1_81, %c0_82, %c0_83] : memref<9x1x128xf32, #tpu.memory_space<vmem>>, vector<1x1x128xf32>
    %104 = vector.shape_cast %103 : vector<1x1x128xf32> to vector<1x128xf32>
    %105 = vector.shape_cast %104 : vector<1x128xf32> to vector<1x1x128xf32>
    %106 = vector.broadcast %105 : vector<1x1x128xf32> to vector<16x16x128xf32>
    %107 = arith.mulf %102, %106 : vector<16x16x128xf32>
    %108 = arith.addf %101, %107 : vector<16x16x128xf32>
    %c0_84 = arith.constant 0 : index
    %c2_85 = arith.constant 2 : index
    %c0_86 = arith.constant 0 : index
    %109 = vector.load %arg11[%c0_84, %c2_85, %c0_86] : memref<18x18x128xf32, #tpu.memory_space<vmem>>, vector<16x16x128xf32>
    %c2_87 = arith.constant 2 : index
    %c0_88 = arith.constant 0 : index
    %c0_89 = arith.constant 0 : index
    %110 = vector.load %arg6[%c2_87, %c0_88, %c0_89] : memref<9x1x128xf32, #tpu.memory_space<vmem>>, vector<1x1x128xf32>
    %111 = vector.shape_cast %110 : vector<1x1x128xf32> to vector<1x128xf32>
    %112 = vector.shape_cast %111 : vector<1x128xf32> to vector<1x1x128xf32>
    %113 = vector.broadcast %112 : vector<1x1x128xf32> to vector<16x16x128xf32>
    %114 = arith.mulf %109, %113 : vector<16x16x128xf32>
    %115 = arith.addf %108, %114 : vector<16x16x128xf32>
    %c1_90 = arith.constant 1 : index
    %c0_91 = arith.constant 0 : index
    %c0_92 = arith.constant 0 : index
    %116 = vector.load %arg11[%c1_90, %c0_91, %c0_92] : memref<18x18x128xf32, #tpu.memory_space<vmem>>, vector<16x16x128xf32>
    %c3_93 = arith.constant 3 : index
    %c0_94 = arith.constant 0 : index
    %c0_95 = arith.constant 0 : index
    %117 = vector.load %arg6[%c3_93, %c0_94, %c0_95] : memref<9x1x128xf32, #tpu.memory_space<vmem>>, vector<1x1x128xf32>
    %118 = vector.shape_cast %117 : vector<1x1x128xf32> to vector<1x128xf32>
    %119 = vector.shape_cast %118 : vector<1x128xf32> to vector<1x1x128xf32>
    %120 = vector.broadcast %119 : vector<1x1x128xf32> to vector<16x16x128xf32>
    %121 = arith.mulf %116, %120 : vector<16x16x128xf32>
    %122 = arith.addf %115, %121 : vector<16x16x128xf32>
    %c1_96 = arith.constant 1 : index
    %c1_97 = arith.constant 1 : index
    %c0_98 = arith.constant 0 : index
    %123 = vector.load %arg11[%c1_96, %c1_97, %c0_98] : memref<18x18x128xf32, #tpu.memory_space<vmem>>, vector<16x16x128xf32>
    %c4_99 = arith.constant 4 : index
    %c0_100 = arith.constant 0 : index
    %c0_101 = arith.constant 0 : index
    %124 = vector.load %arg6[%c4_99, %c0_100, %c0_101] : memref<9x1x128xf32, #tpu.memory_space<vmem>>, vector<1x1x128xf32>
    %125 = vector.shape_cast %124 : vector<1x1x128xf32> to vector<1x128xf32>
    %126 = vector.shape_cast %125 : vector<1x128xf32> to vector<1x1x128xf32>
    %127 = vector.broadcast %126 : vector<1x1x128xf32> to vector<16x16x128xf32>
    %128 = arith.mulf %123, %127 : vector<16x16x128xf32>
    %129 = arith.addf %122, %128 : vector<16x16x128xf32>
    %c1_102 = arith.constant 1 : index
    %c2_103 = arith.constant 2 : index
    %c0_104 = arith.constant 0 : index
    %130 = vector.load %arg11[%c1_102, %c2_103, %c0_104] : memref<18x18x128xf32, #tpu.memory_space<vmem>>, vector<16x16x128xf32>
    %c5_105 = arith.constant 5 : index
    %c0_106 = arith.constant 0 : index
    %c0_107 = arith.constant 0 : index
    %131 = vector.load %arg6[%c5_105, %c0_106, %c0_107] : memref<9x1x128xf32, #tpu.memory_space<vmem>>, vector<1x1x128xf32>
    %132 = vector.shape_cast %131 : vector<1x1x128xf32> to vector<1x128xf32>
    %133 = vector.shape_cast %132 : vector<1x128xf32> to vector<1x1x128xf32>
    %134 = vector.broadcast %133 : vector<1x1x128xf32> to vector<16x16x128xf32>
    %135 = arith.mulf %130, %134 : vector<16x16x128xf32>
    %136 = arith.addf %129, %135 : vector<16x16x128xf32>
    %c2_108 = arith.constant 2 : index
    %c0_109 = arith.constant 0 : index
    %c0_110 = arith.constant 0 : index
    %137 = vector.load %arg11[%c2_108, %c0_109, %c0_110] : memref<18x18x128xf32, #tpu.memory_space<vmem>>, vector<16x16x128xf32>
    %c6_111 = arith.constant 6 : index
    %c0_112 = arith.constant 0 : index
    %c0_113 = arith.constant 0 : index
    %138 = vector.load %arg6[%c6_111, %c0_112, %c0_113] : memref<9x1x128xf32, #tpu.memory_space<vmem>>, vector<1x1x128xf32>
    %139 = vector.shape_cast %138 : vector<1x1x128xf32> to vector<1x128xf32>
    %140 = vector.shape_cast %139 : vector<1x128xf32> to vector<1x1x128xf32>
    %141 = vector.broadcast %140 : vector<1x1x128xf32> to vector<16x16x128xf32>
    %142 = arith.mulf %137, %141 : vector<16x16x128xf32>
    %143 = arith.addf %136, %142 : vector<16x16x128xf32>
    %c2_114 = arith.constant 2 : index
    %c1_115 = arith.constant 1 : index
    %c0_116 = arith.constant 0 : index
    %144 = vector.load %arg11[%c2_114, %c1_115, %c0_116] : memref<18x18x128xf32, #tpu.memory_space<vmem>>, vector<16x16x128xf32>
    %c7_117 = arith.constant 7 : index
    %c0_118 = arith.constant 0 : index
    %c0_119 = arith.constant 0 : index
    %145 = vector.load %arg6[%c7_117, %c0_118, %c0_119] : memref<9x1x128xf32, #tpu.memory_space<vmem>>, vector<1x1x128xf32>
    %146 = vector.shape_cast %145 : vector<1x1x128xf32> to vector<1x128xf32>
    %147 = vector.shape_cast %146 : vector<1x128xf32> to vector<1x1x128xf32>
    %148 = vector.broadcast %147 : vector<1x1x128xf32> to vector<16x16x128xf32>
    %149 = arith.mulf %144, %148 : vector<16x16x128xf32>
    %150 = arith.addf %143, %149 : vector<16x16x128xf32>
    %c2_120 = arith.constant 2 : index
    %c2_121 = arith.constant 2 : index
    %c0_122 = arith.constant 0 : index
    %151 = vector.load %arg11[%c2_120, %c2_121, %c0_122] : memref<18x18x128xf32, #tpu.memory_space<vmem>>, vector<16x16x128xf32>
    %c8_123 = arith.constant 8 : index
    %c0_124 = arith.constant 0 : index
    %c0_125 = arith.constant 0 : index
    %152 = vector.load %arg6[%c8_123, %c0_124, %c0_125] : memref<9x1x128xf32, #tpu.memory_space<vmem>>, vector<1x1x128xf32>
    %153 = vector.shape_cast %152 : vector<1x1x128xf32> to vector<1x128xf32>
    %154 = vector.shape_cast %153 : vector<1x128xf32> to vector<1x1x128xf32>
    %155 = vector.broadcast %154 : vector<1x1x128xf32> to vector<16x16x128xf32>
    %156 = arith.mulf %151, %155 : vector<16x16x128xf32>
    %157 = arith.addf %150, %156 : vector<16x16x128xf32>
    %c0_126 = arith.constant 0 : index
    %c0_127 = arith.constant 0 : index
    %158 = vector.load %arg7[%c0_126, %c0_127] : memref<1x128xf32, #tpu.memory_space<vmem>>, vector<1x128xf32>
    %159 = vector.shape_cast %158 : vector<1x128xf32> to vector<1x1x128xf32>
    %160 = vector.broadcast %159 : vector<1x1x128xf32> to vector<16x16x128xf32>
    %161 = arith.addf %157, %160 : vector<16x16x128xf32>
    %162 = vector.shape_cast %161 : vector<16x16x128xf32> to vector<256x128xf32>
    %163 = arith.truncf %162 : vector<256x128xf32> to vector<256x128xbf16>
    %c0_128 = arith.constant 0 : index
    %c0_129 = arith.constant 0 : index
    %164 = vector.load %arg8[%c0_128, %c0_129] : memref<128x128xbf16, #tpu.memory_space<vmem>>, vector<128x128xbf16>
    %cst_130 = arith.constant dense<0.000000e+00> : vector<256x128xf32>
    %165 = tpu.matmul %163, %164, %cst_130 {dimension_numbers = #tpu.dot_dimension_numbers<[1], [0], [0], [1], [0, 0, 1, 1], [], []>} : vector<256x128xbf16>, vector<128x128xbf16>, vector<256x128xf32> -> vector<256x128xf32>
    %c0_131 = arith.constant 0 : index
    %c0_132 = arith.constant 0 : index
    %166 = vector.load %arg9[%c0_131, %c0_132] : memref<1x128xf32, #tpu.memory_space<vmem>>, vector<1x128xf32>
    %167 = vector.broadcast %166 : vector<1x128xf32> to vector<256x128xf32>
    %168 = arith.addf %165, %167 : vector<256x128xf32>
    %c0_133 = arith.constant 0 : index
    %c0_134 = arith.constant 0 : index
    %c0_135 = arith.constant 0 : index
    %c0_136 = arith.constant 0 : index
    %169 = vector.load %arg1[%c0_133, %c0_134, %c0_135, %c0_136] : memref<1x16x16x128xf32, #tpu.memory_space<vmem>>, vector<1x16x16x128xf32>
    %170 = vector.shape_cast %169 : vector<1x16x16x128xf32> to vector<16x16x128xf32>
    %171 = vector.shape_cast %170 : vector<16x16x128xf32> to vector<256x128xf32>
    %172 = arith.addf %168, %171 : vector<256x128xf32>
    %cst_137 = arith.constant 0.000000e+00 : f32
    %173 = vector.broadcast %cst_137 : f32 to vector<256x128xf32>
    %174 = arith.minimumf %172, %173 : vector<256x128xf32>
    %175 = math.exp %174 : vector<256x128xf32>
    %cst_138 = arith.constant 1.000000e+00 : f32
    %176 = vector.broadcast %cst_138 : f32 to vector<256x128xf32>
    %177 = arith.subf %175, %176 : vector<256x128xf32>
    %cst_139 = arith.constant 1.67326319 : f32
    %178 = vector.broadcast %cst_139 : f32 to vector<256x128xf32>
    %179 = arith.mulf %178, %177 : vector<256x128xf32>
    %cst_140 = arith.constant 0.000000e+00 : f32
    %180 = vector.broadcast %cst_140 : f32 to vector<256x128xf32>
    %181 = arith.cmpf ogt, %172, %180 : vector<256x128xf32>
    %182 = arith.select %181, %172, %179 : vector<256x128xi1>, vector<256x128xf32>
    %cst_141 = arith.constant 1.05070102 : f32
    %183 = vector.broadcast %cst_141 : f32 to vector<256x128xf32>
    %184 = arith.mulf %183, %182 : vector<256x128xf32>
    %c0_142 = arith.constant 0 : index
    %c0_143 = arith.constant 0 : index
    %c0_144 = arith.constant 0 : index
    %185 = vector.load %arg10[%c0_142, %c0_143, %c0_144] : memref<1x256x128xf32, #tpu.memory_space<vmem>>, vector<1x256x128xf32>
    %186 = vector.shape_cast %185 : vector<1x256x128xf32> to vector<256x128xf32>
    %187 = vector.shape_cast %184 : vector<256x128xf32> to vector<1x256x128xf32>
    tpu.vector_store %arg10[%c0_142, %c0_143, %c0_144], %187 {strides = array<i32>} : memref<1x256x128xf32, #tpu.memory_space<vmem>>, vector<1x256x128xf32>,
    return
  }
  func.func @transform_0(%arg0: i32) -> (i32, i32, i32, i32) {
    %c0_i32 = arith.constant 0 : i32
    %c0_i32_0 = arith.constant 0 : i32
    %c0_i32_1 = arith.constant 0 : i32
    %c0_i32_2 = arith.constant 0 : i32
    return %arg0, %c0_i32, %c0_i32_0, %c0_i32_1 : i32, i32, i32, i32
  }
  func.func @transform_1(%arg0: i32) -> (i32, i32, i32) {
    %c0_i32 = arith.constant 0 : i32
    %c0_i32_0 = arith.constant 0 : i32
    %c0_i32_1 = arith.constant 0 : i32
    %c0_i32_2 = arith.constant 0 : i32
    return %c0_i32, %c0_i32_0, %c0_i32_1 : i32, i32, i32
  }
  func.func @transform_2(%arg0: i32) -> (i32, i32) {
    %c0_i32 = arith.constant 0 : i32
    %c0_i32_0 = arith.constant 0 : i32
    %c0_i32_1 = arith.constant 0 : i32
    return %c0_i32, %c0_i32_0 : i32, i32
  }
  func.func @transform_3(%arg0: i32) -> (i32, i32) {
    %c0_i32 = arith.constant 0 : i32
    %c0_i32_0 = arith.constant 0 : i32
    %c0_i32_1 = arith.constant 0 : i32
    return %c0_i32, %c0_i32_0 : i32, i32
  }
  func.func @transform_4(%arg0: i32) -> (i32, i32) {
    %c0_i32 = arith.constant 0 : i32
    %c0_i32_0 = arith.constant 0 : i32
    %c0_i32_1 = arith.constant 0 : i32
    return %c0_i32, %c0_i32_0 : i32, i32
  }
  func.func @transform_5(%arg0: i32) -> (i32, i32, i32) {
    %c0_i32 = arith.constant 0 : i32
    %c0_i32_0 = arith.constant 0 : i32
    %c0_i32_1 = arith.constant 0 : i32
    %c0_i32_2 = arith.constant 0 : i32
    return %c0_i32, %c0_i32_0, %c0_i32_1 : i32, i32, i32
  }
  func.func @transform_6(%arg0: i32) -> (i32, i32) {
    %c0_i32 = arith.constant 0 : i32
    %c0_i32_0 = arith.constant 0 : i32
    %c0_i32_1 = arith.constant 0 : i32
    return %c0_i32, %c0_i32_0 : i32, i32
  }
  func.func @transform_7(%arg0: i32) -> (i32, i32) {
    %c0_i32 = arith.constant 0 : i32
    %c0_i32_0 = arith.constant 0 : i32
    %c0_i32_1 = arith.constant 0 : i32
    return %c0_i32, %c0_i32_0 : i32, i32
  }
  func.func @transform_8(%arg0: i32) -> (i32, i32) {
    %c0_i32 = arith.constant 0 : i32
    %c0_i32_0 = arith.constant 0 : i32
    %c0_i32_1 = arith.constant 0 : i32
    return %c0_i32, %c0_i32_0 : i32, i32
  }
  func.func @transform_9(%arg0: i32) -> (i32, i32, i32) {
    %c0_i32 = arith.constant 0 : i32
    %c0_i32_0 = arith.constant 0 : i32
    %c0_i32_1 = arith.constant 0 : i32
    return %arg0, %c0_i32, %c0_i32_0 : i32, i32, i32
  }
}

</mosaic_0001>

<bundles_post_ra>
// kernel: rtg_res_block_forward.1
= control target key start
LH: loop header
LB: loop body
LE: loop exit
PB: predicated region body
PF: predicated region fallthrough
CT: control target
= control target key end

     0   :  { %s6644_s0 = inlined_call_operand.hbm [shape: f32[2,16,16,128], index: 0, kind: input, shape index: {}]   ;;  %s6645_s1 = inlined_call_operand.hbm [shape: f32[9,1,128], index: 1, kind: input, shape index: {}]   ;;  %s6646_s2 = inlined_call_operand.vmem [shape: f32[1,128], index: 2, kind: input, shape index: {}]   ;;  %s6647_s3 = inlined_call_operand.hbm [shape: bf16[128,128], index: 3, kind: input, shape index: {}]   ;;  %s6648_s4 = inlined_call_operand.vmem [shape: f32[1,128], index: 4, kind: input, shape index: {}]   ;;  %s6649_s5 = inlined_call_operand.vmem [shape: f32[9,1,128], index: 5, kind: input, shape index: {}]   ;;  %s6650_s6 = inlined_call_operand.vmem [shape: f32[1,128], index: 6, kind: input, shape index: {}]   ;;  %s6651_s7 = inlined_call_operand.hbm [shape: bf16[128,128], index: 7, kind: input, shape index: {}]   ;;  %s6652_s8 = inlined_call_operand.vmem [shape: f32[1,128], index: 8, kind: input, shape index: {}]   ;;  %s6653_s9 = inlined_call_operand.hbm [shape: f32[2,256,128], index: 9, kind: output, shape index: {}]  }
   0x1   :  { %6674 = sst [smem:[#allocation25_spill]] %s6645_s1 }
   0x2   :  { %6675 = sst [smem:[#allocation26_spill]] %s6653_s9 }
   0x3   :  { %14 = vsyncpa [#allocation4], 0 }
   0x4   :  { %16 = vsyncpa [#allocation4 + $0x1], 0 }
   0x5   :  { %17 = vsyncpa [#allocation7], 0 }
   0x6   :  { %18 = vsyncpa [#allocation10], 0 }
   0x7   :  { %19 = vsyncpa [#allocation5], 0 }
   0x8   :  { %21 = vsyncpa [#allocation5 + $0x1], 0  ;;  %s4503_s30 = smov 0   ;;  %s4505_s10 = smov 0  }
   0x9   :  { %s4507_s11 = smov 0   ;;  %s4509_s12 = smov 0  }
   0xa LB: > { %6676 = sst [smem:[#allocation16_spill]] %s4425_s30  ;;  %s4524_s13 = sadd.s32 4294967295, %s4437_s12   ;;  %s4437_s12 = sphi %s4509_s12, %s6715_s12   ;;  %s4433_s11 = sphi %s4507_s11, %s6714_s11   ;;  %s4429_s10 = sphi %s4505_s10, %s6713_s10   ;;  %s4425_s30 = sphi %s4503_s30, %s6712_s30  }
   0xb   : > { %s3716_s14 = sadd.s32 4294967294, %s4437_s12   ;;  %p47_p0 = scmp.ne.s32.totalorder %s4429_s10, %s4425_s30 }
   0xc   : > { %p6654_p1 = scmp.eq.s32.totalorder %s4524_s13, 0  ;;  %p245_p3 = scmp.eq.s32.totalorder %s3716_s14, 1 }
   0xd   : > { %p3717_p5 = scmp.ge.s32.totalorder %s4437_s12, 1  ;;  %p252_p7 = scmp.lt.s32.totalorder %s4437_s12, 3 }
   0xe   : > { %p4533_p4 = por %p6654_p1, %p47_p0  ;;  %p4538_p6 = por %p245_p3, %p47_p0 }
   0xf   : > { %p4543_p8 = pnand %p3717_p5, %p252_p7  ;;  %s4439_s18 = smov [#allocation6]  }
  0x10   : > { %s6677_s15 = scalar_select %p4533_p4, 1, 0 }
  0x11   : > { %s6678_s16 = scalar_select %p4538_p6, 1, 0 }
  0x12   : > { %s6680_s17 = scalar_select %p4543_p8, 1, 0 }
  0x13   : > { %6679 = sst [smem:[#allocation17_spill]] %s6678_s16  ;;  %s264_s19 = sshll.u32 %s4439_s18, 4  ;;  %s4547_s19 = int_to_ptr.vmem [resolvable:$true] %s264_s19 }
  0x14   : > { %p4008_p9 = pneg %p4543_p8  ;;  %s4440_s21 = smov [#allocation8]  }
  0x15   : > { %s280_s22 = sshll.u32 %s4440_s21, 4  ;;  %s6682_s1 = sld [smem:[#allocation25_spill]]  ;;  %s4558_s22 = int_to_ptr.vmem [resolvable:$true] %s280_s22 }
  0x16   : > { %p4554_p11 = pnand %p4008_p9, %p6654_p1 }
  0x18   : > { %p4568_p13 = pneg %p4554_p11 }
  0x1b   : > { %s4249_s25 = scalar_lea.hbm %s6682_s1, 144 }
  0x1c   : > { %p4250_p12 = scmp.ne.s32.totalorder %s6682_s1, %s4249_s25  ;;  %p4256_p5 = scmp.lt.u32.totalorder %s4249_s25, %s6682_s1 }
  0x1e   : > { %p4252_p0 = pnand %p4568_p13, %p4250_p12 }
  0x20   : > { %p4253_p3 = pneg %p4252_p0 }
  0x22   : > { %p4258_p7 = pnand %p4256_p5, %p4253_p3 }
  0x24   : > { %4261 = shalt.err (!%p4258_p7)
}
  0x25   : > { %s4262_s18 = scalar_lea.vmem %s4547_s19, 144  ;;  %s4269_s21 = scalar_lea.vmem %s4547_s19, 160 }
  0x26   : > { %p4263_p9 = scmp.ne.s32.totalorder %s4547_s19, %s4262_s18  ;;  %p4270_p12 = scmp.lt.s32.totalorder %s4547_s19, %s4547_s19 }
  0x27   : > { %p4271_p0 = scmp.lt.s32.totalorder %s4269_s21, %s4262_s18 }
  0x28   : > { %p4265_p10 = pnand %p4263_p9, %p4568_p13 }
  0x29   : > { %p4272_p2 = por %p4271_p0, %p4270_p12 }
  0x2a   : > { %p4266_p1 = pneg %p4265_p10 }
  0x2c   : > { %p4273_p6 = pnand %p4272_p2, %p4266_p1 }
  0x2e   : > { %4276 = shalt.err (!%p4273_p6)
}
  0x2f   : > { %s4441_s23 = smov 16   ;;  %s4442_s24 = smov 1  }
  0x30   : > { %4011 = dma.hbm_to_vmem [thread:$0]  (!%p4554_p11), %s6682_s1, 144, %s4547_s19, [#allocation7], %s4441_s23, %s4441_s23, %s4442_s24  }
  0x31   : > { %s4277_s14 = scalar_lea.hbm %s6647_s3, 1024 }
  0x32   : > { %p4278_p10 = scmp.ne.s32.totalorder %s6647_s3, %s4277_s14  ;;  %p4284_p6 = scmp.lt.u32.totalorder %s4277_s14, %s6647_s3 }
  0x34   : > { %p4280_p1 = pnand %p4278_p10, %p4568_p13 }
  0x36   : > { %p4281_p2 = pneg %p4280_p1 }
  0x38   : > { %p4286_p3 = pnand %p4284_p6, %p4281_p2 }
  0x3a   : > { %4289 = shalt.err (!%p4286_p3)
}
  0x3b   : > { %s4290_s19 = scalar_lea.vmem %s4558_s22, 1024  ;;  %p4298_p12 = scmp.lt.s32.totalorder %s4558_s22, %s4558_s22 }
  0x3c   : > { %p4291_p5 = scmp.ne.s32.totalorder %s4558_s22, %s4290_s19  ;;  %p4299_p0 = scmp.lt.s32.totalorder %s4290_s19, %s4290_s19 }
  0x3e   : > { %p4293_p7 = pnand %p4291_p5, %p4568_p13  ;;  %p4300_p10 = por %p4299_p0, %p4298_p12 }
  0x40   : > { %p4294_p9 = pneg %p4293_p7 }
  0x42   : > { %p4301_p1 = pnand %p4300_p10, %p4294_p9 }
  0x44   : > { %4304 = shalt.err (!%p4301_p1)
}
  0x45   : > { %s4443_s30 = smov 64   ;;  %s4444_s16 = smov 4  }
  0x46   : > { %4014 = dma.hbm_to_vmem [thread:$0]  (!%p4554_p11), %s6647_s3, 1024, %s4558_s22, [#allocation7], %s4443_s30, %s4443_s30, %s4444_s16  }
  0x47   : > { %s4445_s25 = smov [#allocation9]   ;;  %s4614_s27 = sadd.s32 1, %s4437_s12  }
  0x48   : > { %s302_s26 = sshll.u32 %s4445_s25, 4  ;;  %s4305_s18 = scalar_lea.hbm %s6651_s7, 1024  ;;  %s303_s26 = int_to_ptr.vmem [resolvable:$true] %s302_s26 }
  0x49   : > { %p4306_p2 = scmp.ne.s32.totalorder %s6651_s7, %s4305_s18  ;;  %p4312_p5 = scmp.lt.u32.totalorder %s4305_s18, %s6651_s7 }
  0x4b   : > { %p4308_p6 = pnand %p4306_p2, %p4568_p13 }
  0x4d   : > { %p4309_p3 = pneg %p4308_p6 }
  0x4f   : > { %p4314_p7 = pnand %p4312_p5, %p4309_p3 }
  0x51   : > { %4317 = shalt.err (!%p4314_p7)
}
  0x52   : > { %s4318_s22 = scalar_lea.vmem %s303_s26, 1024  ;;  %p4326_p10 = scmp.lt.s32.totalorder %s303_s26, %s303_s26 }
  0x53   : > { %p4319_p9 = scmp.ne.s32.totalorder %s303_s26, %s4318_s22  ;;  %p4327_p1 = scmp.lt.s32.totalorder %s4318_s22, %s4318_s22 }
  0x55   : > { %p4321_p12 = pnand %p4319_p9, %p4568_p13  ;;  %p4328_p4 = por %p4327_p1, %p4326_p10 }
  0x57   : > { %p4322_p0 = pneg %p4321_p12 }
  0x59   : > { %p4329_p8 = pnand %p4328_p4, %p4322_p0 }
  0x5b   : > { %4332 = shalt.err (!%p4329_p8)
}
  0x5c   : > { %4017 = dma.hbm_to_vmem [thread:$0]  (!%p4554_p11), %s6651_s7, 1024, %s303_s26, [#allocation10], %s4443_s30, %s4443_s30, %s4444_s16  }
  0x5d   : > { %s31_s1 = ssub.s32 %s4437_s12, %s4614_s27  ;;  %s34_s9 = sadd.s32 1, %s4433_s11 }
  0x5e   : > { %p32_p4 = scmp.eq.s32.totalorder %s31_s1, 0  ;;  %p41_p8 = scmp.ne.s32.totalorder %s4433_s11, %s4429_s10 }
  0x5f   : > { %p42_p13 = scmp.eq.s32.totalorder %s4437_s12, 0  ;;  %p4029_p2 = scmp.lt.s32.totalorder %s4437_s12, 2 }
  0x60   : > { %s4642_s20 = scalar_select %p32_p4, %s4433_s11, %s34_s9  }
  0x61   : > { %p43_p6 = por %p42_p13, %p41_p8  ;;  %p6684_p3 = scmp.eq.s32.totalorder %s4524_s13, 1 }
  0x62   : > { %s319_s25 = sand.u32 1, %s4433_s11   ;;  %s3846_s29 = sshll.u32 %s4437_s12, 12 }
  0x63   : > { %p4646_p5 = por %p6684_p3, %p41_p8  ;;  %s3722_s14 = sshll.u32 %s319_s25, 8 }
  0x64   : > { %s4655_s30 = scalar_lea.hbm %s6644_s0, %s3846_s29  ;;  %s323_s16 = scalar_lea.vmem [#allocation3], %s3722_s14 }
  0x65   : > { %s330_s26 = sshll.u32 %s323_s16, 4  ;;  %p4657_p11 = pnand %p4029_p2, %p43_p6  ;;  %s4661_s26 = int_to_ptr.vmem [resolvable:$true] %s330_s26 }
  0x66   : > { %s4663_s22 = scalar_lea.sflag [#allocation4], %s319_s25  ;;  %s4333_s23 = scalar_lea.hbm %s4655_s30, 4096 }
  0x67   : > { %p4334_p7 = scmp.ne.s32.totalorder %s4655_s30, %s4333_s23  ;;  %p4335_p9 = pneg %p4657_p11 }
  0x68   : > { %s4338_s9 = scalar_lea.hbm %s6644_s0, 8192  ;;  %p4339_p10 = scmp.lt.u32.totalorder %s4655_s30, %s6644_s0 }
  0x69   : > { %p4336_p12 = pnand %p4335_p9, %p4334_p7  ;;  %p4340_p1 = scmp.lt.u32.totalorder %s4338_s9, %s4333_s23 }
  0x6a   : > { %p4342_p8 = scmp.lt.u32.totalorder %s4333_s23, %s4655_s30 }
  0x6b   : > { %p4337_p0 = pneg %p4336_p12  ;;  %p4341_p4 = por %p4340_p1, %p4339_p10 }
  0x6d   : > { %p4343_p13 = por %p4342_p8, %p4341_p4 }
  0x6f   : > { %p4344_p2 = pnand %p4343_p13, %p4337_p0 }
  0x71   : > { %4347 = shalt.err (!%p4344_p2)
}
  0x72   : > { %s4348_s25 = scalar_lea.vmem %s4661_s26, 4096  ;;  %s4446_s18 = smov [#allocation3]  }
  0x73   : > { %p4349_p6 = scmp.ne.s32.totalorder %s4661_s26, %s4348_s25  ;;  %s4353_s21 = sshll.u32 %s4446_s18, 4  ;;  %s4354_s21 = int_to_ptr.vmem [resolvable:$false] %s4353_s21 }
  0x74   : > { %s4355_s16 = scalar_lea.vmem %s4354_s21, 8192  ;;  %p4356_p12 = scmp.lt.s32.totalorder %s4661_s26, %s4354_s21 }
  0x75   : > { %p4351_p3 = pnand %p4349_p6, %p4335_p9  ;;  %p4357_p10 = scmp.lt.s32.totalorder %s4355_s16, %s4348_s25 }
  0x77   : > { %p4352_p7 = pneg %p4351_p3  ;;  %p4358_p1 = por %p4357_p10, %p4356_p12 }
  0x79   : > { %p4359_p4 = pnand %p4358_p1, %p4352_p7 }
  0x7b   : > { %4362 = shalt.err (!%p4359_p4)
}
  0x7c   : > { %s4447_s23 = smov 128   ;;  %s4448_s24 = smov 8  }
  0x7d   : > { %4021 = dma.hbm_to_vmem [thread:$0]  (!%p4657_p11), %s4655_s30, 4096, %s4661_s26, %s4663_s22, %s4447_s23, %s4447_s23, %s4448_s24  }
  0x7e   : > { %p6687_p9 = scmp.ne.s32.totalorder %s6680_s17, 0 }
  0x80   : > { %342 = sbr.rel (%p6687_p9) target bundleno = 921 (0x399), region = 56 }
  0x87   : > { %s4694_s1 = sand.u32 1, %s4429_s10   ;;  %p6688_p0 = scmp.ne.s32.totalorder %s6677_s15, 0 }
  0x88   : > { %s3726_s9 = sshll.u32 %s4694_s1, 8  ;;  %s345_s29 = scalar_lea.sflag [#allocation4], %s4694_s1 }
  0x89   : > { %s4700_s14 = scalar_lea.vmem [#allocation3], %s3726_s9 }
  0x8a   : > { %4408 = dma.done.wait (%p6688_p0), %s345_s29, 4096  }
  0x8b   : > { %4410 = vsyncadd (%p6688_p0), %s345_s29, 4294963200  ;;  %p6689_p11 = scmp.eq.s32.totalorder %s4524_s13, 0 }
  0x8d   : > { %4412 = dma.done.wait (%p6689_p11), [#allocation7], 1168   ;;  %p6690_p8 = pmov %p6689_p11 }
  0x8f   : > { %4414 = vsyncadd (%p6690_p8), [#allocation7], 4294966128  ;;  %p6691_p13 = pmov %p6690_p8 }
  0x90   : > { %p6692_p2 = pmov %p6690_p8 }
  0x91   : > { %4416 = dma.done.wait (%p6691_p13), [#allocation10], 1024  }
  0x92   : > { %4418 = vsyncadd (%p6692_p2), [#allocation10], 4294966272  ;;  %v4449_v0 = vmov 0.0   ;;  %v4078_v1 = vld [vmem:[#allocation8] sm:$0xff]   ;;  %v4079_v2 = vld [vmem:[#allocation8 + $0x8] sm:$0xff]   ;;  %s6459_s24 = scalar_lea.vmem [#allocation11], %s3726_s9 }
  0x93   : > { %396 = vst [vmem:[#allocation2] sm:$0xff] %v4449_v0  ;;  %397 = vst [vmem:[#allocation2 + $0x8] sm:$0xff] %v4449_v0  ;;  %3896 = vmatprep.subr.bf16.mxu0 %v4078_v1  ;;  %v4080_v3 = vld [vmem:[#allocation8 + $0x10] sm:$0xff]   ;;  %v4081_v4 = vld [vmem:[#allocation8 + $0x18] sm:$0xff]   ;;  %s3847_s9 = sshll.u32 %s4524_s13, 12  ;;  %s6707_s17 = sld [smem:[#allocation26_spill]] }
  0x94   : > { %398 = vst [vmem:[#allocation2 + $0x10] sm:$0x3] %v4449_v0  ;;  %399 = vst [vmem:[#allocation2 + $0x18] sm:$0xff] %v4449_v0  ;;  %3897 = vmatpush3.bf16.msra.mxu0 %v4078_v1  ;;  %v450_v5 = vld [vmem:[%s4700_s14] sm:$0xff]  ;;  %v451_v6 = vld [vmem:[%s4700_s14 + $0x8] sm:$0xff]  ;;  %s3601_s13 = scalar_lea.sflag [#allocation5], %s4694_s1 }
  0x95   : > { %400 = vst [vmem:[#allocation2 + $0x20] sm:$0xff] %v4449_v0  ;;  %401 = vst [vmem:[#allocation2 + $0x28] sm:$0x3] %v4449_v0  ;;  %3898 = vmatprep.subr.bf16.mxu0 %v4079_v2  ;;  %v452_v7 = vld [vmem:[%s4700_s14 + $0x10] sm:$0xff]  ;;  %v453_v8 = vld [vmem:[%s4700_s14 + $0x18] sm:$0xff]  ;;  %s4450_s19 = smov [#allocation11]  }
  0x96   : > { %402 = vst [vmem:[#allocation2 + $0x30] sm:$0xff] %v4449_v0  ;;  %403 = vst [vmem:[#allocation2 + $0x38] sm:$0xff] %v4449_v0  ;;  %v4718_v9 = vld [vmem:[#allocation6] ss:$0 sm:$0xff]  ;;  %v4721_v13 = vld [vmem:[#allocation6 + $0x1] ss:$0 sm:$0xff] }
  0x97   : > { %404 = vst [vmem:[#allocation2 + $0x40] sm:$0x3] %v4449_v0  ;;  %405 = vst [vmem:[#allocation2 + $0x48] sm:$0xff] %v4449_v0  ;;  %v554_v11 = vmul.f32 0.0, %v4718_v9  ;;  %v4725_v18 = vld [vmem:[#allocation6 + $0x2] ss:$0 sm:$0xff]  ;;  %v4728_v19 = vmul.f32 %v4721_v13, %v450_v5  ;;  %v4731_v20 = vmul.f32 %v4721_v13, %v451_v6  ;;  %v4740_v26 = vmul.f32 %v4721_v13, %v452_v7 }
  0x98   : > { %406 = vst [vmem:[#allocation2 + $0x50] sm:$0xff] %v4449_v0  ;;  %407 = vst [vmem:[#allocation2 + $0x58] sm:$0x3] %v4449_v0  ;;  %3899 = vmatpush3.bf16.msra.mxu0 %v4079_v2  ;;  %v4082_v21 = vld [vmem:[#allocation8 + $0x20] sm:$0xff]   ;;  %v4735_v24 = vld [vmem:[#allocation6 + $0x3] ss:$0 sm:$0xff]  ;;  %v4743_v27 = vmul.f32 %v4721_v13, %v453_v8 }
  0x99   : > { %408 = vst [vmem:[#allocation2 + $0x60] sm:$0xff] %v4449_v0  ;;  %409 = vst [vmem:[#allocation2 + $0x68] sm:$0xff] %v4449_v0  ;;  %3900 = vmatprep.subr.bf16.mxu0 %v4080_v3  ;;  %v4737_v25 = vld [vmem:[#allocation6 + $0x4] ss:$0 sm:$0xff]  ;;  %v4751_v32 = vld [vmem:[#allocation6 + $0x5] ss:$0 sm:$0xff]  ;;  %s6597_s30 = scalar_lea.hbm %s6707_s17, %s3847_s9 }
  0x9a   : > { %410 = vst [vmem:[#allocation2 + $0x70] sm:$0x3] %v4449_v0  ;;  %411 = vst [vmem:[#allocation2 + $0x78] sm:$0xff] %v4449_v0  ;;  %v618_v10 = vld [vmem:[#allocation2 + $0x1] sm:$0xff]  ;;  %v4746_v30 = vmul.f32 %v4737_v25, %v450_v5  ;;  %v4749_v31 = vmul.f32 %v4737_v25, %v451_v6  ;;  %v4753_v33 = vld [vmem:[#allocation6 + $0x6] ss:$0 sm:$0xff]  ;;  %v4774_v41 = vmul.f32 %v4737_v25, %v452_v7 }
  0x9b   : > { %412 = vst [vmem:[#allocation2 + $0x80] sm:$0xff] %v4449_v0  ;;  %413 = vst [vmem:[#allocation2 + $0x88] sm:$0x3] %v4449_v0  ;;  %v619_v12 = vld [vmem:[#allocation2 + $0x9] sm:$0xff]  ;;  %v658_v15 = vmul.f32 %v4721_v13, %v618_v10  ;;  %v4755_v34 = vld [vmem:[#allocation6 + $0x7] ss:$0 sm:$0xff]  ;;  %v4777_v42 = vmul.f32 %v4737_v25, %v453_v8 }
  0x9c   : > { %414 = vst [vmem:[#allocation2 + $0x90] sm:$0xff] %v4449_v0  ;;  %415 = vst [vmem:[#allocation2 + $0x98] sm:$0xff] %v4449_v0  ;;  %v722_v14 = vld [vmem:[#allocation2 + $0x2] sm:$0xff]  ;;  %3901 = vmatpush3.bf16.msra.mxu0 %v4080_v3  ;;  %v659_v16 = vmul.f32 %v4721_v13, %v619_v12  ;;  %v723_v17 = vld [vmem:[#allocation2 + $0xa] sm:$0xff]  ;;  %v4760_v36 = vmul.f32 %v4755_v34, %v452_v7  ;;  %v4763_v37 = vmul.f32 %v4755_v34, %v453_v8  ;;  %s4367_s22 = sshll.u32 %s4450_s19, 4  ;;  %s4368_s22 = int_to_ptr.vmem [resolvable:$false] %s4367_s22 }
  0x9d   : > { %416 = vst [vmem:[#allocation2 + $0xa0] sm:$0x3] %v4449_v0  ;;  %417 = vst [vmem:[#allocation2 + $0xa8] sm:$0xff] %v4449_v0  ;;  %3902 = vmatprep.subr.bf16.mxu0 %v4081_v4  ;;  %v762_v22 = vmul.f32 %v4725_v18, %v722_v14  ;;  %v763_v23 = vmul.f32 %v4725_v18, %v723_v17  ;;  %v690_v28 = vadd.f32 %v658_v15, %v554_v11  ;;  %v4757_v35 = vld [vmem:[#allocation8 + $0x28] sm:$0xff]   ;;  %v4765_v38 = vld [vmem:[#allocation6 + $0x8] ss:$0 sm:$0xff] }
  0x9e   : > { %418 = vst [vmem:[#allocation2 + $0xb0] sm:$0xff] %v4449_v0  ;;  %419 = vst [vmem:[#allocation2 + $0xb8] sm:$0x3] %v4449_v0  ;;  %v691_v29 = vadd.f32 %v659_v16, %v554_v11  ;;  %v4768_v39 = vld [vmem:[%s4700_s14 + $0x20] sm:$0xff]  ;;  %v4771_v40 = vld [vmem:[%s4700_s14 + $0x28] sm:$0xff]  ;;  %s4369_s25 = scalar_lea.vmem %s4368_s22, 8192 }
  0x9f   : > { %420 = vst [vmem:[#allocation2 + $0xc0] sm:$0xff] %v4449_v0  ;;  %421 = vst [vmem:[#allocation2 + $0xc8] sm:$0xff] %v4449_v0  ;;  %v4780_v43 = vld [vmem:[%s4700_s14 + $0x30] sm:$0xff]  ;;  %v794_v44 = vadd.f32 %v762_v22, %v690_v28  ;;  %v4786_v46 = vmul.f32 %v4755_v34, %v4768_v39  ;;  %v4790_v47 = vmul.f32 %v4755_v34, %v4771_v40  ;;  %v4793_v48 = vld [vmem:[%s4700_s14 + $0x38] sm:$0xff] }
  0xa0   : > { %422 = vst [vmem:[#allocation2 + $0xd0] sm:$0x3] %v4449_v0  ;;  %423 = vst [vmem:[#allocation2 + $0xd8] sm:$0xff] %v4449_v0  ;;  %3903 = vmatpush3.bf16.msra.mxu0 %v4081_v4  ;;  %v795_v45 = vadd.f32 %v763_v23, %v691_v29  ;;  %v4797_v49 = vld [vmem:[%s4700_s14 + $0x40] sm:$0xff]  ;;  %v4800_v50 = vld [vmem:[%s4700_s14 + $0x48] sm:$0xff]  ;;  %v4805_v54 = vmul.f32 %v4737_v25, %v4768_v39  ;;  %v4809_v55 = vmul.f32 %v4737_v25, %v4771_v40 }
  0xa1   : > { %424 = vst [vmem:[#allocation2 + $0xe0] sm:$0xff] %v4449_v0  ;;  %425 = vst [vmem:[#allocation2 + $0xe8] sm:$0x3] %v4449_v0  ;;  %3904 = vmatprep.subr.bf16.mxu0 %v4082_v21  ;;  %v4813_v56 = vmul.f32 %v4755_v34, %v4780_v43  ;;  %v4817_v57 = vmul.f32 %v4755_v34, %v4793_v48  ;;  %v4829_v1 = vld [vmem:[#allocation8 + $0x30] sm:$0xff]   ;;  %v4854_v17 = vld [vmem:[%s4700_s14 + $0x68] sm:$0xff] }
  0xa2   : > { %426 = vst [vmem:[#allocation2 + $0xf0] sm:$0xff] %v4449_v0  ;;  %427 = vst [vmem:[#allocation2 + $0xf8] sm:$0xff] %v4449_v0  ;;  %v4847_v15 = vld [vmem:[%s4700_s14 + $0x58] sm:$0xff]  ;;  %v4851_v16 = vld [vmem:[%s4700_s14 + $0x60] sm:$0xff] }
  0xa3   : > { %428 = vst [vmem:[#allocation2 + $0x100] sm:$0x3] %v4449_v0  ;;  %429 = vst [vmem:[#allocation2 + $0x108] sm:$0xff] %v4449_v0  ;;  %v4865_v29 = vld [vmem:[%s4700_s14 + $0x70] sm:$0xff] }
  0xa4   : > { %430 = vst [vmem:[#allocation2 + $0x110] sm:$0xff] %v4449_v0  ;;  %431 = vst [vmem:[#allocation2 + $0x118] sm:$0x3] %v4449_v0  ;;  %3905 = vmatpush3.bf16.msra.mxu0 %v4082_v21 }
  0xa5   : > { %432 = vst [vmem:[#allocation2 + $0x120] sm:$0xff] %v4449_v0  ;;  %433 = vst [vmem:[#allocation2 + $0x128] sm:$0xff] %v4449_v0  ;;  %3906 = vmatprep.subr.bf16.mxu0 %v4757_v35 }
  0xa6   : > { %434 = vst [vmem:[#allocation2 + $0x130] sm:$0x3] %v4449_v0  ;;  %435 = vst [vmem:[#allocation2 + $0x138] sm:$0xff] %v4449_v0 }
  0xa7   : > { %436 = vst [vmem:[#allocation2 + $0x140] sm:$0xff] %v4449_v0  ;;  %437 = vst [vmem:[#allocation2 + $0x148] sm:$0x3] %v4449_v0 }
  0xa8   : > { %438 = vst [vmem:[#allocation2 + $0x150] sm:$0xff] %v4449_v0  ;;  %439 = vst [vmem:[#allocation2 + $0x158] sm:$0xff] %v4449_v0  ;;  %3907 = vmatpush3.bf16.msra.mxu0 %v4757_v35 }
  0xa9   : > { %440 = vst [vmem:[#allocation2 + $0x160] sm:$0x3] %v4449_v0  ;;  %441 = vst [vmem:[#allocation2 + $0x168] sm:$0xff] %v4449_v0  ;;  %3908 = vmatprep.subr.bf16.mxu0 %v4829_v1 }
  0xaa   : > { %442 = vst [vmem:[#allocation2 + $0x170] sm:$0xff] %v4449_v0  ;;  %443 = vst [vmem:[#allocation2 + $0x178] sm:$0x3] %v4449_v0 }
  0xab   : > { %444 = vst [vmem:[#allocation2 + $0x180] sm:$0xff] %v4449_v0  ;;  %445 = vst [vmem:[#allocation2 + $0x188] sm:$0xff] %v4449_v0 }
  0xac   : > { %446 = vst [vmem:[#allocation2 + $0x190] sm:$0x3] %v4449_v0  ;;  %447 = vst [vmem:[#allocation2 + $0x198] sm:$0xff] %v4449_v0  ;;  %3909 = vmatpush3.bf16.msra.mxu0 %v4829_v1 }
  0xad   : > { %448 = vst [vmem:[#allocation2 + $0x1a0] sm:$0xff] %v4449_v0  ;;  %449 = vst [vmem:[#allocation2 + $0x1a8] sm:$0x3] %v4449_v0 }
  0xae   : > { %483 = vst [vmem:[#allocation2 + $0x19] sm:$0xff] %v450_v5  ;;  %484 = vst [vmem:[#allocation2 + $0x21] sm:$0xff] %v451_v6 }
  0xaf   : > { %485 = vst [vmem:[#allocation2 + $0x31] sm:$0xff] %v452_v7  ;;  %486 = vst [vmem:[#allocation2 + $0x39] sm:$0xff] %v453_v8  ;;  %v4838_v8 = vld [vmem:[%s4700_s14 + $0x50] sm:$0xff] }
  0xb0   : > { %487 = vst [vmem:[#allocation2 + $0x49] sm:$0xff] %v4768_v39  ;;  %488 = vst [vmem:[#allocation2 + $0x51] sm:$0xff] %v4771_v40 }
  0xb1   : > { %489 = vst [vmem:[#allocation2 + $0x61] sm:$0xff] %v4780_v43  ;;  %490 = vst [vmem:[#allocation2 + $0x69] sm:$0xff] %v4793_v48 }
  0xb2   : > { %491 = vst [vmem:[#allocation2 + $0x79] sm:$0xff] %v4797_v49  ;;  %492 = vst [vmem:[#allocation2 + $0x81] sm:$0xff] %v4800_v50 }
  0xb3   : > { %493 = vst [vmem:[#allocation2 + $0x91] sm:$0xff] %v4838_v8  ;;  %6693 = vst [vmem:[#allocation18_spill] sm:$0xff] %v4854_v17 }
  0xb4   : > { %494 = vst [vmem:[#allocation2 + $0x99] sm:$0xff] %v4847_v15  ;;  %495 = vst [vmem:[#allocation2 + $0xa9] sm:$0xff] %v4851_v16 }
  0xb5   : > { %v826_v51 = vld [vmem:[#allocation2 + $0x18] sm:$0xff]  ;;  %v827_v52 = vld [vmem:[#allocation2 + $0x20] sm:$0xff]  ;;  %496 = vst [vmem:[#allocation2 + $0xb1] sm:$0xff] %v4854_v17  ;;  %6694 = vst [vmem:[#allocation19_spill] sm:$0xff] %v4865_v29 }
  0xb6   : > { %v1034_v53 = vld [vmem:[#allocation2 + $0x1a] sm:$0xff]  ;;  %v866_v58 = vmul.f32 %v4735_v24, %v826_v51  ;;  %v867_v59 = vmul.f32 %v4735_v24, %v827_v52  ;;  %v1035_v60 = vld [vmem:[#allocation2 + $0x22] sm:$0xff]  ;;  %v4824_v62 = vld [vmem:[#allocation2 + $0x30] sm:$0xff]  ;;  %v556_v0 = vmul.f32 %v4718_v9, %v826_v51  ;;  %v557_v7 = vmul.f32 %v4718_v9, %v827_v52  ;;  %497 = vst [vmem:[#allocation2 + $0xc1] sm:$0xff] %v4865_v29 }
  0xb7   : > { %v1074_v61 = vmul.f32 %v4751_v32, %v1034_v53  ;;  %v4826_v63 = vld [vmem:[#allocation2 + $0x38] sm:$0xff]  ;;  %v1075_v2 = vmul.f32 %v4751_v32, %v1035_v60  ;;  %v1179_v3 = vmul.f32 %v4753_v33, %v4824_v62  ;;  %v764_v23 = vmul.f32 %v4725_v18, %v1034_v53 }
  0xb8   : > { %v1180_v4 = vmul.f32 %v4753_v33, %v4826_v63  ;;  %v1347_v5 = vld [vmem:[#allocation2 + $0x32] sm:$0xff]  ;;  %v1348_v6 = vld [vmem:[#allocation2 + $0x3a] sm:$0xff]  ;;  %v898_v10 = vadd.f32 %v866_v58, %v794_v44  ;;  %v899_v11 = vadd.f32 %v867_v59, %v795_v45  ;;  %v692_v21 = vadd.f32 %v4728_v19, %v556_v0  ;;  %v4868_v44 = vld [vmem:[%s4700_s14 + $0x78] sm:$0xff] }
  0xb9   : > { %v4841_v12 = vmul.f32 %v4765_v38, %v1347_v5  ;;  %v4844_v14 = vmul.f32 %v4765_v38, %v1348_v6  ;;  %v693_v22 = vadd.f32 %v4731_v20, %v557_v7  ;;  %v765_v28 = vmul.f32 %v4725_v18, %v1035_v60  ;;  %6695 = vst [vmem:[#allocation20_spill] sm:$0xff] %v4868_v44  ;;  %v4871_v19 = vld [vmem:[%s4700_s14 + $0x80] sm:$0xff]  ;;  %v4882_v53 = vld [vmem:[%s4700_s14 + $0x88] sm:$0xff]  ;;  %v4886_v58 = vld [vmem:[%s4700_s14 + $0x90] sm:$0xff] }
  0xba   : > { %6696 = vst [vmem:[#allocation21_spill] sm:$0xff] %v4871_v19  ;;  %v1002_v20 = vadd.f32 %v4746_v30, %v898_v10  ;;  %v1003_v45 = vadd.f32 %v4749_v31, %v899_v11  ;;  %v868_v51 = vmul.f32 %v4735_v24, %v4824_v62  ;;  %v869_v52 = vmul.f32 %v4735_v24, %v4826_v63  ;;  %v4889_v59 = vld [vmem:[%s4700_s14 + $0x98] sm:$0xff]  ;;  %v4895_v10 = vld [vmem:[#allocation2 + $0x50] sm:$0xff] }
  0xbb   : > { %498 = vst [vmem:[#allocation2 + $0xc9] sm:$0xff] %v4868_v44  ;;  %6697 = vst [vmem:[#allocation22_spill] sm:$0xff] %v4882_v53  ;;  %v796_v30 = vadd.f32 %v764_v23, %v692_v21  ;;  %v797_v31 = vadd.f32 %v765_v28, %v693_v22  ;;  %v1076_v60 = vmul.f32 %v4751_v32, %v1347_v5  ;;  %v4893_v7 = vld [vmem:[#allocation2 + $0x48] sm:$0xff]  ;;  %v4907_v28 = vld [vmem:[#allocation2 + $0x52] sm:$0xff] }
  0xbc   : > { %499 = vst [vmem:[#allocation2 + $0xd9] sm:$0xff] %v4871_v19  ;;  %6698 = vst [vmem:[#allocation23_spill] sm:$0xff] %v4886_v58  ;;  %v1077_v0 = vmul.f32 %v4751_v32, %v1348_v6  ;;  %v1106_v11 = vadd.f32 %v1074_v61, %v1002_v20  ;;  %v1107_v19 = vadd.f32 %v1075_v2, %v1003_v45  ;;  %v4905_v23 = vld [vmem:[#allocation2 + $0x4a] sm:$0xff] }
  0xbd   : > { %6699 = vst [vmem:[#allocation24_spill] sm:$0xff] %v4889_v59  ;;  %500 = vst [vmem:[#allocation2 + $0xe1] sm:$0xff] %v4882_v53  ;;  %v1181_v21 = vmul.f32 %v4753_v33, %v4893_v7  ;;  %v1182_v22 = vmul.f32 %v4753_v33, %v4895_v10  ;;  %v901_v53 = vadd.f32 %v869_v52, %v797_v31  ;;  %v4926_v31 = vld [vmem:[%s4700_s14 + $0xa8] sm:$0xff] }
  0xbe   : > { %501 = vst [vmem:[#allocation2 + $0xf1] sm:$0xff] %v4886_v58  ;;  %502 = vst [vmem:[#allocation2 + $0xf9] sm:$0xff] %v4889_v59  ;;  %v4085_v58 = vld [vmem:[#allocation8 + $0x38] sm:$0xff]   ;;  %v900_v59 = vadd.f32 %v868_v51, %v796_v30  ;;  %v1389_v35 = vmul.f32 %v4765_v38, %v4905_v23  ;;  %v1390_v61 = vmul.f32 %v4765_v38, %v4907_v28 }
  0xbf   : > { %v1211_v2 = vadd.f32 %v1179_v3, %v1106_v11  ;;  %v1212_v20 = vadd.f32 %v1180_v4, %v1107_v19  ;;  %v558_v45 = vmul.f32 %v4718_v9, %v4824_v62  ;;  %v559_v44 = vmul.f32 %v4718_v9, %v4826_v63  ;;  %v4923_v30 = vld [vmem:[%s4700_s14 + $0xa0] sm:$0xff]  ;;  %504 = vst [vmem:[#allocation2 + $0x111] sm:$0xff] %v4926_v31 }
  0xc0   : > { %v1004_v29 = vadd.f32 %v4774_v41, %v900_v59  ;;  %v1005_v17 = vadd.f32 %v4777_v42, %v901_v53  ;;  %v766_v51 = vmul.f32 %v4725_v18, %v1347_v5  ;;  %v767_v52 = vmul.f32 %v4725_v18, %v1348_v6  ;;  %503 = vst [vmem:[#allocation2 + $0x109] sm:$0xff] %v4923_v30  ;;  %v4938_v42 = vld [vmem:[%s6646_s2] ss:$0 sm:$0xff] }
  0xc1   : > { %v1315_v3 = vadd.f32 %v4760_v36, %v1211_v2  ;;  %v1316_v62 = vadd.f32 %v4763_v37, %v1212_v20  ;;  %v694_v63 = vadd.f32 %v4740_v26, %v558_v45  ;;  %v695_v41 = vadd.f32 %v4743_v27, %v559_v44  ;;  %3910 = vmatprep.subr.bf16.mxu0 %v4085_v58  ;;  %v4962_v2 = vld [vmem:[#allocation2 + $0x62] sm:$0xff] }
  0xc2   : > { %v1108_v4 = vadd.f32 %v1076_v60, %v1004_v29  ;;  %v1109_v1 = vadd.f32 %v1077_v0, %v1005_v17  ;;  %v870_v36 = vmul.f32 %v4735_v24, %v4893_v7  ;;  %v871_v26 = vmul.f32 %v4735_v24, %v4895_v10  ;;  %3911 = vmatpush3.bf16.msra.mxu0 %v4085_v58  ;;  %v4954_v0 = vld [vmem:[#allocation2 + $0x68] sm:$0xff] }
  0xc3   : > { %v1419_v27 = vadd.f32 %v4841_v12, %v1315_v3  ;;  %v1420_v37 = vadd.f32 %v4844_v14, %v1316_v62  ;;  %v798_v5 = vadd.f32 %v766_v51, %v694_v63  ;;  %v799_v6 = vadd.f32 %v767_v52, %v695_v41  ;;  %v4952_v14 = vld [vmem:[#allocation2 + $0x60] sm:$0xff]  ;;  %v4966_v52 = vld [vmem:[#allocation2 + $0x6a] sm:$0xff] }
  0xc4   : > { %v1213_v44 = vadd.f32 %v1181_v21, %v1108_v4  ;;  %v1214_v19 = vadd.f32 %v1182_v22, %v1109_v1  ;;  %v1078_v53 = vmul.f32 %v4751_v32, %v4905_v23  ;;  %v1079_v17 = vmul.f32 %v4751_v32, %v4907_v28  ;;  %v4974_v3 = vld [vmem:[%s4700_s14 + $0xb8] sm:$0xff]  ;;  %v4987_v1 = vld [vmem:[%s4700_s14 + $0xc0] sm:$0xff] }
  0xc5   : > { %v1458_v29 = vadd.f32 %v4938_v42, %v1419_v27  ;;  %v1459_v59 = vadd.f32 %v4938_v42, %v1420_v37  ;;  %v902_v12 = vadd.f32 %v870_v36, %v798_v5  ;;  %v903_v60 = vadd.f32 %v871_v26, %v799_v6  ;;  %506 = vst [vmem:[#allocation2 + $0x129] sm:$0xff] %v4974_v3  ;;  %v4990_v36 = vld [vmem:[%s4700_s14 + $0xc8] sm:$0xff]  ;;  %v5004_v37 = vld [vmem:[%s4700_s14 + $0xd8] sm:$0xff]  ;;  %v5007_v5 = vld [vmem:[%s4700_s14 + $0xe0] sm:$0xff] }
  0xc6   : > { %v1317_v11 = vadd.f32 %v4786_v46, %v1213_v44  ;;  %v1318_v21 = vadd.f32 %v4790_v47, %v1214_v19  ;;  %v1183_v22 = vmul.f32 %v4753_v33, %v4952_v14  ;;  %v1184_v58 = vmul.f32 %v4753_v33, %v4954_v0  ;;  %v4971_v47 = vld [vmem:[%s4700_s14 + $0xb0] sm:$0xff]  ;;  %507 = vst [vmem:[#allocation2 + $0x139] sm:$0xff] %v4987_v1 }
  0xc7   : > { %v1490_v20 = vpack.c.bf16 %v1459_v59, %v1458_v29  ;;  %v1006_v45 = vadd.f32 %v4805_v54, %v902_v12  ;;  %v1007_v51 = vadd.f32 %v4809_v55, %v903_v60  ;;  %v1391_v46 = vmul.f32 %v4765_v38, %v4962_v2  ;;  %505 = vst [vmem:[#allocation2 + $0x121] sm:$0xff] %v4971_v47 }
  0xc8   : > { %v1421_v62 = vadd.f32 %v1389_v35, %v1317_v11  ;;  %v1422_v63 = vadd.f32 %v1390_v61, %v1318_v21  ;;  %v1392_v41 = vmul.f32 %v4765_v38, %v4966_v52  ;;  %v560_v54 = vmul.f32 %v4718_v9, %v4893_v7  ;;  %508 = vst [vmem:[#allocation2 + $0x141] sm:$0xff] %v4990_v36 }
  0xc9   : > { %3912 = vmatprep.mubr.bf16.mxu0 %v1490_v20  ;;  %v1110_v55 = vadd.f32 %v1078_v53, %v1006_v45  ;;  %v1111_v4 = vadd.f32 %v1079_v17, %v1007_v51  ;;  %v561_v35 = vmul.f32 %v4718_v9, %v4895_v10  ;;  %v664_v61 = vmul.f32 %v4721_v13, %v4768_v39  ;;  %v5001_v39 = vld [vmem:[%s4700_s14 + $0xd0] sm:$0xff]  ;;  %v5021_v17 = vld [vmem:[%s4700_s14 + $0xf8] sm:$0xff] }
  0xca   : > { %v1460_v7 = vadd.f32 %v4938_v42, %v1421_v62  ;;  %v1461_v26 = vadd.f32 %v4938_v42, %v1422_v63  ;;  %v665_v27 = vmul.f32 %v4721_v13, %v4771_v40  ;;  %v768_v10 = vmul.f32 %v4725_v18, %v4905_v23  ;;  %509 = vst [vmem:[#allocation2 + $0x151] sm:$0xff] %v5001_v39  ;;  %v5014_v23 = vld [vmem:[%s4700_s14 + $0xe8] sm:$0xff]  ;;  %v5018_v53 = vld [vmem:[%s4700_s14 + $0xf0] sm:$0xff] }
  0xcb   : > { %v1215_v6 = vadd.f32 %v1183_v22, %v1110_v55  ;;  %v1216_v44 = vadd.f32 %v1184_v58, %v1111_v4  ;;  %v696_v19 = vadd.f32 %v664_v61, %v560_v54  ;;  %v769_v40 = vmul.f32 %v4725_v18, %v4907_v28  ;;  %510 = vst [vmem:[#allocation2 + $0x159] sm:$0xff] %v5004_v37  ;;  %v1145_v58 = vld [vmem:[#allocation2 + $0x78] sm:$0xff] }
  0xcc   : > { %511 = vst [vmem:[#allocation2 + $0x169] sm:$0xff] %v5007_v5  ;;  %v1491_v29 = vpack.c.bf16 %v1461_v26, %v1460_v7  ;;  %v697_v59 = vadd.f32 %v665_v27, %v561_v35  ;;  %v872_v12 = vmul.f32 %v4735_v24, %v4952_v14  ;;  %v873_v28 = vmul.f32 %v4735_v24, %v4954_v0  ;;  %v1353_v26 = vld [vmem:[#allocation2 + $0x7a] sm:$0xff] }
  0xcd   : > { %512 = vst [vmem:[#allocation2 + $0x171] sm:$0xff] %v5014_v23  ;;  %513 = vst [vmem:[#allocation2 + $0x181] sm:$0xff] %v5018_v53  ;;  %v1319_v60 = vadd.f32 %v4813_v56, %v1215_v6  ;;  %v1320_v11 = vadd.f32 %v4817_v57, %v1216_v44  ;;  %v800_v21 = vadd.f32 %v768_v10, %v696_v19  ;;  %v1146_v57 = vld [vmem:[#allocation2 + $0x80] sm:$0xff] }
  0xce   : > { %514 = vst [vmem:[#allocation2 + $0x189] sm:$0xff] %v5021_v17  ;;  %v976_v22 = vmul.f32 %v4737_v25, %v4780_v43  ;;  %3913 = vmatmul.mubr.bf16.vlgmr.msra.gmra.mrb[0].mxu0 %v1491_v29  ;;  %v801_v20 = vadd.f32 %v769_v40, %v697_v59  ;;  %v977_v45 = vmul.f32 %v4737_v25, %v4793_v48 }
  0xcf   : > { %v1080_v51 = vmul.f32 %v4751_v32, %v4962_v2  ;;  %v1081_v62 = vmul.f32 %v4751_v32, %v4966_v52  ;;  %v1423_v63 = vadd.f32 %v1391_v46, %v1319_v60  ;;  %v1424_v56 = vadd.f32 %v1392_v41, %v1320_v11  ;;  %v1354_v41 = vld [vmem:[#allocation2 + $0x82] sm:$0xff] }
  0xd0   : > { %v904_v54 = vadd.f32 %v872_v12, %v800_v21  ;;  %v1185_v55 = vmul.f32 %v4753_v33, %v1145_v58  ;;  %v905_v4 = vadd.f32 %v873_v28, %v801_v20  ;;  %v1186_v35 = vmul.f32 %v4753_v33, %v1146_v57 }
  0xd1   : > { %v1289_v61 = vmul.f32 %v4755_v34, %v4797_v49  ;;  %v1290_v7 = vmul.f32 %v4755_v34, %v4800_v50  ;;  %v1462_v27 = vadd.f32 %v4938_v42, %v1423_v63  ;;  %v1463_v10 = vadd.f32 %v4938_v42, %v1424_v56  ;;  %v5064_v63 = vld [vmem:[#allocation2 + $0x90] sm:$0xff] }
  0xd2   : > { %v1008_v46 = vadd.f32 %v976_v22, %v904_v54  ;;  %v1393_v6 = vmul.f32 %v4765_v38, %v1353_v26  ;;  %v1009_v44 = vadd.f32 %v977_v45, %v905_v4  ;;  %v1394_v19 = vmul.f32 %v4765_v38, %v1354_v41 }
  0xd3   : > { %v562_v40 = vmul.f32 %v4718_v9, %v4952_v14  ;;  %v563_v29 = vmul.f32 %v4718_v9, %v4954_v0  ;;  %v1492_v59 = vpack.c.bf16 %v1463_v10, %v1462_v27  ;;  %v666_v28 = vmul.f32 %v4721_v13, %v4780_v43 }
  0xd4   : > { %v1112_v12 = vadd.f32 %v1080_v51, %v1008_v46  ;;  %v667_v60 = vmul.f32 %v4721_v13, %v4793_v48  ;;  %v1113_v11 = vadd.f32 %v1081_v62, %v1009_v44  ;;  %v770_v21 = vmul.f32 %v4725_v18, %v4962_v2 }
  0xd5   : > { %v771_v22 = vmul.f32 %v4725_v18, %v4966_v52  ;;  %v874_v14 = vmul.f32 %v4735_v24, %v1145_v58  ;;  %3916 = vmatprep.mubr.bf16.mxu0 %v1492_v59  ;;  %v698_v0 = vadd.f32 %v666_v28, %v562_v40  ;;  %v875_v51 = vmul.f32 %v4735_v24, %v1146_v57  ;;  %v5071_v52 = vld [vmem:[#allocation2 + $0x98] sm:$0xff] }
  0xd6   : > { %v1217_v20 = vadd.f32 %v1185_v55, %v1112_v12  ;;  %v699_v45 = vadd.f32 %v667_v60, %v563_v29  ;;  %v1218_v43 = vadd.f32 %v1186_v35, %v1113_v11  ;;  %v978_v48 = vmul.f32 %v4737_v25, %v4797_v49  ;;  %v1355_v59 = vld [vmem:[#allocation2 + $0x92] sm:$0xff]  ;;  %v1356_v12 = vld [vmem:[#allocation2 + $0x9a] sm:$0xff] }
  0xd7   : > { %v979_v2 = vmul.f32 %v4737_v25, %v4800_v50  ;;  %v1082_v62 = vmul.f32 %v4751_v32, %v1353_v26  ;;  %v802_v54 = vadd.f32 %v770_v21, %v698_v0  ;;  %v1083_v4 = vmul.f32 %v4751_v32, %v1354_v41 }
  0xd8   : > { %v1321_v56 = vadd.f32 %v1289_v61, %v1217_v20  ;;  %v803_v55 = vadd.f32 %v771_v22, %v699_v45  ;;  %v1322_v27 = vadd.f32 %v1290_v7, %v1218_v43  ;;  %v1187_v10 = vmul.f32 %v4753_v33, %v5064_v63 }
  0xd9   : > { %v1188_v35 = vmul.f32 %v4753_v33, %v5071_v52  ;;  %v1291_v46 = vmul.f32 %v4755_v34, %v4838_v8  ;;  %v906_v40 = vadd.f32 %v874_v14, %v802_v54  ;;  %v1292_v61 = vmul.f32 %v4755_v34, %v4847_v15 }
  0xda   : > { %v1425_v44 = vadd.f32 %v1393_v6, %v1321_v56  ;;  %v907_v29 = vadd.f32 %v875_v51, %v803_v55  ;;  %v1426_v28 = vadd.f32 %v1394_v19, %v1322_v27  ;;  %v1395_v7 = vmul.f32 %v4765_v38, %v1355_v59 }
  0xdb   : > { %v1396_v60 = vmul.f32 %v4765_v38, %v1356_v12  ;;  %v564_v11 = vmul.f32 %v4718_v9, %v1145_v58  ;;  %v1010_v22 = vadd.f32 %v978_v48, %v906_v40  ;;  %v565_v6 = vmul.f32 %v4718_v9, %v1146_v57  ;;  %v1150_v40 = vld [vmem:[#allocation2 + $0xb0] sm:$0xff] }
  0xdc   : > { %v1464_v21 = vadd.f32 %v4938_v42, %v1425_v44  ;;  %v1011_v20 = vadd.f32 %v979_v2, %v907_v29  ;;  %v1465_v14 = vadd.f32 %v4938_v42, %v1426_v28  ;;  %v668_v0 = vmul.f32 %v4721_v13, %v4797_v49  ;;  %v1149_v44 = vld [vmem:[#allocation2 + $0xa8] sm:$0xff] }
  0xdd   : > { %v669_v19 = vmul.f32 %v4721_v13, %v4800_v50  ;;  %v772_v45 = vmul.f32 %v4725_v18, %v1353_v26  ;;  %v1114_v51 = vadd.f32 %v1082_v62, %v1010_v22  ;;  %v773_v58 = vmul.f32 %v4725_v18, %v1354_v41 }
  0xde   : > { %v1115_v43 = vadd.f32 %v1083_v4, %v1011_v20  ;;  %v876_v48 = vmul.f32 %v4735_v24, %v5064_v63  ;;  %v1493_v2 = vpack.c.bf16 %v1465_v14, %v1464_v21  ;;  %v700_v56 = vadd.f32 %v668_v0, %v564_v11  ;;  %v6700_v20 = vld [vmem:[#allocation18_spill] sm:$0xff]  ;;  %v1357_v14 = vld [vmem:[#allocation2 + $0xaa] sm:$0xff]  ;;  %v1358_v0 = vld [vmem:[#allocation2 + $0xb2] sm:$0xff] }
  0xdf   : > { %v701_v57 = vadd.f32 %v669_v19, %v565_v6  ;;  %v877_v54 = vmul.f32 %v4735_v24, %v5071_v52  ;;  %v1219_v55 = vadd.f32 %v1187_v10, %v1114_v51  ;;  %v980_v50 = vmul.f32 %v4737_v25, %v4838_v8 }
  0xe0   : > { %v1220_v49 = vadd.f32 %v1188_v35, %v1115_v43  ;;  %v981_v26 = vmul.f32 %v4737_v25, %v4847_v15  ;;  %3917 = vmatmul.mubr.bf16.gmra.mrb[4].mxu0 %v1493_v2  ;;  %v804_v62 = vadd.f32 %v772_v45, %v700_v56  ;;  %v1084_v4 = vmul.f32 %v4751_v32, %v1355_v59 }
  0xe1   : > { %v805_v41 = vadd.f32 %v773_v58, %v701_v57  ;;  %v1085_v27 = vmul.f32 %v4751_v32, %v1356_v12  ;;  %v1323_v29 = vadd.f32 %v1291_v46, %v1219_v55  ;;  %v1189_v10 = vmul.f32 %v4753_v33, %v1149_v44 }
  0xe2   : > { %v1324_v28 = vadd.f32 %v1292_v61, %v1220_v49  ;;  %v1190_v35 = vmul.f32 %v4753_v33, %v1150_v40  ;;  %v908_v11 = vadd.f32 %v876_v48, %v804_v62  ;;  %v1293_v22 = vmul.f32 %v4755_v34, %v4851_v16 }
  0xe3   : > { %v909_v21 = vadd.f32 %v877_v54, %v805_v41  ;;  %v1294_v6 = vmul.f32 %v4755_v34, %v6700_v20  ;;  %v1427_v19 = vadd.f32 %v1395_v7, %v1323_v29  ;;  %v1397_v51 = vmul.f32 %v4765_v38, %v1357_v14 }
  0xe4   : > { %v1428_v45 = vadd.f32 %v1396_v60, %v1324_v28  ;;  %v1398_v46 = vmul.f32 %v4765_v38, %v1358_v0  ;;  %v1012_v61 = vadd.f32 %v980_v50, %v908_v11  ;;  %v566_v58 = vmul.f32 %v4718_v9, %v5064_v63 }
  0xe5   : > { %v1013_v43 = vadd.f32 %v981_v26, %v909_v21  ;;  %v567_v48 = vmul.f32 %v4718_v9, %v5071_v52  ;;  %v1466_v2 = vadd.f32 %v4938_v42, %v1427_v19  ;;  %v670_v7 = vmul.f32 %v4721_v13, %v4838_v8 }
  0xe6   : > { %v1467_v56 = vadd.f32 %v4938_v42, %v1428_v45  ;;  %v671_v60 = vmul.f32 %v4721_v13, %v4847_v15  ;;  %v1116_v57 = vadd.f32 %v1084_v4, %v1012_v61  ;;  %v774_v55 = vmul.f32 %v4725_v18, %v1355_v59 }
  0xe7   : > { %v1117_v54 = vadd.f32 %v1085_v27, %v1013_v43  ;;  %v775_v49 = vmul.f32 %v4725_v18, %v1356_v12  ;;  %v702_v50 = vadd.f32 %v670_v7, %v566_v58  ;;  %v878_v52 = vmul.f32 %v4735_v24, %v1149_v44  ;;  %v1151_v27 = vld [vmem:[#allocation2 + $0xc0] sm:$0xff]  ;;  %v6702_v7 = vld [vmem:[#allocation20_spill] sm:$0xff] }
  0xe8   : > { %v1494_v63 = vpack.c.bf16 %v1467_v56, %v1466_v2  ;;  %v703_v26 = vadd.f32 %v671_v60, %v567_v48  ;;  %v1221_v62 = vadd.f32 %v1189_v10, %v1116_v57  ;;  %v879_v29 = vmul.f32 %v4735_v24, %v1150_v40  ;;  %v1152_v10 = vld [vmem:[#allocation2 + $0xc8] sm:$0xff] }
  0xe9   : > { %v1222_v41 = vadd.f32 %v1190_v35, %v1117_v54  ;;  %v982_v8 = vmul.f32 %v4737_v25, %v4851_v16  ;;  %v806_v15 = vadd.f32 %v774_v55, %v702_v50  ;;  %v983_v59 = vmul.f32 %v4737_v25, %v6700_v20  ;;  %v6701_v43 = vld [vmem:[#allocation19_spill] sm:$0xff] }
  0xea   : > { %3920 = vmatprep.mubr.bf16.mxu0 %v1494_v63  ;;  %v807_v4 = vadd.f32 %v775_v49, %v703_v26  ;;  %v1086_v12 = vmul.f32 %v4751_v32, %v1357_v14  ;;  %v1325_v28 = vadd.f32 %v1293_v22, %v1221_v62  ;;  %v1087_v21 = vmul.f32 %v4751_v32, %v1358_v0  ;;  %v1359_v48 = vld [vmem:[#allocation2 + $0xc2] sm:$0xff]  ;;  %v1360_v22 = vld [vmem:[#allocation2 + $0xca] sm:$0xff] }
  0xeb   : > { %v1326_v11 = vadd.f32 %v1294_v6, %v1222_v41  ;;  %v1191_v35 = vmul.f32 %v4753_v33, %v1151_v27  ;;  %v910_v19 = vadd.f32 %v878_v52, %v806_v15  ;;  %v1192_v61 = vmul.f32 %v4753_v33, %v1152_v10 }
  0xec   : > { %v911_v45 = vadd.f32 %v879_v29, %v807_v4  ;;  %v1295_v58 = vmul.f32 %v4755_v34, %v6701_v43  ;;  %v1429_v2 = vadd.f32 %v1397_v51, %v1325_v28  ;;  %v1296_v60 = vmul.f32 %v4755_v34, %v6702_v7 }
  0xed   : > { %v1430_v56 = vadd.f32 %v1398_v46, %v1326_v11  ;;  %v1399_v6 = vmul.f32 %v4765_v38, %v1359_v48  ;;  %v1014_v57 = vadd.f32 %v982_v8, %v910_v19  ;;  %v1400_v55 = vmul.f32 %v4765_v38, %v1360_v22 }
  0xee   : > { %v1015_v54 = vadd.f32 %v983_v59, %v911_v45  ;;  %v568_v49 = vmul.f32 %v4718_v9, %v1149_v44  ;;  %v1468_v63 = vadd.f32 %v4938_v42, %v1429_v2  ;;  %v569_v26 = vmul.f32 %v4718_v9, %v1150_v40  ;;  %v1154_v45 = vld [vmem:[#allocation2 + $0xe0] sm:$0xff] }
  0xef   : > { %v1469_v50 = vadd.f32 %v4938_v42, %v1430_v56  ;;  %v672_v51 = vmul.f32 %v4721_v13, %v4851_v16  ;;  %v1118_v46 = vadd.f32 %v1086_v12, %v1014_v57  ;;  %v673_v62 = vmul.f32 %v4721_v13, %v6700_v20  ;;  %v6703_v57 = vld [vmem:[#allocation21_spill] sm:$0xff] }
  0xf0   : > { %v1119_v52 = vadd.f32 %v1087_v21, %v1015_v54  ;;  %v776_v41 = vmul.f32 %v4725_v18, %v1357_v14  ;;  %v777_v44 = vmul.f32 %v4725_v18, %v1358_v0  ;;  %v880_v15 = vmul.f32 %v4735_v24, %v1151_v27 }
  0xf1   : > { %v1495_v29 = vpack.c.bf16 %v1469_v50, %v1468_v63  ;;  %v704_v8 = vadd.f32 %v672_v51, %v568_v49  ;;  %v1223_v4 = vadd.f32 %v1191_v35, %v1118_v46  ;;  %v705_v28 = vadd.f32 %v673_v62, %v569_v26  ;;  %v1153_v35 = vld [vmem:[#allocation2 + $0xd8] sm:$0xff]  ;;  %v1362_v51 = vld [vmem:[#allocation2 + $0xe2] sm:$0xff] }
  0xf2   : > { %v1224_v59 = vadd.f32 %v1192_v61, %v1119_v52  ;;  %v881_v40 = vmul.f32 %v4735_v24, %v1152_v10  ;;  %v984_v12 = vmul.f32 %v4737_v25, %v6701_v43  ;;  %v985_v20 = vmul.f32 %v4737_v25, %v6702_v7  ;;  %v6704_v26 = vld [vmem:[#allocation22_spill] sm:$0xff] }
  0xf3   : > { %3921 = vmatmul.mubr.bf16.gmra.mrb[8].mxu0 %v1495_v29  ;;  %v808_v16 = vadd.f32 %v776_v41, %v704_v8  ;;  %v1088_v14 = vmul.f32 %v4751_v32, %v1359_v48  ;;  %v1327_v11 = vadd.f32 %v1295_v58, %v1223_v4  ;;  %v809_v0 = vadd.f32 %v777_v44, %v705_v28 }
  0xf4   : > { %v1328_v21 = vadd.f32 %v1296_v60, %v1224_v59  ;;  %v1089_v19 = vmul.f32 %v4751_v32, %v1360_v22  ;;  %v1193_v2 = vmul.f32 %v4753_v33, %v1153_v35  ;;  %v1194_v56 = vmul.f32 %v4753_v33, %v1154_v45  ;;  %v1361_v60 = vld [vmem:[#allocation2 + $0xda] sm:$0xff] }
  0xf5   : > { %v912_v61 = vadd.f32 %v880_v15, %v808_v16  ;;  %v1297_v54 = vmul.f32 %v4755_v34, %v6703_v57  ;;  %v1431_v49 = vadd.f32 %v1399_v6, %v1327_v11  ;;  %v913_v50 = vadd.f32 %v881_v40, %v809_v0 }
  0xf6   : > { %v1432_v63 = vadd.f32 %v1400_v55, %v1328_v21  ;;  %v1298_v58 = vmul.f32 %v4755_v34, %v6704_v26  ;;  %v1401_v52 = vmul.f32 %v4765_v38, %v1361_v60  ;;  %v1402_v62 = vmul.f32 %v4765_v38, %v1362_v51 }
  0xf7   : > { %v1016_v46 = vadd.f32 %v984_v12, %v912_v61  ;;  %v570_v41 = vmul.f32 %v4718_v9, %v1151_v27  ;;  %v1470_v29 = vadd.f32 %v4938_v42, %v1431_v49  ;;  %v1017_v44 = vadd.f32 %v985_v20, %v913_v50  ;;  %v1155_v61 = vld [vmem:[#allocation2 + $0xf0] sm:$0xff]  ;;  %v6705_v50 = vld [vmem:[#allocation23_spill] sm:$0xff] }
  0xf8   : > { %v1471_v8 = vadd.f32 %v4938_v42, %v1432_v63  ;;  %v571_v6 = vmul.f32 %v4718_v9, %v1152_v10  ;;  %v674_v15 = vmul.f32 %v4721_v13, %v6701_v43  ;;  %v675_v4 = vmul.f32 %v4721_v13, %v6702_v7 }
  0xf9   : > { %v1120_v55 = vadd.f32 %v1088_v14, %v1016_v46  ;;  %v778_v59 = vmul.f32 %v4725_v18, %v1359_v48  ;;  %v1121_v40 = vadd.f32 %v1089_v19, %v1017_v44  ;;  %v779_v27 = vmul.f32 %v4725_v18, %v1360_v22  ;;  %v6706_v44 = vld [vmem:[#allocation24_spill] sm:$0xff] }
  0xfa   : > { %v1496_v28 = vpack.c.bf16 %v1471_v8, %v1470_v29  ;;  %v882_v16 = vmul.f32 %v4735_v24, %v1153_v35  ;;  %v706_v11 = vadd.f32 %v674_v15, %v570_v41  ;;  %v707_v20 = vadd.f32 %v675_v4, %v571_v6  ;;  %v1363_v6 = vld [vmem:[#allocation2 + $0xf2] sm:$0xff] }
  0xfb   : > { %v1225_v12 = vadd.f32 %v1193_v2, %v1120_v55  ;;  %v883_v10 = vmul.f32 %v4735_v24, %v1154_v45  ;;  %v1226_v14 = vadd.f32 %v1194_v56, %v1121_v40  ;;  %v986_v43 = vmul.f32 %v4737_v25, %v6703_v57  ;;  %v1156_v2 = vld [vmem:[#allocation2 + $0xf8] sm:$0xff] }
  0xfc   : > { %3924 = vmatprep.mubr.bf16.mxu0 %v1496_v28  ;;  %v987_v7 = vmul.f32 %v4737_v25, %v6704_v26  ;;  %v1090_v48 = vmul.f32 %v4751_v32, %v1361_v60  ;;  %v810_v0 = vadd.f32 %v778_v59, %v706_v11  ;;  %v811_v22 = vadd.f32 %v779_v27, %v707_v20  ;;  %v1364_v55 = vld [vmem:[#allocation2 + $0xfa] sm:$0xff] }
  0xfd   : > { %v1329_v21 = vadd.f32 %v1297_v54, %v1225_v12  ;;  %v1091_v19 = vmul.f32 %v4751_v32, %v1362_v51  ;;  %v1330_v49 = vadd.f32 %v1298_v58, %v1226_v14  ;;  %v1195_v63 = vmul.f32 %v4753_v33, %v1155_v61 }
  0xfe   : > { %v1196_v56 = vmul.f32 %v4753_v33, %v1156_v2  ;;  %v1299_v46 = vmul.f32 %v4755_v34, %v6705_v50  ;;  %v914_v29 = vadd.f32 %v882_v16, %v810_v0  ;;  %v915_v8 = vadd.f32 %v883_v10, %v811_v22 }
  0xff   : > { %v1433_v41 = vadd.f32 %v1401_v52, %v1329_v21  ;;  %v1300_v54 = vmul.f32 %v4755_v34, %v6706_v44  ;;  %v1434_v15 = vadd.f32 %v1402_v62, %v1330_v49  ;;  %v1403_v4 = vmul.f32 %v4765_v38, %v1363_v6  ;;  %v5210_v49 = vld [vmem:[#allocation2 + $0x108] sm:$0xff] }
 0x100   : > { %v1404_v58 = vmul.f32 %v4765_v38, %v1364_v55  ;;  %v572_v59 = vmul.f32 %v4718_v9, %v1153_v35  ;;  %v1018_v40 = vadd.f32 %v986_v43, %v914_v29  ;;  %v1019_v27 = vadd.f32 %v987_v7, %v915_v8 }
 0x101   : > { %v1472_v28 = vadd.f32 %v4938_v42, %v1433_v41  ;;  %v573_v52 = vmul.f32 %v4718_v9, %v1154_v45  ;;  %v1473_v16 = vadd.f32 %v4938_v42, %v1434_v15  ;;  %v676_v12 = vmul.f32 %v4721_v13, %v6703_v57  ;;  %v5212_v41 = vld [vmem:[#allocation2 + $0x110] sm:$0xff] }
 0x102   : > { %v677_v62 = vmul.f32 %v4721_v13, %v6704_v26  ;;  %v780_v11 = vmul.f32 %v4725_v18, %v1361_v60  ;;  %v1122_v20 = vadd.f32 %v1090_v48, %v1018_v40  ;;  %v1123_v10 = vadd.f32 %v1091_v19, %v1019_v27  ;;  %v5222_v27 = vld [vmem:[#allocation2 + $0x10a] sm:$0xff] }
 0x103   : > { %v781_v35 = vmul.f32 %v4725_v18, %v1362_v51  ;;  %v884_v14 = vmul.f32 %v4735_v24, %v1155_v61  ;;  %v1497_v43 = vpack.c.bf16 %v1473_v16, %v1472_v28  ;;  %v708_v7 = vadd.f32 %v676_v12, %v572_v59 }
 0x104   : > { %v709_v21 = vadd.f32 %v677_v62, %v573_v52  ;;  %v885_v45 = vmul.f32 %v4735_v24, %v1156_v2  ;;  %v1227_v0 = vadd.f32 %v1195_v63, %v1122_v20  ;;  %v1228_v22 = vadd.f32 %v1196_v56, %v1123_v10  ;;  %v5224_v52 = vld [vmem:[#allocation2 + $0x112] sm:$0xff] }
 0x105   : > { %v988_v57 = vmul.f32 %v4737_v25, %v6705_v50  ;;  %v989_v26 = vmul.f32 %v4737_v25, %v6706_v44  ;;  %3925 = vmatmul.mubr.bf16.gmra.mrb[12].mxu0 %v1497_v43  ;;  %v812_v60 = vadd.f32 %v780_v11, %v708_v7  ;;  %v1092_v51 = vmul.f32 %v4751_v32, %v1363_v6 }
 0x106   : > { %v813_v48 = vadd.f32 %v781_v35, %v709_v21  ;;  %v1093_v19 = vmul.f32 %v4751_v32, %v1364_v55  ;;  %v1331_v29 = vadd.f32 %v1299_v46, %v1227_v0  ;;  %v1332_v63 = vadd.f32 %v1300_v54, %v1228_v22 }
 0x107   : > { %v1197_v56 = vmul.f32 %v4753_v33, %v5210_v49  ;;  %v1198_v8 = vmul.f32 %v4753_v33, %v5212_v41  ;;  %v916_v15 = vadd.f32 %v884_v14, %v812_v60  ;;  %v1301_v28 = vmul.f32 %v4755_v34, %v4923_v30 }
 0x108   : > { %v917_v59 = vadd.f32 %v885_v45, %v813_v48  ;;  %v1302_v40 = vmul.f32 %v4755_v34, %v4926_v31  ;;  %v1435_v46 = vadd.f32 %v1403_v4, %v1331_v29  ;;  %v1436_v54 = vadd.f32 %v1404_v58, %v1332_v63  ;;  %v5258_v29 = vld [vmem:[#allocation6 + $0x6] ss:$0 sm:$0xff]  ;;  %v5262_v63 = vld [vmem:[#allocation6 + $0x7] ss:$0 sm:$0xff] }
 0x109   : > { %v1405_v16 = vmul.f32 %v4765_v38, %v5222_v27  ;;  %v1406_v12 = vmul.f32 %v4765_v38, %v5224_v52  ;;  %v1020_v62 = vadd.f32 %v988_v57, %v916_v15  ;;  %v574_v20 = vmul.f32 %v4718_v9, %v1155_v61 }
 0x10a   : > { %v1021_v11 = vadd.f32 %v989_v26, %v917_v59  ;;  %v575_v10 = vmul.f32 %v4718_v9, %v1156_v2  ;;  %v1474_v34 = vadd.f32 %v4938_v42, %v1435_v46  ;;  %v1475_v35 = vadd.f32 %v4938_v42, %v1436_v54 }
 0x10b   : > { %v678_v4 = vmul.f32 %v4721_v13, %v6705_v50  ;;  %v679_v58 = vmul.f32 %v4721_v13, %v6706_v44  ;;  %v1124_v14 = vadd.f32 %v1092_v51, %v1020_v62  ;;  %v782_v38 = vmul.f32 %v4725_v18, %v1363_v6 }
 0x10c   : > { %v1125_v43 = vadd.f32 %v1093_v19, %v1021_v11  ;;  %v783_v7 = vmul.f32 %v4725_v18, %v1364_v55  ;;  %v1498_v21 = vpack.c.bf16 %v1475_v35, %v1474_v34  ;;  %v886_v9 = vmul.f32 %v4735_v24, %v5210_v49  ;;  %v5250_v55 = vld [vmem:[#allocation2 + $0x120] sm:$0xff]  ;;  %v5278_v11 = vld [vmem:[#allocation6] ss:$0 sm:$0xff]  ;;  %v5286_v34 = vld [vmem:[#allocation6 + $0x1] ss:$0 sm:$0xff] }
 0x10d   : > { %v710_v61 = vadd.f32 %v678_v4, %v574_v20  ;;  %v711_v45 = vadd.f32 %v679_v58, %v575_v10  ;;  %v1229_v2 = vadd.f32 %v1197_v56, %v1124_v14  ;;  %v887_v50 = vmul.f32 %v4735_v24, %v5212_v41  ;;  %v5254_v24 = vld [vmem:[#allocation2 + $0x128] sm:$0xff] }
 0x10e   : > { %v1230_v0 = vadd.f32 %v1198_v8, %v1125_v43  ;;  %v990_v13 = vmul.f32 %v4737_v25, %v4923_v30  ;;  %3928 = vmatprep.mubr.bf16.mxu0 %v1498_v21  ;;  %v991_v18 = vmul.f32 %v4737_v25, %v4926_v31  ;;  %v1094_v6 = vmul.f32 %v4751_v32, %v5222_v27  ;;  %v5266_v8 = vld [vmem:[#allocation2 + $0x122] sm:$0xff]  ;;  %v5292_v43 = vld [vmem:[#allocation6 + $0x2] ss:$0 sm:$0xff]  ;;  %v5298_v21 = vld [vmem:[#allocation6 + $0x3] ss:$0 sm:$0xff] }
 0x10f   : > { %v814_v44 = vadd.f32 %v782_v38, %v710_v61  ;;  %v815_v22 = vadd.f32 %v783_v7, %v711_v45  ;;  %v1333_v57 = vadd.f32 %v1301_v28, %v1229_v2  ;;  %v1095_v60 = vmul.f32 %v4751_v32, %v5224_v52  ;;  %v5272_v28 = vld [vmem:[#allocation6 + $0x8] ss:$0 sm:$0xff] }
 0x110   : > { %v1334_v26 = vadd.f32 %v1302_v40, %v1230_v0  ;;  %v1199_v48 = vmul.f32 %v4753_v33, %v5250_v55  ;;  %v1200_v25 = vmul.f32 %v5258_v29, %v5254_v24  ;;  %v1303_v56 = vmul.f32 %v5262_v63, %v4971_v47  ;;  %v5270_v33 = vld [vmem:[#allocation2 + $0x12a] sm:$0xff]  ;;  %v5304_v0 = vld [vmem:[#allocation6 + $0x4] ss:$0 sm:$0xff] }
 0x111   : > { %v918_v51 = vadd.f32 %v886_v9, %v814_v44  ;;  %v919_v19 = vadd.f32 %v887_v50, %v815_v22  ;;  %v1437_v32 = vadd.f32 %v1405_v16, %v1333_v57  ;;  %v1304_v59 = vmul.f32 %v5262_v63, %v4974_v3  ;;  %v5310_v50 = vld [vmem:[#allocation6 + $0x5] ss:$0 sm:$0xff]  ;;  %v1161_v57 = vld [vmem:[#allocation2 + $0x138] sm:$0xff] }
 0x112   : > { %v1438_v15 = vadd.f32 %v1406_v12, %v1334_v26  ;;  %v1407_v40 = vmul.f32 %v5272_v28, %v5266_v8  ;;  %v1408_v62 = vmul.f32 %v5272_v28, %v5270_v33  ;;  %v576_v16 = vmul.f32 %v5278_v11, %v5210_v49  ;;  %v1162_v26 = vld [vmem:[#allocation2 + $0x140] sm:$0xff] }
 0x113   : > { %v1022_v46 = vadd.f32 %v990_v13, %v918_v51  ;;  %v1023_v54 = vadd.f32 %v991_v18, %v919_v19  ;;  %v1476_v12 = vadd.f32 %v4938_v42, %v1437_v32  ;;  %v577_v10 = vmul.f32 %v5278_v11, %v5212_v41 }
 0x114   : > { %v1477_v20 = vadd.f32 %v4938_v42, %v1438_v15  ;;  %v680_v35 = vmul.f32 %v5286_v34, %v4923_v30  ;;  %v681_v14 = vmul.f32 %v5286_v34, %v4926_v31  ;;  %v784_v49 = vmul.f32 %v5292_v43, %v5222_v27 }
 0x115   : > { %v1126_v4 = vadd.f32 %v1094_v6, %v1022_v46  ;;  %v1127_v58 = vadd.f32 %v1095_v60, %v1023_v54  ;;  %v785_v41 = vmul.f32 %v5292_v43, %v5224_v52  ;;  %v888_v30 = vmul.f32 %v5298_v21, %v5250_v55  ;;  %v1370_v46 = vld [vmem:[#allocation2 + $0x142] sm:$0xff] }
 0x116   : > { %v1499_v38 = vpack.c.bf16 %v1477_v20, %v1476_v12  ;;  %v712_v7 = vadd.f32 %v680_v35, %v576_v16  ;;  %v713_v9 = vadd.f32 %v681_v14, %v577_v10  ;;  %v889_v31 = vmul.f32 %v5298_v21, %v5254_v24 }
 0x117   : > { %v1231_v61 = vadd.f32 %v1199_v48, %v1126_v4  ;;  %v1232_v45 = vadd.f32 %v1200_v25, %v1127_v58  ;;  %v992_v27 = vmul.f32 %v5304_v0, %v4971_v47  ;;  %v993_v52 = vmul.f32 %v5304_v0, %v4974_v3 }
 0x118   : > { %3929 = vmatmul.mubr.bf16.gmra.mrb[16].mxu0 %v1499_v38  ;;  %v816_v2 = vadd.f32 %v784_v49, %v712_v7  ;;  %v1096_v13 = vmul.f32 %v5310_v50, %v5266_v8  ;;  %v817_v18 = vadd.f32 %v785_v41, %v713_v9  ;;  %v1097_v6 = vmul.f32 %v5310_v50, %v5270_v33 }
 0x119   : > { %v1335_v44 = vadd.f32 %v1303_v56, %v1231_v61  ;;  %v1336_v22 = vadd.f32 %v1304_v59, %v1232_v45  ;;  %v1201_v48 = vmul.f32 %v5258_v29, %v1161_v57  ;;  %v1202_v51 = vmul.f32 %v5258_v29, %v1162_v26  ;;  %v1369_v59 = vld [vmem:[#allocation2 + $0x13a] sm:$0xff] }
 0x11a   : > { %v920_v60 = vadd.f32 %v888_v30, %v816_v2  ;;  %v1305_v19 = vmul.f32 %v5262_v63, %v4987_v1  ;;  %v921_v15 = vadd.f32 %v889_v31, %v817_v18  ;;  %v1306_v56 = vmul.f32 %v5262_v63, %v4990_v36 }
 0x11b   : > { %v1439_v25 = vadd.f32 %v1407_v40, %v1335_v44  ;;  %v1440_v32 = vadd.f32 %v1408_v62, %v1336_v22  ;;  %v1409_v16 = vmul.f32 %v5272_v28, %v1369_v59  ;;  %v1410_v12 = vmul.f32 %v5272_v28, %v1370_v46 }
 0x11c   : > { %v1024_v54 = vadd.f32 %v992_v27, %v920_v60  ;;  %v578_v20 = vmul.f32 %v5278_v11, %v5250_v55  ;;  %v1025_v40 = vadd.f32 %v993_v52, %v921_v15  ;;  %v579_v62 = vmul.f32 %v5278_v11, %v5254_v24  ;;  %v1163_v52 = vld [vmem:[#allocation2 + $0x150] sm:$0xff] }
 0x11d   : > { %v1478_v10 = vadd.f32 %v4938_v42, %v1439_v25  ;;  %v1479_v35 = vadd.f32 %v4938_v42, %v1440_v32  ;;  %v682_v58 = vmul.f32 %v5286_v34, %v4971_v47  ;;  %v683_v14 = vmul.f32 %v5286_v34, %v4974_v3  ;;  %v1371_v25 = vld [vmem:[#allocation2 + $0x152] sm:$0xff]  ;;  %v1372_v32 = vld [vmem:[#allocation2 + $0x15a] sm:$0xff] }
 0x11e   : > { %v1128_v4 = vadd.f32 %v1096_v13, %v1024_v54  ;;  %v786_v49 = vmul.f32 %v5292_v43, %v5266_v8  ;;  %v1129_v55 = vadd.f32 %v1097_v6, %v1025_v40  ;;  %v787_v7 = vmul.f32 %v5292_v43, %v5270_v33  ;;  %v1164_v13 = vld [vmem:[#allocation2 + $0x158] sm:$0xff] }
 0x11f   : > { %v1500_v38 = vpack.c.bf16 %v1479_v35, %v1478_v10  ;;  %v890_v41 = vmul.f32 %v5298_v21, %v1161_v57  ;;  %v714_v61 = vadd.f32 %v682_v58, %v578_v20  ;;  %v715_v24 = vadd.f32 %v683_v14, %v579_v62 }
 0x120   : > { %v1233_v30 = vadd.f32 %v1201_v48, %v1128_v4  ;;  %v891_v45 = vmul.f32 %v5298_v21, %v1162_v26  ;;  %v1234_v47 = vadd.f32 %v1202_v51, %v1129_v55  ;;  %v994_v3 = vmul.f32 %v5304_v0, %v4987_v1 }
 0x121   : > { %3932 = vmatprep.mubr.bf16.mxu0 %v1500_v38  ;;  %v995_v8 = vmul.f32 %v5304_v0, %v4990_v36  ;;  %v1098_v9 = vmul.f32 %v5310_v50, %v1369_v59  ;;  %v818_v2 = vadd.f32 %v786_v49, %v714_v61  ;;  %v819_v33 = vadd.f32 %v787_v7, %v715_v24 }
 0x122   : > { %v1337_v31 = vadd.f32 %v1305_v19, %v1233_v30  ;;  %v1099_v27 = vmul.f32 %v5310_v50, %v1370_v46  ;;  %v1338_v44 = vadd.f32 %v1306_v56, %v1234_v47  ;;  %v1203_v22 = vmul.f32 %v5258_v29, %v1163_v52  ;;  %v5372_v47 = vld [vmem:[#allocation2 + $0x170] sm:$0xff] }
 0x123   : > { %v1204_v18 = vmul.f32 %v5258_v29, %v1164_v13  ;;  %v1307_v6 = vmul.f32 %v5262_v63, %v5001_v39  ;;  %v922_v48 = vadd.f32 %v890_v41, %v818_v2  ;;  %v923_v51 = vadd.f32 %v891_v45, %v819_v33  ;;  %v1165_v45 = vld [vmem:[#allocation2 + $0x168] sm:$0xff] }
 0x124   : > { %v1441_v60 = vadd.f32 %v1409_v16, %v1337_v31  ;;  %v1308_v19 = vmul.f32 %v5262_v63, %v5004_v37  ;;  %v1442_v15 = vadd.f32 %v1410_v12, %v1338_v44  ;;  %v1411_v54 = vmul.f32 %v5272_v28, %v1371_v25 }
 0x125   : > { %v1412_v56 = vmul.f32 %v5272_v28, %v1372_v32  ;;  %v580_v20 = vmul.f32 %v5278_v11, %v1161_v57  ;;  %v1026_v35 = vadd.f32 %v994_v3, %v922_v48  ;;  %v1027_v40 = vadd.f32 %v995_v8, %v923_v51 }
 0x126   : > { %v1480_v10 = vadd.f32 %v4938_v42, %v1441_v60  ;;  %v581_v16 = vmul.f32 %v5278_v11, %v1162_v26  ;;  %v1481_v62 = vadd.f32 %v4938_v42, %v1442_v15  ;;  %v684_v4 = vmul.f32 %v5286_v34, %v4987_v1 }
 0x127   : > { %v685_v12 = vmul.f32 %v5286_v34, %v4990_v36  ;;  %v788_v58 = vmul.f32 %v5292_v43, %v1369_v59  ;;  %v1130_v14 = vadd.f32 %v1098_v9, %v1026_v35  ;;  %v1131_v49 = vadd.f32 %v1099_v27, %v1027_v40  ;;  %v5391_v35 = vld [vmem:[%s6646_s2] ss:$0 sm:$0xff] }
 0x128   : > { %v789_v57 = vmul.f32 %v5292_v43, %v1370_v46  ;;  %v892_v38 = vmul.f32 %v5298_v21, %v1163_v52  ;;  %v1501_v55 = vpack.c.bf16 %v1481_v62, %v1480_v10  ;;  %v716_v7 = vadd.f32 %v684_v4, %v580_v20 }
 0x129   : > { %v717_v41 = vadd.f32 %v685_v12, %v581_v16  ;;  %v893_v26 = vmul.f32 %v5298_v21, %v1164_v13  ;;  %v1235_v42 = vadd.f32 %v1203_v22, %v1130_v14  ;;  %v1236_v30 = vadd.f32 %v1204_v18, %v1131_v49  ;;  %v1373_v22 = vld [vmem:[#allocation2 + $0x16a] sm:$0xff]  ;;  %v5381_v18 = vld [vmem:[#allocation2 + $0x172] sm:$0xff] }
 0x12a   : > { %v996_v1 = vmul.f32 %v5304_v0, %v5001_v39  ;;  %v997_v36 = vmul.f32 %v5304_v0, %v5004_v37  ;;  %3933 = vmatmul.mubr.bf16.gmra.mrb[20].mxu0 %v1501_v55  ;;  %v820_v59 = vadd.f32 %v788_v58, %v716_v7  ;;  %v1100_v46 = vmul.f32 %v5310_v50, %v1371_v25 }
 0x12b   : > { %v821_v61 = vadd.f32 %v789_v57, %v717_v41  ;;  %v1101_v24 = vmul.f32 %v5310_v50, %v1372_v32  ;;  %v1339_v3 = vadd.f32 %v1307_v6, %v1235_v42  ;;  %v1340_v8 = vadd.f32 %v1308_v19, %v1236_v30  ;;  %v1167_v41 = vld [vmem:[#allocation2 + $0x180] sm:$0xff] }
 0x12c   : > { %v1205_v9 = vmul.f32 %v5258_v29, %v1165_v45  ;;  %v1206_v31 = vmul.f32 %v5258_v29, %v5372_v47  ;;  %v924_v2 = vadd.f32 %v892_v38, %v820_v59  ;;  %v1309_v27 = vmul.f32 %v5262_v63, %v5007_v5 }
 0x12d   : > { %v925_v33 = vadd.f32 %v893_v26, %v821_v61  ;;  %v1310_v44 = vmul.f32 %v5262_v63, %v5014_v23  ;;  %v1443_v60 = vadd.f32 %v1411_v54, %v1339_v3  ;;  %v1444_v48 = vadd.f32 %v1412_v56, %v1340_v8 }
 0x12e   : > { %v1413_v6 = vmul.f32 %v5272_v28, %v1373_v22  ;;  %v1414_v51 = vmul.f32 %v5272_v28, %v5381_v18  ;;  %v1028_v19 = vadd.f32 %v996_v1, %v924_v2  ;;  %v582_v20 = vmul.f32 %v5278_v11, %v1163_v52  ;;  %v1168_v1 = vld [vmem:[#allocation2 + $0x188] sm:$0xff] }
 0x12f   : > { %v1029_v15 = vadd.f32 %v997_v36, %v925_v33  ;;  %v583_v10 = vmul.f32 %v5278_v11, %v1164_v13  ;;  %v1482_v40 = vadd.f32 %v5391_v35, %v1443_v60  ;;  %v1483_v54 = vadd.f32 %v5391_v35, %v1444_v48 }
 0x130   : > { %v686_v56 = vmul.f32 %v5286_v34, %v5001_v39  ;;  %v687_v16 = vmul.f32 %v5286_v34, %v5004_v37  ;;  %v1132_v62 = vadd.f32 %v1100_v46, %v1028_v19  ;;  %v790_v52 = vmul.f32 %v5292_v43, %v1371_v25 }
 0x131   : > { %v1133_v4 = vadd.f32 %v1101_v24, %v1029_v15  ;;  %v791_v13 = vmul.f32 %v5292_v43, %v1372_v32  ;;  %v1502_v12 = vpack.c.bf16 %v1483_v54, %v1482_v40  ;;  %v894_v49 = vmul.f32 %v5298_v21, %v1165_v45  ;;  %v1375_v24 = vld [vmem:[#allocation2 + $0x182] sm:$0xff]  ;;  %v4233_v15 = vld [vmem:[#allocation2 + $0x171] sm:$0xff] }
 0x132   : > { %v718_v58 = vadd.f32 %v686_v56, %v582_v20  ;;  %v719_v14 = vadd.f32 %v687_v16, %v583_v10  ;;  %v1237_v57 = vadd.f32 %v1205_v9, %v1132_v62  ;;  %v895_v55 = vmul.f32 %v5298_v21, %v5372_v47  ;;  %v1376_v9 = vld [vmem:[#allocation2 + $0x18a] sm:$0xff] }
 0x133   : > { %v1238_v38 = vadd.f32 %v1206_v31, %v1133_v4  ;;  %v998_v39 = vmul.f32 %v5304_v0, %v5007_v5  ;;  %3936 = vmatprep.mubr.bf16.mxu0 %v1502_v12  ;;  %v999_v25 = vmul.f32 %v5304_v0, %v5014_v23  ;;  %v1102_v32 = vmul.f32 %v5310_v50, %v1373_v22 }
 0x134   : > { %v822_v37 = vadd.f32 %v790_v52, %v718_v58  ;;  %v823_v7 = vadd.f32 %v791_v13, %v719_v14  ;;  %v1341_v26 = vadd.f32 %v1309_v27, %v1237_v57  ;;  %v1103_v30 = vmul.f32 %v5310_v50, %v5381_v18  ;;  %v4234_v52 = vld [vmem:[#allocation2 + $0x181] sm:$0xff]  ;;  %v4235_v58 = vld [vmem:[#allocation2 + $0x189] sm:$0xff] }
 0x135   : > { %v1342_v42 = vadd.f32 %v1310_v44, %v1238_v38  ;;  %v1207_v36 = vmul.f32 %v5258_v29, %v1167_v41  ;;  %v1208_v5 = vmul.f32 %v5258_v29, %v1168_v1  ;;  %v1311_v46 = vmul.f32 %v5262_v63, %v5018_v53 }
 0x136   : > { %v926_v59 = vadd.f32 %v894_v49, %v822_v37  ;;  %v927_v61 = vadd.f32 %v895_v55, %v823_v7  ;;  %v1445_v23 = vadd.f32 %v1413_v6, %v1341_v26  ;;  %v1312_v8 = vmul.f32 %v5262_v63, %v5021_v17  ;;  %v4232_v6 = vld [vmem:[#allocation2 + $0x169] sm:$0xff]  ;;  %v5435_v37 = vld [vmem:[#allocation2] sm:$0xff] }
 0x137   : > { %v1446_v3 = vadd.f32 %v1414_v51, %v1342_v42  ;;  %v1415_v31 = vmul.f32 %v5272_v28, %v1375_v24  ;;  %v1416_v27 = vmul.f32 %v5272_v28, %v1376_v9  ;;  %v584_v44 = vmul.f32 %v5278_v11, %v1165_v45  ;;  %v1377_v26 = vld [vmem:[#allocation2 + $0x19a] sm:$0xff] }
 0x138   : > { %v1030_v2 = vadd.f32 %v998_v39, %v926_v59  ;;  %v1031_v33 = vadd.f32 %v999_v25, %v927_v61  ;;  %v1484_v60 = vadd.f32 %v5391_v35, %v1445_v23  ;;  %v585_v53 = vmul.f32 %v5278_v11, %v5372_v47  ;;  %v1274_v25 = vld [vmem:[#allocation2 + $0x1a1] sm:$0xff] }
 0x139   : > { %v1485_v48 = vadd.f32 %v5391_v35, %v1446_v3  ;;  %v688_v51 = vmul.f32 %v4232_v6, %v5286_v34  ;;  %v689_v20 = vmul.f32 %v4233_v15, %v5286_v34  ;;  %v792_v10 = vmul.f32 %v5292_v43, %v1373_v22 }
 0x13a   : > { %v1134_v17 = vadd.f32 %v1102_v32, %v1030_v2  ;;  %v1135_v19 = vadd.f32 %v1103_v30, %v1031_v33  ;;  %v793_v45 = vmul.f32 %v5292_v43, %v5381_v18  ;;  %v896_v56 = vmul.f32 %v5298_v21, %v1167_v41  ;;  %v4086_v33 = vld [vmem:[#allocation9] sm:$0xff]  }
 0x13b   : > { %v1503_v40 = vpack.c.bf16 %v1485_v48, %v1484_v60  ;;  %v720_v54 = vadd.f32 %v688_v51, %v584_v44  ;;  %v721_v11 = vadd.f32 %v689_v20, %v585_v53  ;;  %v897_v47 = vmul.f32 %v5298_v21, %v1168_v1  ;;  %v1273_v21 = vld [vmem:[#allocation2 + $0x199] sm:$0xff]  ;;  %v1378_v1 = vld [vmem:[#allocation2 + $0x1a2] sm:$0xff]  ;;  %3944 = vmatprep.subr.bf16.mxu1 %v4086_v33 }
 0x13c   : > { %v1239_v16 = vadd.f32 %v1207_v36, %v1134_v17  ;;  %v1240_v62 = vadd.f32 %v1208_v5, %v1135_v19  ;;  %v1000_v13 = vmul.f32 %v4234_v52, %v5304_v0  ;;  %v1001_v14 = vmul.f32 %v4235_v58, %v5304_v0  ;;  %3945 = vmatpush3.bf16.msra.mxu1 %v4086_v33  ;;  %v4089_v44 = vld [vmem:[#allocation9 + $0x18] sm:$0xff]   ;;  %v4091_v60 = vld [vmem:[#allocation9 + $0x28] sm:$0xff]   ;;  %v5450_v53 = vld [vmem:[%s6648_s4] ss:$0 sm:$0xff] }
 0x13d   : > { %3937 = vmatmul.mubr.bf16.gmra.mrb[24].mxu0 %v1503_v40  ;;  %v824_v4 = vadd.f32 %v792_v10, %v720_v54  ;;  %v825_v22 = vadd.f32 %v793_v45, %v721_v11  ;;  %v1104_v43 = vmul.f32 %v5310_v50, %v1375_v24  ;;  %v1105_v55 = vmul.f32 %v5310_v50, %v1376_v9  ;;  %v4093_v48 = vld [vmem:[#allocation9 + $0x38] sm:$0xff]   ;;  %v5459_v52 = vld [vmem:[%s6649_s5] ss:$0 sm:$0xff]  ;;  %v2234_v33 = vld [vmem:[#allocation2 + $0xa] sm:$0xff] }
 0x13e   : > { %v1343_v34 = vadd.f32 %v1311_v46, %v1239_v16  ;;  %v1344_v12 = vadd.f32 %v1312_v8, %v1240_v62  ;;  %v1209_v7 = vmul.f32 %v5435_v37, %v5258_v29  ;;  %v1313_v30 = vmul.f32 %v5262_v63, %v1273_v21 }
 0x13f   : > { %v928_v49 = vadd.f32 %v896_v56, %v824_v4  ;;  %v929_v38 = vadd.f32 %v897_v47, %v825_v22  ;;  %v1314_v59 = vmul.f32 %v5262_v63, %v1274_v25  ;;  %v1417_v5 = vmul.f32 %v5272_v28, %v1377_v26  ;;  %v4088_v63 = vld [vmem:[#allocation9 + $0x10] sm:$0xff]   ;;  %v5464_v22 = vld [vmem:[%s6649_s5 + $0x1] ss:$0 sm:$0xff] }
 0x140   : > { %v1447_v18 = vadd.f32 %v1415_v31, %v1343_v34  ;;  %v1448_v57 = vadd.f32 %v1416_v27, %v1344_v12  ;;  %v1418_v46 = vmul.f32 %v5272_v28, %v1378_v1  ;;  %v4087_v27 = vld [vmem:[#allocation9 + $0x8] sm:$0xff]   ;;  %v4090_v28 = vld [vmem:[#allocation9 + $0x20] sm:$0xff]  }
 0x141   : > { %v1032_v39 = vadd.f32 %v1000_v13, %v928_v49  ;;  %v1033_v41 = vadd.f32 %v1001_v14, %v929_v38  ;;  %3946 = vmatprep.subr.bf16.mxu1 %v4087_v27  ;;  %v2129_v13 = vld [vmem:[#allocation2 + $0x1] sm:$0xff]  ;;  %v2130_v34 = vld [vmem:[#allocation2 + $0x9] sm:$0xff] }
 0x142   : > { %v1486_v32 = vadd.f32 %v5391_v35, %v1447_v18  ;;  %v1487_v0 = vadd.f32 %v5391_v35, %v1448_v57  ;;  %3947 = vmatpush3.bf16.msra.mxu1 %v4087_v27  ;;  %v2169_v18 = vmul.f32 %v5464_v22, %v2129_v13  ;;  %v5488_v27 = vld [vmem:[%s6649_s5 + $0x2] ss:$0 sm:$0xff]  ;;  %v5530_v13 = vld [vmem:[%s6649_s5 + $0x5] ss:$0 sm:$0xff] }
 0x143   : > { %v1136_v42 = vadd.f32 %v1104_v43, %v1032_v39  ;;  %v1137_v50 = vadd.f32 %v1105_v55, %v1033_v41  ;;  %3948 = vmatprep.subr.bf16.mxu1 %v4088_v63  ;;  %v2065_v43 = vmul.f32 %v5435_v37, %v5459_v52  ;;  %v2170_v39 = vmul.f32 %v5464_v22, %v2130_v34 }
 0x144   : > { %v1504_v36 = vpack.c.bf16 %v1487_v0, %v1486_v32 }
 0x145   : > { %v1241_v61 = vadd.f32 %v1209_v7, %v1136_v42  ;;  %v1242_v29 = vadd.f32 %v1209_v7, %v1137_v50 }
 0x146   : > { %3940 = vmatprep.mubr.bf16.mxu0 %v1504_v36  ;;  %3949 = vmatpush3.bf16.msra.mxu1 %v4088_v63 }
 0x147   : > { %v1345_v24 = vadd.f32 %v1313_v30, %v1241_v61  ;;  %v1346_v23 = vadd.f32 %v1314_v59, %v1242_v29  ;;  %3950 = vmatprep.subr.bf16.mxu1 %v4089_v44 }
 0x149   : > { %v1449_v3 = vadd.f32 %v1417_v5, %v1345_v24  ;;  %v1450_v8 = vadd.f32 %v1418_v46, %v1346_v23 }
 0x14a   : > { %3951 = vmatpush3.bf16.msra.mxu1 %v4089_v44 }
 0x14b   : > { %v1488_v9 = vadd.f32 %v5391_v35, %v1449_v3  ;;  %v1489_v31 = vadd.f32 %v5391_v35, %v1450_v8  ;;  %3952 = vmatprep.subr.bf16.mxu1 %v4090_v28  ;;  %v4092_v35 = vld [vmem:[#allocation9 + $0x30] sm:$0xff]  }
 0x14d   : > { %v1505_v2 = vpack.c.bf16 %v1489_v31, %v1488_v9 }
 0x14e   : > { %3953 = vmatpush3.bf16.msra.mxu1 %v4090_v28 }
 0x14f   : > { %3941 = vmatmul.mubr.bf16.gmra.mrb[28].mxu0 %v1505_v2  ;;  %3954 = vmatprep.subr.bf16.mxu1 %v4091_v60  ;;  %v2233_v2 = vld [vmem:[#allocation2 + $0x2] sm:$0xff] }
 0x152   : > { %3955 = vmatpush3.bf16.msra.mxu1 %v4091_v60  ;;  %v2201_v60 = vadd.f32 %v2169_v18, %v2065_v43 }
 0x153   : > { %3956 = vmatprep.subr.bf16.mxu1 %v4092_v35 }
 0x156   : > { %3957 = vmatpush3.bf16.msra.mxu1 %v4092_v35 }
 0x157   : > { %3958 = vmatprep.subr.bf16.mxu1 %v4093_v48 }
 0x15a   : > { %3959 = vmatpush3.bf16.msra.mxu1 %v4093_v48  ;;  %v2202_v48 = vadd.f32 %v2170_v39, %v2065_v43 }
 0x1a1   : > { %v3914_v6 = vpop.f32.mrb[0].mxu0 }
 0x1a2   : > { %v1620_v51 = vadd.f32 %v3914_v6, %v5450_v53  ;;  %v1611_v17 = vpop.f32.mrb[1].mxu0  ;;  %v2273_v6 = vmul.f32 %v5488_v27, %v2233_v2 }
 0x1a3   : > { %v1612_v19 = vadd.f32 %v5450_v53, %v1611_v17  ;;  %v3915_v15 = vpop.f32.mrb[2].mxu0 }
 0x1a4   : > { %v1740_v20 = vmin.f32 %v1620_v51, 0.0  ;;  %v1623_v10 = vadd.f32 %v3915_v15, %v5450_v53  ;;  %v1614_v40 = vpop.f32.mrb[3].mxu0  ;;  %vm1900_vm0 = vcmp.gt.f32.partialorder %v1620_v51, 0.0  ;;  %v5502_v15 = vld [vmem:[%s6649_s5 + $0x7] ss:$0 sm:$0xff] }
 0x1a5   : > { %v1738_v54 = vmin.f32 %v1612_v19, 0.0  ;;  %v1615_v45 = vadd.f32 %v5450_v53, %v1614_v40  ;;  %vm1898_vm1 = vcmp.gt.f32.partialorder %v1612_v19, 0.0 }
 0x1a6   : > { %v1774_v56 = vmul.f32 1.442695, %v1740_v20  ;;  %v1741_v16 = vmin.f32 %v1623_v10, 0.0  ;;  %vm1901_vm2 = vcmp.gt.f32.partialorder %v1623_v10, 0.0  ;;  %v5507_v20 = vld [vmem:[%s6649_s5 + $0x3] ss:$0 sm:$0xff] }
 0x1a7   : > { %v1770_v62 = vmul.f32 1.442695, %v1738_v54  ;;  %v1739_v11 = vmin.f32 %v1615_v45, 0.0  ;;  %vm1899_vm3 = vcmp.gt.f32.partialorder %v1615_v45, 0.0 }
 0x1a8   : > { %4094 = vpow2.f32 %v1774_v56  ;;  %v1776_v47 = vmul.f32 1.442695, %v1741_v16 }
 0x1a9   : > { %4096 = vpow2.f32 %v1770_v62  ;;  %v1772_v4 = vmul.f32 1.442695, %v1739_v11 }
 0x1aa   : > { %4098 = vpow2.f32 %v1776_v47 }
 0x1ab   : > { %4100 = vpow2.f32 %v1772_v4 }
 0x1b2   : > { %v4095_v12 = vpop.eup %4094 }
 0x1b3   : > { %v4097_v58 = vpop.eup %4096  ;;  %v3752_v14 = vadd.f32 -1.0, %v4095_v12  ;;  %v3918_v49 = vpop.f32.mrb[4].mxu0 }
 0x1b4   : > { %v4099_v57 = vpop.eup %4098  ;;  %v3750_v38 = vadd.f32 -1.0, %v4097_v58  ;;  %v5470_v55 = vadd.f32 %v3918_v49, %v5450_v53  ;;  %v1627_v21 = vpop.f32.mrb[5].mxu0 }
 0x1b5   : > { %v4101_v7 = vpop.eup %4100  ;;  %v1868_v25 = vmul.f32 1.6732632, %v3752_v14  ;;  %v3753_v32 = vadd.f32 -1.0, %v4099_v57  ;;  %v5474_v0 = vadd.f32 %v5450_v53, %v1627_v21  ;;  %v3919_v41 = vpop.f32.mrb[6].mxu0 }
 0x1b6   : > { %v1866_v37 = vmul.f32 1.6732632, %v3750_v38  ;;  %v3751_v26 = vadd.f32 -1.0, %v4101_v7  ;;  %v1744_v42 = vmin.f32 %v5470_v55, 0.0  ;;  %v1630_v30 = vpop.f32.mrb[7].mxu0  ;;  %v5480_v3 = vadd.f32 %v3919_v41, %v5450_v53 }
 0x1b7   : > { %v1932_v1 = vsel %vm1900_vm0, %v1620_v51, %v1868_v25  ;;  %v1869_v36 = vmul.f32 1.6732632, %v3753_v32  ;;  %v1742_v50 = vmin.f32 %v5474_v0, 0.0  ;;  %v5483_v31 = vadd.f32 %v5450_v53, %v1630_v30 }
 0x1b8   : > { %v1964_v59 = vmul.f32 1.050701, %v1932_v1  ;;  %v1930_v61 = vsel %vm1898_vm1, %v1612_v19, %v1866_v37  ;;  %v1867_v5 = vmul.f32 1.6732632, %v3751_v26  ;;  %v1782_v29 = vmul.f32 1.442695, %v1744_v42 }
 0x1b9   : > { %v1962_v46 = vmul.f32 1.050701, %v1930_v61  ;;  %v1933_v24 = vsel %vm1901_vm2, %v1623_v10, %v1869_v36  ;;  %v1778_v23 = vmul.f32 1.442695, %v1742_v50  ;;  %v1745_v44 = vmin.f32 %v5480_v3, 0.0 }
 0x1ba   : > { %1996 = vst [vmem:[#allocation2 + $0x31] sm:$0xff] %v1964_v59  ;;  %v1965_v8 = vmul.f32 1.050701, %v1933_v24  ;;  %v1931_v9 = vsel %vm1899_vm3, %v1615_v45, %v1867_v5  ;;  %4102 = vpow2.f32 %v1782_v29  ;;  %v1743_v28 = vmin.f32 %v5483_v31, 0.0  ;;  %v5497_v19 = vld [vmem:[%s6649_s5 + $0x4] ss:$0 sm:$0xff] }
 0x1bb   : > { %1994 = vst [vmem:[#allocation2 + $0x19] sm:$0xff] %v1962_v46  ;;  %v1963_v63 = vmul.f32 1.050701, %v1931_v9  ;;  %4104 = vpow2.f32 %v1778_v23  ;;  %v1784_v35 = vmul.f32 1.442695, %v1745_v44  ;;  %v2274_v51 = vmul.f32 %v5488_v27, %v2234_v33 }
 0x1bc   : > { %1997 = vst [vmem:[#allocation2 + $0x39] sm:$0xff] %v1965_v8  ;;  %v1780_v17 = vmul.f32 1.442695, %v1743_v28  ;;  %vm1904_vm4 = vcmp.gt.f32.partialorder %v5470_v55, 0.0  ;;  %vm1902_vm5 = vcmp.gt.f32.partialorder %v5474_v0, 0.0  ;;  %v2305_v10 = vadd.f32 %v2273_v6, %v2201_v60 }
 0x1bd   : > { %1995 = vst [vmem:[#allocation2 + $0x21] sm:$0xff] %v1963_v63  ;;  %4106 = vpow2.f32 %v1784_v35  ;;  %v2306_v40 = vadd.f32 %v2274_v51, %v2202_v48  ;;  %v5514_v45 = vld [vmem:[%s6649_s5 + $0x6] ss:$0 sm:$0xff]  ;;  %v2481_v16 = vmul.f32 %v5497_v19, %v1962_v46  ;;  %v5518_v62 = vmul.f32 %v5497_v19, %v1963_v63 }
 0x1be   : > { %4108 = vpow2.f32 %v1780_v17  ;;  %v5521_v11 = vmul.f32 %v5502_v15, %v1964_v59  ;;  %v5524_v47 = vmul.f32 %v5502_v15, %v1965_v8  ;;  %v5533_v34 = vmul.f32 %v5464_v22, %v1962_v46 }
 0x1bf   : > { %v5536_v12 = vmul.f32 %v5464_v22, %v1963_v63  ;;  %v5539_v58 = vmul.f32 %v5497_v19, %v1964_v59  ;;  %v5549_v38 = vmul.f32 %v5497_v19, %v1965_v8  ;;  %v5552_v21 = vmul.f32 %v5464_v22, %v1964_v59 }
 0x1c0   : > { %v5555_v39 = vmul.f32 %v5464_v22, %v1965_v8  ;;  %vm1905_vm6 = vcmp.gt.f32.partialorder %v5480_v3, 0.0  ;;  %vm1903_vm7 = vcmp.gt.f32.partialorder %v5483_v31, 0.0 }
 0x1c1   : > { %v2649_v54 = vld [vmem:[#allocation2 + $0x30] sm:$0xff] }
 0x1c2   : > { %v2337_v56 = vld [vmem:[#allocation2 + $0x18] sm:$0xff]  ;;  %v5546_v57 = vmul.f32 %v5514_v45, %v2649_v54  ;;  %v5560_v26 = vmul.f32 %v5507_v20, %v2649_v54  ;;  %v5568_v50 = vmul.f32 %v5459_v52, %v2649_v54 }
 0x1c3   : > { %v2377_v4 = vmul.f32 %v5507_v20, %v2337_v56  ;;  %v5543_v18 = vld [vmem:[#allocation2 + $0x38] sm:$0xff]  ;;  %v2067_v36 = vmul.f32 %v5459_v52, %v2337_v56 }
 0x1c4   : > { %v4103_v14 = vpop.eup %4102  ;;  %v2338_v49 = vld [vmem:[#allocation2 + $0x20] sm:$0xff]  ;;  %v2690_v46 = vmul.f32 %v5514_v45, %v5543_v18 }
 0x1c5   : > { %v5541_v43 = vld [vmem:[#allocation2 + $0x1a] sm:$0xff]  ;;  %v4105_v7 = vpop.eup %4104  ;;  %v3756_v25 = vadd.f32 -1.0, %v4103_v14  ;;  %v2378_v41 = vmul.f32 %v5507_v20, %v2338_v49  ;;  %v2409_v37 = vadd.f32 %v2377_v4, %v2305_v10  ;;  %v2546_v35 = vld [vmem:[#allocation2 + $0x22] sm:$0xff] }
 0x1c6   : > { %v3922_v32 = vpop.f32.mrb[8].mxu0  ;;  %v3754_v42 = vadd.f32 -1.0, %v4105_v7  ;;  %v2585_v29 = vmul.f32 %v5530_v13, %v5541_v43  ;;  %v2586_v14 = vmul.f32 %v5530_v13, %v2546_v35 }
 0x1c7   : > { %v5564_v30 = vadd.f32 %v3922_v32, %v5450_v53  ;;  %v1643_v1 = vpop.f32.mrb[9].mxu0  ;;  %v1872_v59 = vmul.f32 1.6732632, %v3756_v25  ;;  %v2410_v2 = vadd.f32 %v2378_v41, %v2306_v40  ;;  %v4107_v33 = vpop.eup %4106  ;;  %v2513_v60 = vadd.f32 %v2481_v16, %v2409_v37 }
 0x1c8   : > { %v5571_v61 = vadd.f32 %v5450_v53, %v1643_v1  ;;  %v3923_v5 = vpop.f32.mrb[10].mxu0  ;;  %v1870_v24 = vmul.f32 1.6732632, %v3754_v42  ;;  %v4109_v48 = vpop.eup %4108  ;;  %v3757_v17 = vadd.f32 -1.0, %v4107_v33  ;;  %v2068_v25 = vmul.f32 %v5459_v52, %v2338_v49  ;;  %v2857_v1 = vld [vmem:[#allocation2 + $0x32] sm:$0xff] }
 0x1c9   : > { %v1748_v23 = vmin.f32 %v5564_v30, 0.0  ;;  %v5579_v8 = vadd.f32 %v3923_v5, %v5450_v53  ;;  %v1646_v9 = vpop.f32.mrb[11].mxu0  ;;  %v1936_v63 = vsel %vm1904_vm4, %v5470_v55, %v1872_v59  ;;  %v3755_v54 = vadd.f32 -1.0, %v4109_v48  ;;  %v5608_v59 = vld [vmem:[%s6649_s5 + $0x8] ss:$0 sm:$0xff] }
 0x1ca   : > { %v1746_v44 = vmin.f32 %v5571_v61, 0.0  ;;  %v5586_v28 = vadd.f32 %v5450_v53, %v1646_v9  ;;  %v5588_v6 = vmul.f32 1.050701, %v1936_v63  ;;  %v1934_v51 = vsel %vm1902_vm5, %v5474_v0, %v1870_v24  ;;  %v2858_v24 = vld [vmem:[#allocation2 + $0x3a] sm:$0xff] }
 0x1cb   : > { %v1790_v10 = vmul.f32 1.442695, %v1748_v23  ;;  %v5593_v40 = vmul.f32 1.050701, %v1934_v51  ;;  %v1749_v56 = vmin.f32 %v5579_v8, 0.0  ;;  %v2514_v37 = vadd.f32 %v5518_v62, %v2410_v2 }
 0x1cc   : > { %v1786_v55 = vmul.f32 1.442695, %v1746_v44  ;;  %2000 = vst [vmem:[#allocation2 + $0x61] sm:$0xff] %v5588_v6  ;;  %v1873_v4 = vmul.f32 1.6732632, %v3757_v17  ;;  %v1747_v16 = vmin.f32 %v5586_v28, 0.0  ;;  %v2617_v42 = vadd.f32 %v2585_v29, %v2513_v60 }
 0x1cd   : > { %4110 = vpow2.f32 %v1790_v10  ;;  %1998 = vst [vmem:[#allocation2 + $0x49] sm:$0xff] %v5593_v40  ;;  %v1871_v7 = vmul.f32 1.6732632, %v3755_v54  ;;  %v1792_v0 = vmul.f32 1.442695, %v1749_v56  ;;  %v2618_v62 = vadd.f32 %v2586_v14, %v2514_v37 }
 0x1ce   : > { %4112 = vpow2.f32 %v1786_v55  ;;  %v1937_v32 = vsel %vm1905_vm6, %v5480_v3, %v1873_v4  ;;  %v1788_v41 = vmul.f32 1.442695, %v1747_v16  ;;  %v2203_v3 = vadd.f32 %v5533_v34, %v2067_v36 }
 0x1cf   : > { %v5610_v5 = vmul.f32 1.050701, %v1937_v32  ;;  %v1935_v49 = vsel %vm1903_vm7, %v5483_v31, %v1871_v7  ;;  %4114 = vpow2.f32 %v1792_v0  ;;  %v2721_v29 = vadd.f32 %v5546_v57, %v2617_v42 }
 0x1d0   : > { %v5616_v23 = vmul.f32 1.050701, %v1935_v49  ;;  %4116 = vpow2.f32 %v1788_v41  ;;  %v2897_v9 = vmul.f32 %v5608_v59, %v2857_v1  ;;  %v2204_v2 = vadd.f32 %v5536_v12, %v2068_v25 }
 0x1d1   : > { %2001 = vst [vmem:[#allocation2 + $0x69] sm:$0xff] %v5610_v5  ;;  %v2275_v33 = vmul.f32 %v5488_v27, %v5541_v43  ;;  %v2276_v31 = vmul.f32 %v5488_v27, %v2546_v35  ;;  %v2722_v34 = vadd.f32 %v2690_v46, %v2618_v62  ;;  %v2825_v36 = vadd.f32 %v5521_v11, %v2721_v29  ;;  %v5642_v46 = vld [vmem:[%s6650_s6] ss:$0 sm:$0xff] }
 0x1d2   : > { %1999 = vst [vmem:[#allocation2 + $0x51] sm:$0xff] %v5616_v23  ;;  %v2898_v63 = vmul.f32 %v5608_v59, %v2858_v24  ;;  %v2380_v57 = vmul.f32 %v5507_v20, %v5543_v18  ;;  %vm1908_vm8 = vcmp.gt.f32.partialorder %v5564_v30, 0.0  ;;  %vm1906_vm9 = vcmp.gt.f32.partialorder %v5571_v61, 0.0 }
 0x1d3   : > { %v2307_v12 = vadd.f32 %v2275_v33, %v2203_v3  ;;  %v2308_v44 = vadd.f32 %v2276_v31, %v2204_v2  ;;  %v2826_v43 = vadd.f32 %v5524_v47, %v2722_v34  ;;  %v2929_v60 = vadd.f32 %v2897_v9, %v2825_v36 }
 0x1d4   : > { %v2587_v35 = vmul.f32 %v5530_v13, %v2857_v1  ;;  %v5634_v48 = vld [vmem:[#allocation2 + $0x48] sm:$0xff]  ;;  %v2070_v11 = vmul.f32 %v5459_v52, %v5543_v18  ;;  %vm1909_vm10 = vcmp.gt.f32.partialorder %v5579_v8, 0.0  ;;  %v2588_v47 = vmul.f32 %v5530_v13, %v2858_v24 }
 0x1d5   : > { %v2411_v51 = vadd.f32 %v5560_v26, %v2307_v12  ;;  %v2412_v17 = vadd.f32 %v2380_v57, %v2308_v44  ;;  %v5648_v10 = vmul.f32 %v5502_v15, %v5593_v40  ;;  %vm1907_vm11 = vcmp.gt.f32.partialorder %v5586_v28, 0.0 }
 0x1d6   : > { %v2930_v18 = vadd.f32 %v2898_v63, %v2826_v43  ;;  %v5653_v55 = vmul.f32 %v5502_v15, %v5616_v23  ;;  %v2205_v56 = vadd.f32 %v5552_v21, %v5568_v50  ;;  %v2277_v26 = vmul.f32 %v5488_v27, %v2857_v1 }
 0x1d7   : > { %v4111_v54 = vpop.eup %4110  ;;  %v2515_v14 = vadd.f32 %v5539_v58, %v2411_v51  ;;  %v2516_v7 = vadd.f32 %v5549_v38, %v2412_v17  ;;  %v2691_v0 = vmul.f32 %v5514_v45, %v5634_v48  ;;  %v2968_v41 = vadd.f32 %v5642_v46, %v2929_v60 }
 0x1d8   : > { %v4113_v4 = vpop.eup %4112  ;;  %v3760_v16 = vadd.f32 -1.0, %v4111_v54  ;;  %v3926_v32 = vpop.f32.mrb[12].mxu0  ;;  %v2969_v37 = vadd.f32 %v5642_v46, %v2930_v18  ;;  %v2206_v42 = vadd.f32 %v5555_v39, %v2070_v11  ;;  %v2278_v58 = vmul.f32 %v5488_v27, %v2858_v24 }
 0x1d9   : > { %v3758_v25 = vadd.f32 -1.0, %v4113_v4  ;;  %v4115_v21 = vpop.eup %4114  ;;  %v5666_v1 = vadd.f32 %v3926_v32, %v5450_v53  ;;  %v1659_v49 = vpop.f32.mrb[13].mxu0  ;;  %v2381_v38 = vmul.f32 %v5507_v20, %v5634_v48  ;;  %v2619_v24 = vadd.f32 %v2587_v35, %v2515_v14  ;;  %v5693_v54 = vld [vmem:[#allocation2 + $0x50] sm:$0xff] }
 0x1da   : > { %v1876_v50 = vmul.f32 1.6732632, %v3760_v16  ;;  %v4117_v3 = vpop.eup %4116  ;;  %v3761_v29 = vadd.f32 -1.0, %v4115_v21  ;;  %v5672_v9 = vadd.f32 %v5450_v53, %v1659_v49  ;;  %v3927_v2 = vpop.f32.mrb[14].mxu0  ;;  %v3000_v33 = vpack.c.bf16 %v2969_v37, %v2968_v41  ;;  %v5700_v14 = vld [vmem:[#allocation2 + $0x4a] sm:$0xff]  ;;  %v5707_v37 = vld [vmem:[#allocation2 + $0x52] sm:$0xff] }
 0x1db   : > { %v1874_v62 = vmul.f32 1.6732632, %v3758_v25  ;;  %v3759_v31 = vadd.f32 -1.0, %v4117_v3  ;;  %v1752_v34 = vmin.f32 %v5666_v1, 0.0  ;;  %v1662_v36 = vpop.f32.mrb[15].mxu0  ;;  %v2692_v32 = vmul.f32 %v5514_v45, %v5693_v54 }
 0x1dc   : > { %v1940_v39 = vsel %vm1908_vm8, %v5564_v30, %v1876_v50  ;;  %v1877_v12 = vmul.f32 1.6732632, %v3761_v29  ;;  %v1750_v44 = vmin.f32 %v5672_v9, 0.0  ;;  %3960 = vmatprep.mubr.bf16.mxu1 %v3000_v33  ;;  %v5685_v30 = vadd.f32 %v3927_v2, %v5450_v53  ;;  %v5721_v29 = vld [vmem:[#allocation2 + $0x60] sm:$0xff] }
 0x1dd   : > { %v1972_v63 = vmul.f32 1.050701, %v1940_v39  ;;  %v1938_v57 = vsel %vm1906_vm9, %v5571_v61, %v1874_v62  ;;  %v1875_v60 = vmul.f32 1.6732632, %v3759_v31  ;;  %v1798_v11 = vmul.f32 1.442695, %v1752_v34 }
 0x1de   : > { %v5682_v43 = vmul.f32 1.050701, %v1938_v57  ;;  %v1941_v35 = vsel %vm1909_vm10, %v5579_v8, %v1877_v12  ;;  %v1794_v51 = vmul.f32 1.442695, %v1750_v44  ;;  %v5691_v17 = vadd.f32 %v5450_v53, %v1662_v36  ;;  %v5726_v34 = vld [vmem:[#allocation2 + $0x68] sm:$0xff] }
 0x1df   : > { %2004 = vst [vmem:[#allocation2 + $0x91] sm:$0xff] %v1972_v63  ;;  %v2620_v61 = vadd.f32 %v2588_v47, %v2516_v7  ;;  %v1973_v18 = vmul.f32 1.050701, %v1941_v35  ;;  %v1939_v4 = vsel %vm1907_vm11, %v5586_v28, %v1875_v60  ;;  %4118 = vpow2.f32 %v1798_v11  ;;  %v5731_v36 = vld [vmem:[#allocation2 + $0x62] sm:$0xff]  ;;  %v5736_v57 = vld [vmem:[#allocation2 + $0x6a] sm:$0xff] }
 0x1e0   : > { %2002 = vst [vmem:[#allocation2 + $0x79] sm:$0xff] %v5682_v43  ;;  %v1753_v16 = vmin.f32 %v5685_v30, 0.0  ;;  %v5702_v8 = vmul.f32 1.050701, %v1939_v4  ;;  %4120 = vpow2.f32 %v1794_v51  ;;  %v1751_v25 = vmin.f32 %v5691_v17, 0.0 }
 0x1e1   : > { %v2309_v47 = vadd.f32 %v2277_v26, %v2205_v56  ;;  %2005 = vst [vmem:[#allocation2 + $0x99] sm:$0xff] %v1973_v18  ;;  %v2723_v41 = vadd.f32 %v2691_v0, %v2619_v24  ;;  %v2310_v28 = vadd.f32 %v2278_v58, %v2206_v42  ;;  %v2899_v50 = vmul.f32 %v5608_v59, %v5700_v14 }
 0x1e2   : > { %v1800_v7 = vmul.f32 1.442695, %v1753_v16  ;;  %2003 = vst [vmem:[#allocation2 + $0x81] sm:$0xff] %v5702_v8  ;;  %v1796_v21 = vmul.f32 1.442695, %v1751_v25  ;;  %v2382_v49 = vmul.f32 %v5507_v20, %v5693_v54  ;;  %v2485_v56 = vmul.f32 %v5497_v19, %v5593_v40 }
 0x1e3   : > { %v2724_v26 = vadd.f32 %v2692_v32, %v2620_v61  ;;  %v2827_v3 = vadd.f32 %v5648_v10, %v2723_v41  ;;  %v2413_v0 = vadd.f32 %v2381_v38, %v2309_v47  ;;  %v2900_v42 = vmul.f32 %v5608_v59, %v5707_v37 }
 0x1e4   : > { %4122 = vpow2.f32 %v1800_v7  ;;  %v2414_v58 = vadd.f32 %v2382_v49, %v2310_v28  ;;  %v2486_v62 = vmul.f32 %v5497_v19, %v5616_v23  ;;  %v2589_v31 = vmul.f32 %v5530_v13, %v5700_v14 }
 0x1e5   : > { %4124 = vpow2.f32 %v1796_v21  ;;  %v2828_v2 = vadd.f32 %v5653_v55, %v2724_v26  ;;  %v2931_v33 = vadd.f32 %v2899_v50, %v2827_v3  ;;  %v2517_v39 = vadd.f32 %v2485_v56, %v2413_v0 }
 0x1e6   : > { %vm1912_vm12 = vcmp.gt.f32.partialorder %v5666_v1, 0.0  ;;  %v2518_v10 = vadd.f32 %v2486_v62, %v2414_v58  ;;  %v2590_v38 = vmul.f32 %v5530_v13, %v5707_v37  ;;  %vm1910_vm13 = vcmp.gt.f32.partialorder %v5672_v9, 0.0 }
 0x1e7   : > { %v2932_v24 = vadd.f32 %v2900_v42, %v2828_v2  ;;  %v2621_v63 = vadd.f32 %v2589_v31, %v2517_v39  ;;  %v2693_v55 = vmul.f32 %v5514_v45, %v5721_v29  ;;  %v2970_v12 = vadd.f32 %v5642_v46, %v2931_v33 }
 0x1e8   : > { %v2622_v44 = vadd.f32 %v2590_v38, %v2518_v10  ;;  %v2694_v60 = vmul.f32 %v5514_v45, %v5726_v34  ;;  %v2797_v11 = vmul.f32 %v5502_v15, %v5588_v6  ;;  %vm1913_vm14 = vcmp.gt.f32.partialorder %v5685_v30, 0.0 }
 0x1e9   : > { %v4119_v35 = vpop.eup %4118  ;;  %v2971_v51 = vadd.f32 %v5642_v46, %v2932_v24  ;;  %v2725_v61 = vadd.f32 %v2693_v55, %v2621_v63  ;;  %v2798_v18 = vmul.f32 %v5502_v15, %v5610_v5  ;;  %v2901_v4 = vmul.f32 %v5608_v59, %v5731_v36 }
 0x1ea   : > { %v4121_v16 = vpop.eup %4120  ;;  %v3764_v25 = vadd.f32 -1.0, %v4119_v35  ;;  %vm1911_vm15 = vcmp.gt.f32.partialorder %v5691_v17, 0.0  ;;  %v2726_v7 = vadd.f32 %v2694_v60, %v2622_v44  ;;  %v2902_v6 = vmul.f32 %v5608_v59, %v5736_v57 }
 0x1eb   : > { %v3930_v47 = vpop.f32.mrb[16].mxu0  ;;  %v2071_v32 = vmul.f32 %v5459_v52, %v5634_v48  ;;  %v3762_v41 = vadd.f32 -1.0, %v4121_v16  ;;  %v3001_v21 = vpack.c.bf16 %v2971_v51, %v2970_v12  ;;  %v2829_v50 = vadd.f32 %v2797_v11, %v2725_v61 }
 0x1ec   : > { %v5755_v28 = vadd.f32 %v3930_v47, %v5450_v53  ;;  %v1675_v5 = vpop.f32.mrb[17].mxu0  ;;  %v1880_v49 = vmul.f32 1.6732632, %v3764_v25  ;;  %v2830_v3 = vadd.f32 %v2798_v18, %v2726_v7  ;;  %v2072_v0 = vmul.f32 %v5459_v52, %v5693_v54 }
 0x1ed   : > { %v5758_v56 = vadd.f32 %v5450_v53, %v1675_v5  ;;  %v3931_v26 = vpop.f32.mrb[18].mxu0  ;;  %v1878_v58 = vmul.f32 1.6732632, %v3762_v41  ;;  %3961 = vmatmul.mubr.bf16.vlgmr.msra.gmra.mrb[0].mxu1 %v3001_v21  ;;  %v2175_v33 = vmul.f32 %v5464_v22, %v5593_v40  ;;  %v2279_v38 = vmul.f32 %v5488_v27, %v5700_v14 }
 0x1ee   : > { %v4123_v42 = vpop.eup %4122  ;;  %v1756_v48 = vmin.f32 %v5755_v28, 0.0  ;;  %v5764_v62 = vadd.f32 %v3931_v26, %v5450_v53  ;;  %v1678_v2 = vpop.f32.mrb[19].mxu0  ;;  %v1944_v31 = vsel %vm1912_vm12, %v5666_v1, %v1880_v49  ;;  %v2176_v61 = vmul.f32 %v5464_v22, %v5616_v23  ;;  %v2447_v49 = vld [vmem:[#allocation2 + $0x61] sm:$0xff] }
 0x1ef   : > { %v4125_v39 = vpop.eup %4124  ;;  %v3765_v10 = vadd.f32 -1.0, %v4123_v42  ;;  %v1754_v54 = vmin.f32 %v5758_v56, 0.0  ;;  %v1976_v24 = vmul.f32 1.050701, %v1944_v31  ;;  %v1942_v63 = vsel %vm1910_vm13, %v5672_v9, %v1878_v58 }
 0x1f0   : > { %v3763_v55 = vadd.f32 -1.0, %v4125_v39  ;;  %v1806_v12 = vmul.f32 1.442695, %v1756_v48  ;;  %v1974_v44 = vmul.f32 1.050701, %v1942_v63  ;;  %v5778_v11 = vadd.f32 %v5450_v53, %v1678_v2 }
 0x1f1   : > { %v1881_v40 = vmul.f32 1.6732632, %v3765_v10  ;;  %v1802_v60 = vmul.f32 1.442695, %v1754_v54  ;;  %2008 = vst [vmem:[#allocation2 + $0xc1] sm:$0xff] %v1976_v24  ;;  %v1757_v35 = vmin.f32 %v5764_v62, 0.0  ;;  %v2207_v51 = vadd.f32 %v2175_v33, %v2071_v32 }
 0x1f2   : > { %v1879_v1 = vmul.f32 1.6732632, %v3763_v55  ;;  %4126 = vpow2.f32 %v1806_v12  ;;  %2006 = vst [vmem:[#allocation2 + $0xa9] sm:$0xff] %v1974_v44  ;;  %v1755_v9 = vmin.f32 %v5778_v11, 0.0  ;;  %v2933_v47 = vadd.f32 %v2901_v4, %v2829_v50  ;;  %v2448_v4 = vld [vmem:[#allocation2 + $0x69] sm:$0xff] }
 0x1f3   : > { %v1945_v14 = vsel %vm1913_vm14, %v5685_v30, %v1881_v40  ;;  %4128 = vpow2.f32 %v1802_v60  ;;  %v1808_v25 = vmul.f32 1.442695, %v1757_v35  ;;  %v2934_v41 = vadd.f32 %v2902_v6, %v2830_v3  ;;  %v5799_v3 = vld [vmem:[#allocation2 + $0x78] sm:$0xff]  ;;  %v5816_v24 = vld [vmem:[#allocation2 + $0x82] sm:$0xff] }
 0x1f4   : > { %v1977_v18 = vmul.f32 1.050701, %v1945_v14  ;;  %v1943_v16 = vsel %vm1911_vm15, %v5691_v17, %v1879_v1  ;;  %v1804_v32 = vmul.f32 1.442695, %v1755_v9  ;;  %v2208_v5 = vadd.f32 %v2176_v61, %v2072_v0 }
 0x1f5   : > { %v1975_v7 = vmul.f32 1.050701, %v1943_v16  ;;  %4130 = vpow2.f32 %v1808_v25  ;;  %v2280_v30 = vmul.f32 %v5488_v27, %v5707_v37  ;;  %v2311_v21 = vadd.f32 %v2279_v38, %v2207_v51  ;;  %v5801_v37 = vld [vmem:[#allocation2 + $0x80] sm:$0xff] }
 0x1f6   : > { %2009 = vst [vmem:[#allocation2 + $0xc9] sm:$0xff] %v1977_v18  ;;  %4132 = vpow2.f32 %v1804_v32  ;;  %v2972_v23 = vadd.f32 %v5642_v46, %v2933_v47  ;;  %v2973_v26 = vadd.f32 %v5642_v46, %v2934_v41  ;;  %v2383_v17 = vmul.f32 %v5507_v20, %v5721_v29  ;;  %v5814_v38 = vld [vmem:[#allocation2 + $0x7a] sm:$0xff] }
 0x1f7   : > { %2007 = vst [vmem:[#allocation2 + $0xb1] sm:$0xff] %v1975_v7  ;;  %vm1916_vm0 = vcmp.gt.f32.partialorder %v5755_v28, 0.0  ;;  %v2312_v6 = vadd.f32 %v2280_v30, %v2208_v5  ;;  %v2384_v50 = vmul.f32 %v5507_v20, %v5726_v34  ;;  %vm1914_vm1 = vcmp.gt.f32.partialorder %v5758_v56, 0.0 }
 0x1f8   : > { %v3002_v0 = vpack.c.bf16 %v2973_v26, %v2972_v23  ;;  %v2415_v42 = vadd.f32 %v2383_v17, %v2311_v21  ;;  %v2487_v58 = vmul.f32 %v5497_v19, %v2447_v49  ;;  %v2488_v2 = vmul.f32 %v5497_v19, %v2448_v4 }
 0x1f9   : > { %v2416_v48 = vadd.f32 %v2384_v50, %v2312_v6  ;;  %v2591_v33 = vmul.f32 %v5530_v13, %v5731_v36  ;;  %v2592_v39 = vmul.f32 %v5530_v13, %v5736_v57  ;;  %v2695_v10 = vmul.f32 %v5514_v45, %v5799_v3 }
 0x1fa   : > { %3964 = vmatprep.mubr.bf16.mxu1 %v3002_v0  ;;  %v2519_v31 = vadd.f32 %v2487_v58, %v2415_v42  ;;  %v2696_v54 = vmul.f32 %v5514_v45, %v5801_v37  ;;  %v2073_v63 = vmul.f32 %v5459_v52, %v5721_v29  ;;  %vm1917_vm2 = vcmp.gt.f32.partialorder %v5764_v62, 0.0 }
 0x1fb   : > { %v2520_v12 = vadd.f32 %v2488_v2, %v2416_v48  ;;  %v2074_v44 = vmul.f32 %v5459_v52, %v5726_v34  ;;  %v2177_v40 = vmul.f32 %v5464_v22, %v2447_v49  ;;  %v2178_v60 = vmul.f32 %v5464_v22, %v2448_v4 }
 0x1fc   : > { %v4127_v55 = vpop.eup %4126  ;;  %vm1915_vm3 = vcmp.gt.f32.partialorder %v5778_v11, 0.0  ;;  %v2623_v51 = vadd.f32 %v2591_v33, %v2519_v31  ;;  %v2799_v14 = vmul.f32 %v5502_v15, %v5682_v43  ;;  %v2800_v29 = vmul.f32 %v5502_v15, %v5702_v8 }
 0x1fd   : > { %v4129_v1 = vpop.eup %4128  ;;  %v3768_v35 = vadd.f32 -1.0, %v4127_v55  ;;  %v3934_v61 = vpop.f32.mrb[20].mxu0  ;;  %v2903_v34 = vmul.f32 %v5608_v59, %v5814_v38  ;;  %v2904_v18 = vmul.f32 %v5608_v59, %v5816_v24  ;;  %v2281_v16 = vmul.f32 %v5488_v27, %v5731_v36 }
 0x1fe   : > { %v3766_v9 = vadd.f32 -1.0, %v4129_v1  ;;  %v5837_v47 = vadd.f32 %v3934_v61, %v5450_v53  ;;  %v1691_v7 = vpop.f32.mrb[21].mxu0  ;;  %v2624_v43 = vadd.f32 %v2592_v39, %v2520_v12  ;;  %v2282_v8 = vmul.f32 %v5488_v27, %v5736_v57 }
 0x1ff   : > { %v1884_v25 = vmul.f32 1.6732632, %v3768_v35  ;;  %v4131_v32 = vpop.eup %4130  ;;  %v5842_v5 = vadd.f32 %v5450_v53, %v1691_v7  ;;  %v3935_v30 = vpop.f32.mrb[22].mxu0  ;;  %v2209_v21 = vadd.f32 %v2177_v40, %v2073_v63  ;;  %v2210_v49 = vadd.f32 %v2178_v60, %v2074_v44 }
 0x200   : > { %v1882_v41 = vmul.f32 1.6732632, %v3766_v9  ;;  %v4133_v23 = vpop.eup %4132  ;;  %v3769_v26 = vadd.f32 -1.0, %v4131_v32  ;;  %v1760_v17 = vmin.f32 %v5837_v47, 0.0  ;;  %v1694_v4 = vpop.f32.mrb[23].mxu0  ;;  %v2727_v6 = vadd.f32 %v2695_v10, %v2623_v51 }
 0x201   : > { %v1948_v36 = vsel %vm1916_vm0, %v5755_v28, %v1884_v25  ;;  %v3767_v0 = vadd.f32 -1.0, %v4133_v23  ;;  %v1758_v42 = vmin.f32 %v5842_v5, 0.0  ;;  %v5853_v33 = vadd.f32 %v3935_v30, %v5450_v53 }
 0x202   : > { %v1980_v50 = vmul.f32 1.050701, %v1948_v36  ;;  %v1946_v57 = vsel %vm1914_vm1, %v5758_v56, %v1882_v41  ;;  %v1885_v48 = vmul.f32 1.6732632, %v3769_v26  ;;  %v1814_v2 = vmul.f32 1.442695, %v1760_v17 }
 0x203   : > { %v1978_v58 = vmul.f32 1.050701, %v1946_v57  ;;  %v1883_v28 = vmul.f32 1.6732632, %v3767_v0  ;;  %v1810_v39 = vmul.f32 1.442695, %v1758_v42  ;;  %v5856_v31 = vadd.f32 %v5450_v53, %v1694_v4 }
 0x204   : > { %2012 = vst [vmem:[#allocation2 + $0xf1] sm:$0xff] %v1980_v50  ;;  %v2728_v10 = vadd.f32 %v2696_v54, %v2624_v43  ;;  %v1949_v56 = vsel %vm1917_vm2, %v5764_v62, %v1885_v48  ;;  %4134 = vpow2.f32 %v1814_v2  ;;  %v1761_v63 = vmin.f32 %v5853_v33, 0.0  ;;  %v2449_v54 = vld [vmem:[#allocation2 + $0x79] sm:$0xff]  ;;  %v2450_v62 = vld [vmem:[#allocation2 + $0x81] sm:$0xff] }
 0x205   : > { %2010 = vst [vmem:[#allocation2 + $0xd9] sm:$0xff] %v1978_v58  ;;  %v2385_v55 = vmul.f32 %v5507_v20, %v5799_v3  ;;  %v1981_v12 = vmul.f32 1.050701, %v1949_v56  ;;  %v1947_v44 = vsel %vm1915_vm3, %v5778_v11, %v1883_v28  ;;  %4136 = vpow2.f32 %v1810_v39  ;;  %v5884_v26 = vld [vmem:[#allocation2 + $0x99] sm:$0xff] }
 0x206   : > { %v1759_v40 = vmin.f32 %v5856_v31, 0.0  ;;  %v1979_v60 = vmul.f32 1.050701, %v1947_v44  ;;  %v1816_v1 = vmul.f32 1.442695, %v1761_v63  ;;  %v2831_v35 = vadd.f32 %v2799_v14, %v2727_v6  ;;  %v5890_v6 = vld [vmem:[#allocation2 + $0x92] sm:$0xff] }
 0x207   : > { %v2313_v51 = vadd.f32 %v2281_v16, %v2209_v21  ;;  %2013 = vst [vmem:[#allocation2 + $0xf9] sm:$0xff] %v1981_v12  ;;  %v2832_v61 = vadd.f32 %v2800_v29, %v2728_v10  ;;  %v2314_v25 = vadd.f32 %v2282_v8, %v2210_v49  ;;  %v2386_v7 = vmul.f32 %v5507_v20, %v5801_v37  ;;  %v5872_v16 = vld [vmem:[#allocation2 + $0x90] sm:$0xff]  ;;  %v5876_v8 = vld [vmem:[#allocation2 + $0x98] sm:$0xff] }
 0x208   : > { %v1812_v9 = vmul.f32 1.442695, %v1759_v40  ;;  %2011 = vst [vmem:[#allocation2 + $0xe1] sm:$0xff] %v1979_v60  ;;  %4138 = vpow2.f32 %v1816_v1  ;;  %v2935_v43 = vadd.f32 %v2903_v34, %v2831_v35  ;;  %v2489_v32 = vmul.f32 %v5497_v19, %v2449_v54  ;;  %v5878_v49 = vld [vmem:[#allocation2 + $0x91] sm:$0xff]  ;;  %v5892_v50 = vld [vmem:[#allocation2 + $0x9a] sm:$0xff] }
 0x209   : > { %v2417_v11 = vadd.f32 %v2385_v55, %v2313_v51  ;;  %v2936_v41 = vadd.f32 %v2904_v18, %v2832_v61  ;;  %v2418_v30 = vadd.f32 %v2386_v7, %v2314_v25  ;;  %v2490_v14 = vmul.f32 %v5497_v19, %v2450_v62 }
 0x20a   : > { %4140 = vpow2.f32 %v1812_v9  ;;  %v2593_v29 = vmul.f32 %v5530_v13, %v5814_v38  ;;  %v2974_v34 = vadd.f32 %v5642_v46, %v2935_v43  ;;  %v2594_v18 = vmul.f32 %v5530_v13, %v5816_v24 }
 0x20b   : > { %v2521_v21 = vadd.f32 %v2489_v32, %v2417_v11  ;;  %v2975_v23 = vadd.f32 %v5642_v46, %v2936_v41  ;;  %v2522_v36 = vadd.f32 %v2490_v14, %v2418_v30  ;;  %vm1920_vm4 = vcmp.gt.f32.partialorder %v5837_v47, 0.0 }
 0x20c   : > { %vm1918_vm5 = vcmp.gt.f32.partialorder %v5842_v5, 0.0  ;;  %v2697_v4 = vmul.f32 %v5514_v45, %v5872_v16  ;;  %v2698_v42 = vmul.f32 %v5514_v45, %v5876_v8  ;;  %v2801_v58 = vmul.f32 %v5502_v15, %v5878_v49 }
 0x20d   : > { %v2625_v17 = vadd.f32 %v2593_v29, %v2521_v21  ;;  %v3003_v57 = vpack.c.bf16 %v2975_v23, %v2974_v34  ;;  %v2626_v0 = vadd.f32 %v2594_v18, %v2522_v36  ;;  %vm1921_vm6 = vcmp.gt.f32.partialorder %v5853_v33, 0.0 }
 0x20e   : > { %v4135_v48 = vpop.eup %4134  ;;  %v2802_v28 = vmul.f32 %v5502_v15, %v5884_v26  ;;  %v2075_v39 = vmul.f32 %v5459_v52, %v5799_v3  ;;  %v2179_v10 = vmul.f32 %v5464_v22, %v2449_v54  ;;  %vm1919_vm7 = vcmp.gt.f32.partialorder %v5856_v31, 0.0 }
 0x20f   : > { %v2729_v2 = vadd.f32 %v2697_v4, %v2625_v17  ;;  %v4137_v56 = vpop.eup %4136  ;;  %v3772_v63 = vadd.f32 -1.0, %v4135_v48  ;;  %3965 = vmatmul.mubr.bf16.gmra.mrb[4].mxu1 %v3003_v57  ;;  %v2730_v12 = vadd.f32 %v2698_v42, %v2626_v0  ;;  %v2905_v44 = vmul.f32 %v5608_v59, %v5890_v6  ;;  %v5934_v17 = vld [vmem:[%s6648_s4] ss:$0 sm:$0xff] }
 0x210   : > { %v3938_v55 = vpop.f32.mrb[24].mxu0  ;;  %v2906_v40 = vmul.f32 %v5608_v59, %v5892_v50  ;;  %v3770_v60 = vadd.f32 -1.0, %v4137_v56  ;;  %v2076_v54 = vmul.f32 %v5459_v52, %v5801_v37  ;;  %v2180_v35 = vmul.f32 %v5464_v22, %v2450_v62 }
 0x211   : > { %v5910_v1 = vadd.f32 %v3938_v55, %v5450_v53  ;;  %v1707_v3 = vpop.f32.mrb[25].mxu0  ;;  %v1888_v51 = vmul.f32 1.6732632, %v3772_v63  ;;  %v2833_v25 = vadd.f32 %v2801_v58, %v2729_v2  ;;  %v2283_v7 = vmul.f32 %v5488_v27, %v5814_v38 }
 0x212   : > { %v5916_v9 = vadd.f32 %v5450_v53, %v1707_v3  ;;  %v3939_v61 = vpop.f32.mrb[26].mxu0  ;;  %v4139_v43 = vpop.eup %4138  ;;  %v1886_v11 = vmul.f32 1.6732632, %v3770_v60  ;;  %v2211_v52 = vadd.f32 %v2179_v10, %v2075_v39  ;;  %v2834_v21 = vadd.f32 %v2802_v28, %v2730_v12  ;;  %v5960_v3 = vld [vmem:[#allocation2 + $0xb0] sm:$0xff] }
 0x213   : > { %v1764_v32 = vmin.f32 %v5910_v1, 0.0  ;;  %v5922_v41 = vadd.f32 %v3939_v61, %v5450_v53  ;;  %v1710_v30 = vpop.f32.mrb[27].mxu0  ;;  %v1952_v22 = vsel %vm1920_vm4, %v5837_v47, %v1888_v51  ;;  %v3773_v62 = vadd.f32 -1.0, %v4139_v43 }
 0x214   : > { %v4141_v37 = vpop.eup %4140  ;;  %v1762_v14 = vmin.f32 %v5916_v9, 0.0  ;;  %v1984_v29 = vmul.f32 1.050701, %v1952_v22  ;;  %v1950_v38 = vsel %vm1918_vm5, %v5842_v5, %v1886_v11  ;;  %v5937_v47 = vadd.f32 %v5934_v17, %v1710_v30  ;;  %v5975_v30 = vld [vmem:[#allocation2 + $0xaa] sm:$0xff]  ;;  %v5984_v22 = vld [vmem:[%s6649_s5] ss:$0 sm:$0xff] }
 0x215   : > { %v3771_v34 = vadd.f32 -1.0, %v4141_v37  ;;  %v1822_v23 = vmul.f32 1.442695, %v1764_v32  ;;  %v1982_v53 = vmul.f32 1.050701, %v1950_v38  ;;  %v1765_v57 = vmin.f32 %v5922_v41, 0.0 }
 0x216   : > { %v1889_v36 = vmul.f32 1.6732632, %v3773_v62  ;;  %v1818_v18 = vmul.f32 1.442695, %v1762_v14  ;;  %2016 = vst [vmem:[#allocation2 + $0x121] sm:$0xff] %v1984_v29  ;;  %v2212_v0 = vadd.f32 %v2180_v35, %v2076_v54  ;;  %v1763_v42 = vmin.f32 %v5937_v47, 0.0 }
 0x217   : > { %v1887_v4 = vmul.f32 1.6732632, %v3771_v34  ;;  %4142 = vpow2.f32 %v1822_v23  ;;  %2014 = vst [vmem:[#allocation2 + $0x109] sm:$0xff] %v1982_v53  ;;  %v2284_v58 = vmul.f32 %v5488_v27, %v5816_v24  ;;  %v1824_v28 = vmul.f32 1.442695, %v1765_v57  ;;  %v5962_v54 = vld [vmem:[#allocation2 + $0xa9] sm:$0xff] }
 0x218   : > { %v1953_v5 = vsel %vm1921_vm6, %v5853_v33, %v1889_v36  ;;  %4144 = vpow2.f32 %v1818_v18  ;;  %v2937_v39 = vadd.f32 %v2905_v44, %v2833_v25  ;;  %v1820_v56 = vmul.f32 1.442695, %v1763_v42  ;;  %v5955_v44 = vld [vmem:[#allocation2 + $0xa8] sm:$0xff]  ;;  %v5973_v32 = vld [vmem:[#allocation2 + $0xb1] sm:$0xff] }
 0x219   : > { %v1985_v48 = vmul.f32 1.050701, %v1953_v5  ;;  %v1951_v2 = vsel %vm1919_vm7, %v5856_v31, %v1887_v4  ;;  %v2938_v63 = vadd.f32 %v2906_v40, %v2834_v21  ;;  %v2315_v55 = vadd.f32 %v2283_v7, %v2211_v52 }
 0x21a   : > { %v1983_v10 = vmul.f32 1.050701, %v1951_v2  ;;  %4146 = vpow2.f32 %v1824_v28  ;;  %v2316_v33 = vadd.f32 %v2284_v58, %v2212_v0  ;;  %v2387_v12 = vmul.f32 %v5507_v20, %v5872_v16 }
 0x21b   : > { %2017 = vst [vmem:[#allocation2 + $0x129] sm:$0xff] %v1985_v48  ;;  %4148 = vpow2.f32 %v1820_v56  ;;  %v2976_v27 = vadd.f32 %v5642_v46, %v2937_v39  ;;  %v2977_v24 = vadd.f32 %v5642_v46, %v2938_v63  ;;  %v2388_v31 = vmul.f32 %v5507_v20, %v5876_v8 }
 0x21c   : > { %2015 = vst [vmem:[#allocation2 + $0x111] sm:$0xff] %v1983_v10  ;;  %vm1924_vm8 = vcmp.gt.f32.partialorder %v5910_v1, 0.0  ;;  %v2419_v40 = vadd.f32 %v2387_v12, %v2315_v55  ;;  %v2491_v60 = vmul.f32 %v5497_v19, %v5878_v49  ;;  %vm1922_vm9 = vcmp.gt.f32.partialorder %v5916_v9, 0.0 }
 0x21d   : > { %v3004_v35 = vpack.c.bf16 %v2977_v24, %v2976_v27  ;;  %v2420_v51 = vadd.f32 %v2388_v31, %v2316_v33  ;;  %v2492_v61 = vmul.f32 %v5497_v19, %v5884_v26  ;;  %v2595_v7 = vmul.f32 %v5530_v13, %v5890_v6  ;;  %v6029_v33 = vld [vmem:[%s6649_s5 + $0x3] ss:$0 sm:$0xff] }
 0x21e   : > { %v2523_v25 = vadd.f32 %v2491_v60, %v2419_v40  ;;  %v2596_v43 = vmul.f32 %v5530_v13, %v5892_v50  ;;  %v2699_v11 = vmul.f32 %v5514_v45, %v5955_v44  ;;  %v2700_v37 = vmul.f32 %v5514_v45, %v5960_v3  ;;  %v5994_v45 = vld [vmem:[%s6649_s5 + $0x1] ss:$0 sm:$0xff] }
 0x21f   : > { %3968 = vmatprep.mubr.bf16.mxu1 %v3004_v35  ;;  %v2524_v52 = vadd.f32 %v2492_v61, %v2420_v51  ;;  %v2803_v19 = vmul.f32 %v5502_v15, %v5962_v54  ;;  %v2077_v13 = vmul.f32 %v5984_v22, %v5872_v16  ;;  %vm1925_vm10 = vcmp.gt.f32.partialorder %v5922_v41, 0.0 }
 0x220   : > { %v2627_v14 = vadd.f32 %v2595_v7, %v2523_v25  ;;  %v2078_v21 = vmul.f32 %v5984_v22, %v5876_v8  ;;  %v2181_v29 = vmul.f32 %v5994_v45, %v5878_v49  ;;  %v2182_v38 = vmul.f32 %v5994_v45, %v5884_v26  ;;  %v6008_v49 = vld [vmem:[%s6649_s5 + $0x2] ss:$0 sm:$0xff] }
 0x221   : > { %v4143_v62 = vpop.eup %4142  ;;  %vm1923_vm11 = vcmp.gt.f32.partialorder %v5937_v47, 0.0  ;;  %v2628_v23 = vadd.f32 %v2596_v43, %v2524_v52  ;;  %v2804_v53 = vmul.f32 %v5502_v15, %v5973_v32  ;;  %v2907_v8 = vmul.f32 %v5608_v59, %v5975_v30 }
 0x222   : > { %v4145_v34 = vpop.eup %4144  ;;  %v3776_v16 = vadd.f32 -1.0, %v4143_v62  ;;  %v3942_v18 = vpop.f32.mrb[28].mxu0  ;;  %v2285_v26 = vmul.f32 %v6008_v49, %v5890_v6  ;;  %v2286_v4 = vmul.f32 %v6008_v49, %v5892_v50  ;;  %v2389_v57 = vmul.f32 %v5507_v20, %v5955_v44 }
 0x223   : > { %v3774_v36 = vadd.f32 -1.0, %v4145_v34  ;;  %v6017_v0 = vadd.f32 %v5934_v17, %v3942_v18  ;;  %v1723_v5 = vpop.f32.mrb[29].mxu0  ;;  %v2731_v42 = vadd.f32 %v2699_v11, %v2627_v14  ;;  %v2213_v58 = vadd.f32 %v2181_v29, %v2077_v13  ;;  %v2868_v11 = vld [vmem:[#allocation2 + $0xb2] sm:$0xff] }
 0x224   : > { %v1892_v15 = vmul.f32 1.6732632, %v3776_v16  ;;  %v4147_v48 = vpop.eup %4146  ;;  %v6020_v28 = vadd.f32 %v5934_v17, %v1723_v5  ;;  %v3943_v39 = vpop.f32.mrb[30].mxu0  ;;  %v2732_v6 = vadd.f32 %v2700_v37, %v2628_v23  ;;  %v2214_v10 = vadd.f32 %v2182_v38, %v2078_v21  ;;  %v6052_v23 = vld [vmem:[#allocation2 + $0xc0] sm:$0xff] }
 0x225   : > { %v1890_v2 = vmul.f32 1.6732632, %v3774_v36  ;;  %v4149_v56 = vpop.eup %4148  ;;  %v3777_v50 = vadd.f32 -1.0, %v4147_v48  ;;  %v1768_v63 = vmin.f32 %v6017_v0, 0.0  ;;  %v1726_v55 = vpop.f32.mrb[31].mxu0  ;;  %v2390_v12 = vmul.f32 %v6029_v33, %v5960_v3  ;;  %v6079_v48 = vld [vmem:[#allocation2 + $0xca] sm:$0xff] }
 0x226   : > { %v1956_v20 = vsel %vm1924_vm8, %v5910_v1, %v1892_v15  ;;  %v3775_v31 = vadd.f32 -1.0, %v4149_v56  ;;  %v1766_v1 = vmin.f32 %v6020_v28, 0.0  ;;  %v6038_v51 = vadd.f32 %v5934_v17, %v3943_v39  ;;  %v6073_v5 = vld [vmem:[%s6649_s5 + $0x5] ss:$0 sm:$0xff] }
 0x227   : > { %v1988_v27 = vmul.f32 1.050701, %v1956_v20  ;;  %v1954_v24 = vsel %vm1922_vm9, %v5916_v9, %v1890_v2  ;;  %v1893_v60 = vmul.f32 1.6732632, %v3777_v50  ;;  %v1830_v35 = vmul.f32 1.442695, %v1768_v63 }
 0x228   : > { %v1986_v40 = vmul.f32 1.050701, %v1954_v24  ;;  %v1891_v61 = vmul.f32 1.6732632, %v3775_v31  ;;  %v1826_v25 = vmul.f32 1.442695, %v1766_v1  ;;  %v6041_v7 = vadd.f32 %v5934_v17, %v1726_v55 }
 0x229   : > { %2020 = vst [vmem:[#allocation2 + $0x151] sm:$0xff] %v1988_v27  ;;  %v2835_v43 = vadd.f32 %v2803_v19, %v2731_v42  ;;  %v1957_v9 = vsel %vm1925_vm10, %v5922_v41, %v1893_v60  ;;  %4150 = vpow2.f32 %v1830_v35  ;;  %v1769_v52 = vmin.f32 %v6038_v51, 0.0 }
 0x22a   : > { %2018 = vst [vmem:[#allocation2 + $0x139] sm:$0xff] %v1986_v40  ;;  %v2317_v37 = vadd.f32 %v2285_v26, %v2213_v58  ;;  %v1989_v13 = vmul.f32 1.050701, %v1957_v9  ;;  %v1955_v62 = vsel %vm1923_vm11, %v5937_v47, %v1891_v61  ;;  %4152 = vpow2.f32 %v1826_v25  ;;  %v6057_v47 = vld [vmem:[%s6649_s5 + $0x4] ss:$0 sm:$0xff]  ;;  %v6063_v26 = vld [vmem:[#allocation2 + $0xc8] sm:$0xff] }
 0x22b   : > { %v1767_v17 = vmin.f32 %v6041_v7, 0.0  ;;  %v1987_v14 = vmul.f32 1.050701, %v1955_v62  ;;  %v1832_v19 = vmul.f32 1.442695, %v1769_v52  ;;  %v2836_v21 = vadd.f32 %v2804_v53, %v2732_v6  ;;  %v6077_v58 = vld [vmem:[#allocation2 + $0xc2] sm:$0xff] }
 0x22c   : > { %v2908_v29 = vmul.f32 %v5608_v59, %v2868_v11  ;;  %2021 = vst [vmem:[#allocation2 + $0x159] sm:$0xff] %v1989_v13  ;;  %v2939_v41 = vadd.f32 %v2907_v8, %v2835_v43  ;;  %v2318_v34 = vadd.f32 %v2286_v4, %v2214_v10  ;;  %v2421_v16 = vadd.f32 %v2389_v57, %v2317_v37  ;;  %v6065_v8 = vld [vmem:[#allocation2 + $0xc1] sm:$0xff]  ;;  %v6067_v4 = vld [vmem:[#allocation2 + $0xc9] sm:$0xff] }
 0x22d   : > { %v1828_v38 = vmul.f32 1.442695, %v1767_v17  ;;  %2019 = vst [vmem:[#allocation2 + $0x141] sm:$0xff] %v1987_v14  ;;  %4154 = vpow2.f32 %v1832_v19  ;;  %v2493_v53 = vmul.f32 %v6057_v47, %v5962_v54  ;;  %v2494_v18 = vmul.f32 %v6057_v47, %v5973_v32  ;;  %v6087_v10 = vld [vmem:[%s6649_s5 + $0x6] ss:$0 sm:$0xff] }
 0x22e   : > { %v2940_v36 = vadd.f32 %v2908_v29, %v2836_v21  ;;  %v2978_v57 = vadd.f32 %v5642_v46, %v2939_v41  ;;  %v2422_v15 = vadd.f32 %v2390_v12, %v2318_v34  ;;  %v2597_v42 = vmul.f32 %v6073_v5, %v5975_v30 }
 0x22f   : > { %4156 = vpow2.f32 %v1828_v38  ;;  %vm1928_vm12 = vcmp.gt.f32.partialorder %v6017_v0, 0.0  ;;  %v2525_v39 = vadd.f32 %v2493_v53, %v2421_v16  ;;  %v2598_v6 = vmul.f32 %v6073_v5, %v2868_v11 }
 0x230   : > { %v2979_v2 = vadd.f32 %v5642_v46, %v2940_v36  ;;  %v2701_v56 = vmul.f32 %v6087_v10, %v6052_v23  ;;  %vm1926_vm13 = vcmp.gt.f32.partialorder %v6020_v28, 0.0  ;;  %v2526_v20 = vadd.f32 %v2494_v18, %v2422_v15  ;;  %v6097_v46 = vld [vmem:[%s6649_s5 + $0x7] ss:$0 sm:$0xff] }
 0x231   : > { %v2702_v50 = vmul.f32 %v6087_v10, %v6063_v26  ;;  %v2805_v63 = vmul.f32 %v6097_v46, %v6065_v8  ;;  %v2806_v55 = vmul.f32 %v6097_v46, %v6067_v4  ;;  %v2629_v27 = vadd.f32 %v2597_v42, %v2525_v39  ;;  %v6137_v39 = vld [vmem:[%s6650_s6] ss:$0 sm:$0xff] }
 0x232   : > { %v3005_v12 = vpack.c.bf16 %v2979_v2, %v2978_v57  ;;  %v2909_v24 = vmul.f32 %v5608_v59, %v6077_v58  ;;  %v2910_v31 = vmul.f32 %v5608_v59, %v6079_v48  ;;  %v2630_v1 = vadd.f32 %v2598_v6, %v2526_v20 }
 0x233   : > { %v2079_v40 = vmul.f32 %v5984_v22, %v5955_v44  ;;  %v2080_v60 = vmul.f32 %v5984_v22, %v5960_v3  ;;  %v2183_v35 = vmul.f32 %v5994_v45, %v5962_v54  ;;  %v4151_v61 = vpop.eup %4150  ;;  %vm1929_vm14 = vcmp.gt.f32.partialorder %v6038_v51, 0.0 }
 0x234   : > { %3969 = vmatmul.mubr.bf16.gmra.mrb[8].mxu1 %v3005_v12  ;;  %v2733_v25 = vadd.f32 %v2701_v56, %v2629_v27  ;;  %v2184_v43 = vmul.f32 %v5994_v45, %v5973_v32  ;;  %v2287_v59 = vmul.f32 %v6008_v49, %v5975_v30  ;;  %v2288_v9 = vmul.f32 %v6008_v49, %v2868_v11  ;;  %v4153_v44 = vpop.eup %4152  ;;  %v6140_v56 = vld [vmem:[#allocation2 + $0xd8] sm:$0xff] }
 0x235   : > { %v3780_v52 = vadd.f32 -1.0, %v4151_v61  ;;  %vm1927_vm15 = vcmp.gt.f32.partialorder %v6041_v7, 0.0  ;;  %v2734_v3 = vadd.f32 %v2702_v50, %v2630_v1  ;;  %v2215_v37 = vadd.f32 %v2183_v35, %v2079_v40  ;;  %v6151_v1 = vld [vmem:[#allocation2 + $0xe1] sm:$0xff] }
 0x236   : > { %v2391_v54 = vmul.f32 %v6029_v33, %v6052_v23  ;;  %v3778_v13 = vadd.f32 -1.0, %v4153_v44  ;;  %v2837_v62 = vadd.f32 %v2805_v63, %v2733_v25  ;;  %v2216_v17 = vadd.f32 %v2184_v43, %v2080_v60  ;;  %v2871_v25 = vld [vmem:[#allocation2 + $0xda] sm:$0xff]  ;;  %v6158_v43 = vld [vmem:[#allocation2 + $0xe2] sm:$0xff] }
 0x237   : > { %v2392_v32 = vmul.f32 %v6029_v33, %v6063_v26  ;;  %v1896_v14 = vmul.f32 1.6732632, %v3780_v52  ;;  %v2838_v19 = vadd.f32 %v2806_v55, %v2734_v3  ;;  %v2319_v30 = vadd.f32 %v2287_v59, %v2215_v37  ;;  %v4155_v21 = vpop.eup %4154  ;;  %v6143_v55 = vld [vmem:[#allocation2 + $0xe0] sm:$0xff] }
 0x238   : > { %v2495_v11 = vmul.f32 %v6057_v47, %v6065_v8  ;;  %v1894_v29 = vmul.f32 1.6732632, %v3778_v13  ;;  %v2941_v38 = vadd.f32 %v2909_v24, %v2837_v62  ;;  %v2320_v41 = vadd.f32 %v2288_v9, %v2216_v17  ;;  %v6172_v62 = vld [vmem:[%s6649_s5 + $0x8] ss:$0 sm:$0xff] }
 0x239   : > { %v2496_v34 = vmul.f32 %v6057_v47, %v6067_v4  ;;  %v4157_v16 = vpop.eup %4156  ;;  %v1960_v36 = vsel %vm1928_vm12, %v6017_v0, %v1896_v14  ;;  %v3781_v53 = vadd.f32 -1.0, %v4155_v21  ;;  %v2942_v18 = vadd.f32 %v2910_v31, %v2838_v19  ;;  %v6149_v31 = vld [vmem:[#allocation2 + $0xd9] sm:$0xff] }
 0x23a   : > { %v2423_v57 = vadd.f32 %v2391_v54, %v2319_v30  ;;  %v1992_v15 = vmul.f32 1.050701, %v1960_v36  ;;  %v1958_v42 = vsel %vm1926_vm13, %v6020_v28, %v1894_v29  ;;  %v3779_v2 = vadd.f32 -1.0, %v4157_v16 }
 0x23b   : > { %v2980_v6 = vadd.f32 %v6137_v39, %v2941_v38  ;;  %v1990_v20 = vmul.f32 1.050701, %v1958_v42  ;;  %v1897_v0 = vmul.f32 1.6732632, %v3781_v53  ;;  %v2981_v50 = vadd.f32 %v6137_v39, %v2942_v18  ;;  %v2666_v53 = vld [vmem:[#allocation2 + $0xf8] sm:$0xff] }
 0x23c   : > { %v2424_v63 = vadd.f32 %v2392_v32, %v2320_v41  ;;  %2024 = vst [vmem:[#allocation2 + $0x181] sm:$0xff] %v1992_v15  ;;  %v1895_v12 = vmul.f32 1.6732632, %v3779_v2  ;;  %v2527_v28 = vadd.f32 %v2495_v11, %v2423_v57  ;;  %v2599_v27 = vmul.f32 %v6073_v5, %v6077_v58  ;;  %v2769_v15 = vld [vmem:[#allocation2 + $0xf1] sm:$0xff]  ;;  %v2770_v42 = vld [vmem:[#allocation2 + $0xf9] sm:$0xff] }
 0x23d   : > { %v2600_v24 = vmul.f32 %v6073_v5, %v6079_v48  ;;  %2022 = vst [vmem:[#allocation2 + $0x169] sm:$0xff] %v1990_v20  ;;  %v1961_v40 = vsel %vm1929_vm14, %v6038_v51, %v1897_v0  ;;  %v3006_v60 = vpack.c.bf16 %v2981_v50, %v2980_v6  ;;  %v2703_v61 = vmul.f32 %v6087_v10, %v6140_v56 }
 0x23e   : > { %v2528_v35 = vadd.f32 %v2496_v34, %v2424_v63  ;;  %v1993_v59 = vmul.f32 1.050701, %v1961_v40  ;;  %v1959_v9 = vsel %vm1927_vm15, %v6041_v7, %v1895_v12  ;;  %v2631_v44 = vadd.f32 %v2599_v27, %v2527_v28  ;;  %v2873_v27 = vld [vmem:[#allocation2 + $0xf2] sm:$0xff] }
 0x23f   : > { %v2704_v52 = vmul.f32 %v6087_v10, %v6143_v55  ;;  %v1991_v3 = vmul.f32 1.050701, %v1959_v9  ;;  %3972 = vmatprep.mubr.bf16.mxu1 %v3006_v60  ;;  %v2807_v37 = vmul.f32 %v6097_v46, %v6149_v31  ;;  %v2808_v54 = vmul.f32 %v6097_v46, %v6151_v1 }
 0x240   : > { %v2632_v51 = vadd.f32 %v2600_v24, %v2528_v35  ;;  %2025 = vst [vmem:[#allocation2 + $0x189] sm:$0xff] %v1993_v59  ;;  %v2735_v13 = vadd.f32 %v2703_v61, %v2631_v44  ;;  %v2911_v7 = vmul.f32 %v6172_v62, %v2871_v25  ;;  %v2912_v17 = vmul.f32 %v6172_v62, %v6158_v43  ;;  %v2874_v24 = vld [vmem:[#allocation2 + $0xfa] sm:$0xff] }
 0x241   : > { %v2081_v32 = vmul.f32 %v5984_v22, %v6052_v23  ;;  %2023 = vst [vmem:[#allocation2 + $0x171] sm:$0xff] %v1991_v3  ;;  %v2082_v19 = vmul.f32 %v5984_v22, %v6063_v26  ;;  %v2185_v30 = vmul.f32 %v5994_v45, %v6065_v8  ;;  %v2186_v11 = vmul.f32 %v5994_v45, %v6067_v4  ;;  %v2665_v8 = vld [vmem:[#allocation2 + $0xf0] sm:$0xff] }
 0x242   : > { %v2736_v14 = vadd.f32 %v2704_v52, %v2632_v51  ;;  %v2839_v21 = vadd.f32 %v2807_v37, %v2735_v13  ;;  %v2289_v29 = vmul.f32 %v6008_v49, %v6077_v58  ;;  %v2290_v38 = vmul.f32 %v6008_v49, %v6079_v48 }
 0x243   : > { %v2393_v23 = vmul.f32 %v6029_v33, %v6140_v56  ;;  %v2217_v34 = vadd.f32 %v2185_v30, %v2081_v32  ;;  %v2218_v16 = vadd.f32 %v2186_v11, %v2082_v19  ;;  %v2394_v26 = vmul.f32 %v6029_v33, %v6143_v55  ;;  %v6224_v30 = vld [vmem:[#allocation2 + $0x110] sm:$0xff] }
 0x244   : > { %v2840_v41 = vadd.f32 %v2808_v54, %v2736_v14  ;;  %v2943_v36 = vadd.f32 %v2911_v7, %v2839_v21  ;;  %v2497_v4 = vmul.f32 %v6057_v47, %v6149_v31  ;;  %v2498_v48 = vmul.f32 %v6057_v47, %v6151_v1 }
 0x245   : > { %v2321_v58 = vadd.f32 %v2289_v29, %v2217_v34  ;;  %v2322_v57 = vadd.f32 %v2290_v38, %v2218_v16  ;;  %v2601_v6 = vmul.f32 %v6073_v5, %v2871_v25  ;;  %v2602_v20 = vmul.f32 %v6073_v5, %v6158_v43  ;;  %v6227_v29 = vld [vmem:[#allocation2 + $0x109] sm:$0xff]  ;;  %v6229_v38 = vld [vmem:[#allocation2 + $0x111] sm:$0xff] }
 0x246   : > { %v2944_v18 = vadd.f32 %v2912_v17, %v2840_v41  ;;  %v2982_v2 = vadd.f32 %v6137_v39, %v2943_v36  ;;  %v2705_v0 = vmul.f32 %v6087_v10, %v2665_v8  ;;  %v2706_v28 = vmul.f32 %v6087_v10, %v2666_v53  ;;  %v6219_v17 = vld [vmem:[#allocation2 + $0x108] sm:$0xff] }
 0x247   : > { %v2425_v63 = vadd.f32 %v2393_v23, %v2321_v58  ;;  %v2426_v12 = vadd.f32 %v2394_v26, %v2322_v57  ;;  %v2809_v40 = vmul.f32 %v6097_v46, %v2769_v15  ;;  %v2810_v60 = vmul.f32 %v6097_v46, %v2770_v42 }
 0x248   : > { %v2983_v50 = vadd.f32 %v6137_v39, %v2944_v18  ;;  %v2083_v35 = vmul.f32 %v5984_v22, %v6140_v56  ;;  %v2084_v61 = vmul.f32 %v5984_v22, %v6143_v55  ;;  %v2187_v52 = vmul.f32 %v5994_v45, %v6149_v31 }
 0x249   : > { %v2529_v9 = vadd.f32 %v2497_v4, %v2425_v63  ;;  %v2530_v44 = vadd.f32 %v2498_v48, %v2426_v12  ;;  %v2913_v3 = vmul.f32 %v6172_v62, %v2873_v27  ;;  %v2914_v51 = vmul.f32 %v6172_v62, %v2874_v24  ;;  %v2875_v63 = vld [vmem:[#allocation2 + $0x10a] sm:$0xff] }
 0x24a   : > { %v3007_v59 = vpack.c.bf16 %v2983_v50, %v2982_v2  ;;  %v2188_v37 = vmul.f32 %v5994_v45, %v6151_v1  ;;  %v2291_v54 = vmul.f32 %v6008_v49, %v2871_v25  ;;  %v2219_v7 = vadd.f32 %v2187_v52, %v2083_v35 }
 0x24b   : > { %v2633_v56 = vadd.f32 %v2601_v6, %v2529_v9  ;;  %v2634_v13 = vadd.f32 %v2602_v20, %v2530_v44  ;;  %v2292_v55 = vmul.f32 %v6008_v49, %v6158_v43  ;;  %v2395_v31 = vmul.f32 %v6029_v33, %v2665_v8 }
 0x24c   : > { %3973 = vmatmul.mubr.bf16.gmra.mrb[12].mxu1 %v3007_v59  ;;  %v2220_v32 = vadd.f32 %v2188_v37, %v2084_v61  ;;  %v2396_v14 = vmul.f32 %v6029_v33, %v2666_v53  ;;  %v2499_v19 = vmul.f32 %v6057_v47, %v2769_v15  ;;  %v2323_v11 = vadd.f32 %v2291_v54, %v2219_v7  ;;  %v2876_v59 = vld [vmem:[#allocation2 + $0x112] sm:$0xff]  ;;  %v6259_v7 = vld [vmem:[#allocation2 + $0x121] sm:$0xff] }
 0x24d   : > { %v2737_v1 = vadd.f32 %v2705_v0, %v2633_v56  ;;  %v2738_v25 = vadd.f32 %v2706_v28, %v2634_v13  ;;  %v2500_v21 = vmul.f32 %v6057_v47, %v2770_v42  ;;  %v2603_v23 = vmul.f32 %v6073_v5, %v2873_v27  ;;  %v6255_v13 = vld [vmem:[#allocation2 + $0x120] sm:$0xff] }
 0x24e   : > { %v2324_v43 = vadd.f32 %v2292_v55, %v2220_v32  ;;  %v2604_v41 = vmul.f32 %v6073_v5, %v2874_v24  ;;  %v2707_v34 = vmul.f32 %v6087_v10, %v6219_v17  ;;  %v2427_v36 = vadd.f32 %v2395_v31, %v2323_v11 }
 0x24f   : > { %v2841_v16 = vadd.f32 %v2809_v40, %v2737_v1  ;;  %v2842_v26 = vadd.f32 %v2810_v60, %v2738_v25  ;;  %v2708_v4 = vmul.f32 %v6087_v10, %v6224_v30  ;;  %v2811_v58 = vmul.f32 %v6097_v46, %v6227_v29 }
 0x250   : > { %v2428_v18 = vadd.f32 %v2396_v14, %v2324_v43  ;;  %v2812_v57 = vmul.f32 %v6097_v46, %v6229_v38  ;;  %v2085_v48 = vmul.f32 %v5984_v22, %v2665_v8  ;;  %v2531_v20 = vadd.f32 %v2499_v19, %v2427_v36  ;;  %v6266_v19 = vld [vmem:[#allocation2 + $0x129] sm:$0xff] }
 0x251   : > { %v2945_v2 = vadd.f32 %v2913_v3, %v2841_v16  ;;  %v2946_v6 = vadd.f32 %v2914_v51, %v2842_v26  ;;  %v2086_v0 = vmul.f32 %v5984_v22, %v2666_v53  ;;  %v2189_v12 = vmul.f32 %v5994_v45, %v2769_v15 }
 0x252   : > { %v2532_v50 = vadd.f32 %v2500_v21, %v2428_v18  ;;  %v2190_v28 = vmul.f32 %v5994_v45, %v2770_v42  ;;  %v2293_v40 = vmul.f32 %v6008_v49, %v2873_v27  ;;  %v2635_v61 = vadd.f32 %v2603_v23, %v2531_v20  ;;  %v2877_v18 = vld [vmem:[#allocation2 + $0x122] sm:$0xff] }
 0x253   : > { %v2984_v60 = vadd.f32 %v6137_v39, %v2945_v2  ;;  %v2985_v35 = vadd.f32 %v6137_v39, %v2946_v6  ;;  %v2294_v8 = vmul.f32 %v6008_v49, %v2874_v24  ;;  %v2221_v44 = vadd.f32 %v2189_v12, %v2085_v48  ;;  %v6257_v24 = vld [vmem:[#allocation2 + $0x128] sm:$0xff] }
 0x254   : > { %v2636_v9 = vadd.f32 %v2604_v41, %v2532_v50  ;;  %v2222_v52 = vadd.f32 %v2190_v28, %v2086_v0  ;;  %v2397_v53 = vmul.f32 %v6029_v33, %v6219_v17  ;;  %v2739_v15 = vadd.f32 %v2707_v34, %v2635_v61  ;;  %v2878_v50 = vld [vmem:[#allocation2 + $0x12a] sm:$0xff] }
 0x255   : > { %v3008_v3 = vpack.c.bf16 %v2985_v35, %v2984_v60  ;;  %v2915_v42 = vmul.f32 %v6172_v62, %v2875_v63  ;;  %v2398_v27 = vmul.f32 %v6029_v33, %v6224_v30  ;;  %v2916_v37 = vmul.f32 %v6172_v62, %v2876_v59 }
 0x256   : > { %v2740_v51 = vadd.f32 %v2708_v4, %v2636_v9  ;;  %v2325_v54 = vadd.f32 %v2293_v40, %v2221_v44  ;;  %v2326_v56 = vadd.f32 %v2294_v8, %v2222_v52  ;;  %v2843_v55 = vadd.f32 %v2811_v58, %v2739_v15  ;;  %v6295_v52 = vld [vmem:[#allocation2 + $0x138] sm:$0xff]  ;;  %v6299_v15 = vld [vmem:[#allocation2 + $0x140] sm:$0xff] }
 0x257   : > { %3976 = vmatprep.mubr.bf16.mxu1 %v3008_v3  ;;  %v2501_v32 = vmul.f32 %v6057_v47, %v6227_v29  ;;  %v2502_v31 = vmul.f32 %v6057_v47, %v6229_v38  ;;  %v2605_v14 = vmul.f32 %v6073_v5, %v2875_v63  ;;  %v2606_v21 = vmul.f32 %v6073_v5, %v2876_v59 }
 0x258   : > { %v2844_v1 = vadd.f32 %v2812_v57, %v2740_v51  ;;  %v2429_v25 = vadd.f32 %v2397_v53, %v2325_v54  ;;  %v2430_v11 = vadd.f32 %v2398_v27, %v2326_v56  ;;  %v2947_v43 = vadd.f32 %v2915_v42, %v2843_v55  ;;  %v6301_v42 = vld [vmem:[#allocation2 + $0x139] sm:$0xff]  ;;  %v6303_v27 = vld [vmem:[#allocation2 + $0x141] sm:$0xff] }
 0x259   : > { %v2709_v23 = vmul.f32 %v6087_v10, %v6255_v13  ;;  %v2710_v41 = vmul.f32 %v6087_v10, %v6257_v24  ;;  %v2813_v34 = vmul.f32 %v6097_v46, %v6259_v7  ;;  %v2814_v4 = vmul.f32 %v6097_v46, %v6266_v19 }
 0x25a   : > { %v2948_v16 = vadd.f32 %v2916_v37, %v2844_v1  ;;  %v2533_v26 = vadd.f32 %v2501_v32, %v2429_v25  ;;  %v2534_v36 = vadd.f32 %v2502_v31, %v2430_v11  ;;  %v2986_v58 = vadd.f32 %v6137_v39, %v2947_v43 }
 0x25b   : > { %v2087_v57 = vmul.f32 %v5984_v22, %v6219_v17  ;;  %v2088_v48 = vmul.f32 %v5984_v22, %v6224_v30  ;;  %v2191_v2 = vmul.f32 %v5994_v45, %v6227_v29  ;;  %v2192_v12 = vmul.f32 %v5994_v45, %v6229_v38 }
 0x25c   : > { %v2987_v6 = vadd.f32 %v6137_v39, %v2948_v16  ;;  %v2637_v20 = vadd.f32 %v2605_v14, %v2533_v26  ;;  %v2638_v0 = vadd.f32 %v2606_v21, %v2534_v36  ;;  %v2917_v28 = vmul.f32 %v6172_v62, %v2877_v18  ;;  %v2879_v26 = vld [vmem:[#allocation2 + $0x13a] sm:$0xff]  ;;  %v2880_v36 = vld [vmem:[#allocation2 + $0x142] sm:$0xff] }
 0x25d   : > { %v2223_v40 = vadd.f32 %v2191_v2, %v2087_v57  ;;  %v2295_v60 = vmul.f32 %v6008_v49, %v2875_v63  ;;  %v2296_v17 = vmul.f32 %v6008_v49, %v2876_v59  ;;  %v2224_v8 = vadd.f32 %v2192_v12, %v2088_v48 }
 0x25e   : > { %v3009_v35 = vpack.c.bf16 %v2987_v6, %v2986_v58  ;;  %v2741_v30 = vadd.f32 %v2709_v23, %v2637_v20  ;;  %v2742_v61 = vadd.f32 %v2710_v41, %v2638_v0  ;;  %v2918_v29 = vmul.f32 %v6172_v62, %v2878_v50 }
 0x25f   : > { %v2327_v9 = vadd.f32 %v2295_v60, %v2223_v40  ;;  %v2399_v44 = vmul.f32 %v6029_v33, %v6255_v13  ;;  %v2400_v38 = vmul.f32 %v6029_v33, %v6257_v24  ;;  %v2328_v3 = vadd.f32 %v2296_v17, %v2224_v8  ;;  %v6335_v60 = vld [vmem:[#allocation2 + $0x150] sm:$0xff]  ;;  %v6343_v8 = vld [vmem:[#allocation2 + $0x159] sm:$0xff] }
 0x260   : > { %3977 = vmatmul.mubr.bf16.gmra.mrb[16].mxu1 %v3009_v35  ;;  %v2845_v53 = vadd.f32 %v2813_v34, %v2741_v30  ;;  %v2846_v63 = vadd.f32 %v2814_v4, %v2742_v61  ;;  %v2503_v59 = vmul.f32 %v6057_v47, %v6259_v7  ;;  %v2504_v37 = vmul.f32 %v6057_v47, %v6266_v19  ;;  %v6339_v30 = vld [vmem:[#allocation2 + $0x158] sm:$0xff] }
 0x261   : > { %v2431_v51 = vadd.f32 %v2399_v44, %v2327_v9  ;;  %v2607_v54 = vmul.f32 %v6073_v5, %v2877_v18  ;;  %v2608_v56 = vmul.f32 %v6073_v5, %v2878_v50  ;;  %v2432_v31 = vadd.f32 %v2400_v38, %v2328_v3  ;;  %v6341_v61 = vld [vmem:[#allocation2 + $0x151] sm:$0xff] }
 0x262   : > { %v2949_v55 = vadd.f32 %v2917_v28, %v2845_v53  ;;  %v2950_v32 = vadd.f32 %v2918_v29, %v2846_v63  ;;  %v2711_v14 = vmul.f32 %v6087_v10, %v6295_v52  ;;  %v2712_v25 = vmul.f32 %v6087_v10, %v6299_v15 }
 0x263   : > { %v2535_v1 = vadd.f32 %v2503_v59, %v2431_v51  ;;  %v2815_v11 = vmul.f32 %v6097_v46, %v6301_v42  ;;  %v2816_v21 = vmul.f32 %v6097_v46, %v6303_v27  ;;  %v2536_v41 = vadd.f32 %v2504_v37, %v2432_v31 }
 0x264   : > { %v2988_v43 = vadd.f32 %v6137_v39, %v2949_v55  ;;  %v2989_v23 = vadd.f32 %v6137_v39, %v2950_v32  ;;  %v2089_v34 = vmul.f32 %v5984_v22, %v6255_v13  ;;  %v2090_v4 = vmul.f32 %v5984_v22, %v6257_v24  ;;  %v2881_v55 = vld [vmem:[#allocation2 + $0x152] sm:$0xff] }
 0x265   : > { %v2639_v16 = vadd.f32 %v2607_v54, %v2535_v1  ;;  %v2193_v58 = vmul.f32 %v5994_v45, %v6259_v7  ;;  %v2194_v57 = vmul.f32 %v5994_v45, %v6266_v19  ;;  %v2640_v2 = vadd.f32 %v2608_v56, %v2536_v41 }
 0x266   : > { %v3010_v48 = vpack.c.bf16 %v2989_v23, %v2988_v43  ;;  %v2297_v6 = vmul.f32 %v6008_v49, %v2877_v18  ;;  %v2298_v20 = vmul.f32 %v6008_v49, %v2878_v50  ;;  %v2401_v28 = vmul.f32 %v6029_v33, %v6295_v52 }
 0x267   : > { %v2743_v0 = vadd.f32 %v2711_v14, %v2639_v16  ;;  %v2225_v13 = vadd.f32 %v2193_v58, %v2089_v34  ;;  %v2226_v12 = vadd.f32 %v2194_v57, %v2090_v4  ;;  %v2744_v24 = vadd.f32 %v2712_v25, %v2640_v2 }
 0x268   : > { %3980 = vmatprep.mubr.bf16.mxu1 %v3010_v48  ;;  %v2919_v40 = vmul.f32 %v6172_v62, %v2879_v26  ;;  %v2920_v7 = vmul.f32 %v6172_v62, %v2880_v36  ;;  %v2402_v19 = vmul.f32 %v6029_v33, %v6299_v15  ;;  %v2505_v35 = vmul.f32 %v6057_v47, %v6301_v42 }
 0x269   : > { %v2847_v18 = vadd.f32 %v2815_v11, %v2743_v0  ;;  %v2329_v17 = vadd.f32 %v2297_v6, %v2225_v13  ;;  %v2330_v50 = vadd.f32 %v2298_v20, %v2226_v12  ;;  %v2848_v29 = vadd.f32 %v2816_v21, %v2744_v24  ;;  %v2882_v11 = vld [vmem:[#allocation2 + $0x15a] sm:$0xff]  ;;  %v6373_v20 = vld [vmem:[#allocation2 + $0x168] sm:$0xff]  ;;  %v2676_v12 = vld [vmem:[#allocation2 + $0x170] sm:$0xff] }
 0x26a   : > { %v2506_v9 = vmul.f32 %v6057_v47, %v6303_v27  ;;  %v2609_v44 = vmul.f32 %v6073_v5, %v2879_v26  ;;  %v2610_v38 = vmul.f32 %v6073_v5, %v2880_v36  ;;  %v2713_v59 = vmul.f32 %v6087_v10, %v6335_v60 }
 0x26b   : > { %v2951_v53 = vadd.f32 %v2919_v40, %v2847_v18  ;;  %v2433_v63 = vadd.f32 %v2401_v28, %v2329_v17  ;;  %v2434_v3 = vadd.f32 %v2402_v19, %v2330_v50  ;;  %v2952_v51 = vadd.f32 %v2920_v7, %v2848_v29  ;;  %v2780_v19 = vld [vmem:[#allocation2 + $0x171] sm:$0xff] }
 0x26c   : > { %v2714_v37 = vmul.f32 %v6087_v10, %v6339_v30  ;;  %v2817_v54 = vmul.f32 %v6097_v46, %v6341_v61  ;;  %v2818_v56 = vmul.f32 %v6097_v46, %v6343_v8  ;;  %v2091_v1 = vmul.f32 %v5984_v22, %v6295_v52 }
 0x26d   : > { %v2990_v32 = vadd.f32 %v6137_v39, %v2951_v53  ;;  %v2537_v31 = vadd.f32 %v2505_v35, %v2433_v63  ;;  %v2538_v14 = vadd.f32 %v2506_v9, %v2434_v3  ;;  %v2991_v25 = vadd.f32 %v6137_v39, %v2952_v51 }
 0x26e   : > { %v2092_v21 = vmul.f32 %v5984_v22, %v6299_v15  ;;  %v2195_v43 = vmul.f32 %v5994_v45, %v6301_v42  ;;  %v2196_v23 = vmul.f32 %v5994_v45, %v6303_v27  ;;  %v2921_v16 = vmul.f32 %v6172_v62, %v2881_v55 }
 0x26f   : > { %v2641_v41 = vadd.f32 %v2609_v44, %v2537_v31  ;;  %v2642_v34 = vadd.f32 %v2610_v38, %v2538_v14  ;;  %v2299_v4 = vmul.f32 %v6008_v49, %v2879_v26  ;;  %v3011_v58 = vpack.c.bf16 %v2991_v25, %v2990_v32  ;;  %v2883_v14 = vld [vmem:[#allocation2 + $0x16a] sm:$0xff] }
 0x270   : > { %v2227_v52 = vadd.f32 %v2195_v43, %v2091_v1  ;;  %v2228_v57 = vadd.f32 %v2196_v23, %v2092_v21  ;;  %v2300_v48 = vmul.f32 %v6008_v49, %v2880_v36  ;;  %v2922_v15 = vmul.f32 %v6172_v62, %v2882_v11  ;;  %v6379_v36 = vld [vmem:[#allocation2 + $0x169] sm:$0xff] }
 0x271   : > { %v2745_v2 = vadd.f32 %v2713_v59, %v2641_v41  ;;  %v2746_v6 = vadd.f32 %v2714_v37, %v2642_v34  ;;  %v2403_v42 = vmul.f32 %v6029_v33, %v6335_v60  ;;  %3981 = vmatmul.mubr.bf16.gmra.mrb[20].mxu1 %v3011_v58  ;;  %v2404_v26 = vmul.f32 %v6029_v33, %v6339_v30 }
 0x272   : > { %v2331_v27 = vadd.f32 %v2299_v4, %v2227_v52  ;;  %v2332_v0 = vadd.f32 %v2300_v48, %v2228_v57  ;;  %v2507_v13 = vmul.f32 %v6057_v47, %v6341_v61  ;;  %v2508_v40 = vmul.f32 %v6057_v47, %v6343_v8  ;;  %v2677_v48 = vld [vmem:[#allocation2 + $0x180] sm:$0xff] }
 0x273   : > { %v2849_v28 = vadd.f32 %v2817_v54, %v2745_v2  ;;  %v2850_v24 = vadd.f32 %v2818_v56, %v2746_v6  ;;  %v2611_v7 = vmul.f32 %v6073_v5, %v2881_v55  ;;  %v2612_v50 = vmul.f32 %v6073_v5, %v2882_v11 }
 0x274   : > { %v2435_v18 = vadd.f32 %v2403_v42, %v2331_v27  ;;  %v2436_v17 = vadd.f32 %v2404_v26, %v2332_v0  ;;  %v2715_v35 = vmul.f32 %v6087_v10, %v6373_v20  ;;  %v2716_v44 = vmul.f32 %v6087_v10, %v2676_v12 }
 0x275   : > { %v2953_v29 = vadd.f32 %v2921_v16, %v2849_v28  ;;  %v2954_v9 = vadd.f32 %v2922_v15, %v2850_v24  ;;  %v2819_v38 = vmul.f32 %v6097_v46, %v6379_v36  ;;  %v2820_v3 = vmul.f32 %v6097_v46, %v2780_v19  ;;  %v2678_v28 = vld [vmem:[#allocation2 + $0x188] sm:$0xff] }
 0x276   : > { %v2539_v53 = vadd.f32 %v2507_v13, %v2435_v18  ;;  %v2540_v63 = vadd.f32 %v2508_v40, %v2436_v17  ;;  %v2093_v59 = vmul.f32 %v5984_v22, %v6335_v60  ;;  %v2094_v54 = vmul.f32 %v5984_v22, %v6339_v30  ;;  %v2884_v60 = vld [vmem:[#allocation2 + $0x172] sm:$0xff]  ;;  %v2781_v40 = vld [vmem:[#allocation2 + $0x181] sm:$0xff] }
 0x277   : > { %v2992_v51 = vadd.f32 %v6137_v39, %v2953_v29  ;;  %v2993_v37 = vadd.f32 %v6137_v39, %v2954_v9  ;;  %v2197_v56 = vmul.f32 %v5994_v45, %v6341_v61  ;;  %v2198_v1 = vmul.f32 %v5994_v45, %v6343_v8  ;;  %v2782_v9 = vld [vmem:[#allocation2 + $0x189] sm:$0xff] }
 0x278   : > { %v2643_v32 = vadd.f32 %v2611_v7, %v2539_v53  ;;  %v2644_v31 = vadd.f32 %v2612_v50, %v2540_v63  ;;  %v2301_v25 = vmul.f32 %v6008_v49, %v2881_v55  ;;  %v2302_v23 = vmul.f32 %v6008_v49, %v2882_v11 }
 0x279   : > { %v3012_v21 = vpack.c.bf16 %v2993_v37, %v2992_v51  ;;  %v2229_v43 = vadd.f32 %v2197_v56, %v2093_v59  ;;  %v2405_v41 = vmul.f32 %v6029_v33, %v6373_v20  ;;  %v2230_v16 = vadd.f32 %v2198_v1, %v2094_v54  ;;  %v2886_v54 = vld [vmem:[#allocation2 + $0x18a] sm:$0xff] }
 0x27a   : > { %v2747_v30 = vadd.f32 %v2715_v35, %v2643_v32  ;;  %v2748_v34 = vadd.f32 %v2716_v44, %v2644_v31  ;;  %v2406_v61 = vmul.f32 %v6029_v33, %v2676_v12  ;;  %v2923_v4 = vmul.f32 %v6172_v62, %v2883_v14  ;;  %v2885_v44 = vld [vmem:[#allocation2 + $0x182] sm:$0xff] }
 0x27b   : > { %3984 = vmatprep.mubr.bf16.mxu1 %v3012_v21  ;;  %v2333_v58 = vadd.f32 %v2301_v25, %v2229_v43  ;;  %v2924_v55 = vmul.f32 %v6172_v62, %v2884_v60  ;;  %v2334_v57 = vadd.f32 %v2302_v23, %v2230_v16  ;;  %v2509_v11 = vmul.f32 %v6057_v47, %v6379_v36 }
 0x27c   : > { %v2851_v8 = vadd.f32 %v2819_v38, %v2747_v30  ;;  %v2852_v52 = vadd.f32 %v2820_v3, %v2748_v34  ;;  %v2510_v6 = vmul.f32 %v6057_v47, %v2780_v19  ;;  %v2613_v0 = vmul.f32 %v6073_v5, %v2883_v14 }
 0x27d   : > { %v2437_v2 = vadd.f32 %v2405_v41, %v2333_v58  ;;  %v2438_v27 = vadd.f32 %v2406_v61, %v2334_v57  ;;  %v2614_v13 = vmul.f32 %v6073_v5, %v2884_v60  ;;  %v2717_v24 = vmul.f32 %v6087_v10, %v2677_v48  ;;  %v2783_v61 = vld [vmem:[#allocation2 + $0x199] sm:$0xff] }
 0x27e   : > { %v2955_v15 = vadd.f32 %v2923_v4, %v2851_v8  ;;  %v2956_v42 = vadd.f32 %v2924_v55, %v2852_v52  ;;  %v2095_v7 = vmul.f32 %v5984_v22, %v6373_v20  ;;  %v2096_v35 = vmul.f32 %v5984_v22, %v2676_v12  ;;  %v2784_v4 = vld [vmem:[#allocation2 + $0x1a1] sm:$0xff] }
 0x27f   : > { %v2541_v26 = vadd.f32 %v2509_v11, %v2437_v2  ;;  %v2542_v50 = vadd.f32 %v2510_v6, %v2438_v27  ;;  %v2199_v38 = vmul.f32 %v5994_v45, %v6379_v36  ;;  %v2200_v53 = vmul.f32 %v5994_v45, %v2780_v19  ;;  %v2887_v2 = vld [vmem:[#allocation2 + $0x19a] sm:$0xff]  ;;  %v2888_v11 = vld [vmem:[#allocation2 + $0x1a2] sm:$0xff] }
 0x280   : > { %v2994_v18 = vadd.f32 %v6137_v39, %v2955_v15  ;;  %v2995_v17 = vadd.f32 %v6137_v39, %v2956_v42  ;;  %v2303_v63 = vmul.f32 %v6008_v49, %v2883_v14  ;;  %v2718_v20 = vmul.f32 %v6087_v10, %v2678_v28 }
 0x281   : > { %v2645_v29 = vadd.f32 %v2613_v0, %v2541_v26  ;;  %v2646_v59 = vadd.f32 %v2614_v13, %v2542_v50  ;;  %v2821_v51 = vmul.f32 %v6097_v46, %v2781_v40  ;;  %v2231_v56 = vadd.f32 %v2199_v38, %v2095_v7 }
 0x282   : > { %v3013_v3 = vpack.c.bf16 %v2995_v17, %v2994_v18  ;;  %v2232_v22 = vadd.f32 %v2200_v53, %v2096_v35  ;;  %v2304_v12 = vmul.f32 %v6008_v49, %v2884_v60  ;;  %v2822_v36 = vmul.f32 %v6097_v46, %v2782_v9  ;;  %v6447_v17 = vld [vmem:[%s6652_s8] ss:$0 sm:$0xff]  ;;  %v3251_v53 = vld [vmem:[%s4700_s14 + $0x18] sm:$0xff] }
 0x283   : > { %v2749_v37 = vadd.f32 %v2717_v24, %v2645_v29  ;;  %v2750_v32 = vadd.f32 %v2718_v20, %v2646_v59  ;;  %v2925_v45 = vmul.f32 %v6172_v62, %v2885_v44  ;;  %v2407_v19 = vmul.f32 %v6029_v33, %v2677_v48  ;;  %v3249_v59 = vld [vmem:[%s4700_s14 + $0x8] sm:$0xff] }
 0x284   : > { %3985 = vmatmul.mubr.bf16.gmra.mrb[24].mxu1 %v3013_v3  ;;  %v2335_v14 = vadd.f32 %v2303_v63, %v2231_v56  ;;  %v2336_v1 = vadd.f32 %v2304_v12, %v2232_v22  ;;  %v2408_v25 = vmul.f32 %v6029_v33, %v2678_v28  ;;  %v2926_v43 = vmul.f32 %v6172_v62, %v2886_v54  ;;  %v4248_v33 = vld [vmem:[#allocation2] sm:$0xff] }
 0x285   : > { %v2853_v31 = vadd.f32 %v2821_v51, %v2749_v37  ;;  %v2854_v21 = vadd.f32 %v2822_v36, %v2750_v32  ;;  %v2511_v23 = vmul.f32 %v6057_v47, %v2781_v40  ;;  %v2512_v30 = vmul.f32 %v6057_v47, %v2782_v9  ;;  %v3248_v9 = vld [vmem:[%s4700_s14] sm:$0xff] }
 0x286   : > { %v2439_v49 = vadd.f32 %v2407_v19, %v2335_v14  ;;  %v2440_v60 = vadd.f32 %v2408_v25, %v2336_v1  ;;  %v2615_v16 = vmul.f32 %v6073_v5, %v2885_v44  ;;  %v2616_v52 = vmul.f32 %v6073_v5, %v2886_v54 }
 0x287   : > { %v2957_v41 = vadd.f32 %v2925_v45, %v2853_v31  ;;  %v2958_v34 = vadd.f32 %v2926_v43, %v2854_v21  ;;  %v2719_v55 = vmul.f32 %v4248_v33, %v6087_v10  ;;  %v2823_v15 = vmul.f32 %v6097_v46, %v2783_v61 }
 0x288   : > { %v2543_v58 = vadd.f32 %v2511_v23, %v2439_v49  ;;  %v2544_v8 = vadd.f32 %v2512_v30, %v2440_v60  ;;  %v2824_v42 = vmul.f32 %v6097_v46, %v2784_v4  ;;  %v2927_v5 = vmul.f32 %v6172_v62, %v2887_v2  ;;  %v3254_v2 = vld [vmem:[%s4700_s14 + $0x30] sm:$0xff] }
 0x289   : > { %v2996_v57 = vadd.f32 %v6137_v39, %v2957_v41  ;;  %v2997_v48 = vadd.f32 %v6137_v39, %v2958_v34  ;;  %v2928_v10 = vmul.f32 %v6172_v62, %v2888_v11  ;;  %v3250_v62 = vld [vmem:[%s4700_s14 + $0x10] sm:$0xff] }
 0x28a   : > { %v2647_v6 = vadd.f32 %v2615_v16, %v2543_v58  ;;  %v2648_v47 = vadd.f32 %v2616_v52, %v2544_v8 }
 0x28b   : > { %v3014_v27 = vpack.c.bf16 %v2997_v48, %v2996_v57 }
 0x28c   : > { %v2751_v0 = vadd.f32 %v2719_v55, %v2647_v6  ;;  %v2752_v26 = vadd.f32 %v2719_v55, %v2648_v47  ;;  %v3252_v47 = vld [vmem:[%s4700_s14 + $0x20] sm:$0xff] }
 0x28d   : > { %3988 = vmatprep.mubr.bf16.mxu1 %v3014_v27  ;;  %v3255_v27 = vld [vmem:[%s4700_s14 + $0x38] sm:$0xff] }
 0x28e   : > { %v2855_v13 = vadd.f32 %v2823_v15, %v2751_v0  ;;  %v2856_v28 = vadd.f32 %v2824_v42, %v2752_v26 }
 0x290   : > { %v2959_v24 = vadd.f32 %v2927_v5, %v2855_v13  ;;  %v2960_v40 = vadd.f32 %v2928_v10, %v2856_v28  ;;  %v3253_v10 = vld [vmem:[%s4700_s14 + $0x28] sm:$0xff] }
 0x292   : > { %v2998_v7 = vadd.f32 %v6137_v39, %v2959_v24  ;;  %v2999_v46 = vadd.f32 %v6137_v39, %v2960_v40 }
 0x294   : > { %v3015_v18 = vpack.c.bf16 %v2999_v46, %v2998_v7 }
 0x296   : > { %3989 = vmatmul.mubr.bf16.gmra.mrb[28].mxu1 %v3015_v18 }
 0x2c0   : > { %v3962_v50 = vpop.f32.mrb[0].mxu1 }
 0x2c1   : > { %v3130_v35 = vadd.f32 %v3962_v50, %v6447_v17  ;;  %v3121_v29 = vpop.f32.mrb[1].mxu1 }
 0x2c2   : > { %v3122_v44 = vadd.f32 %v6447_v17, %v3121_v29  ;;  %v3963_v38 = vpop.f32.mrb[2].mxu1 }
 0x2c3   : > { %v3282_v63 = vadd.f32 %v3250_v62, %v3130_v35  ;;  %v3133_v39 = vadd.f32 %v3963_v38, %v6447_v17  ;;  %v3124_v3 = vpop.f32.mrb[3].mxu1 }
 0x2c4   : > { %v3280_v20 = vadd.f32 %v3248_v9, %v3122_v44  ;;  %v3125_v51 = vadd.f32 %v6447_v17, %v3124_v3 }
 0x2c5   : > { %v3314_v37 = vmin.f32 %v3282_v63, 0.0  ;;  %v3283_v54 = vadd.f32 %v3251_v53, %v3133_v39  ;;  %vm3474_vm0 = vcmp.gt.f32.partialorder %v3282_v63, 0.0 }
 0x2c6   : > { %v3312_v56 = vmin.f32 %v3280_v20, 0.0  ;;  %v3281_v22 = vadd.f32 %v3249_v59, %v3125_v51  ;;  %vm3472_vm1 = vcmp.gt.f32.partialorder %v3280_v20, 0.0 }
 0x2c7   : > { %v3348_v12 = vmul.f32 1.442695, %v3314_v37  ;;  %v3315_v32 = vmin.f32 %v3283_v54, 0.0  ;;  %vm3475_vm2 = vcmp.gt.f32.partialorder %v3283_v54, 0.0 }
 0x2c8   : > { %v3344_v36 = vmul.f32 1.442695, %v3312_v56  ;;  %v3313_v45 = vmin.f32 %v3281_v22, 0.0  ;;  %vm3473_vm3 = vcmp.gt.f32.partialorder %v3281_v22, 0.0 }
 0x2c9   : > { %4158 = vpow2.f32 %v3348_v12  ;;  %v3350_v19 = vmul.f32 1.442695, %v3315_v32 }
 0x2ca   : > { %4160 = vpow2.f32 %v3344_v36  ;;  %v3346_v31 = vmul.f32 1.442695, %v3313_v45 }
 0x2cb   : > { %4162 = vpow2.f32 %v3350_v19 }
 0x2cc   : > { %4164 = vpow2.f32 %v3346_v31 }
 0x2d3   : > { %v4159_v14 = vpop.eup %4158 }
 0x2d4   : > { %v4161_v1 = vpop.eup %4160  ;;  %v3811_v25 = vadd.f32 -1.0, %v4159_v14 }
 0x2d5   : > { %v4163_v21 = vpop.eup %4162  ;;  %v3809_v43 = vadd.f32 -1.0, %v4161_v1 }
 0x2d6   : > { %v4165_v23 = vpop.eup %4164  ;;  %v3442_v41 = vmul.f32 1.6732632, %v3811_v25  ;;  %v3812_v49 = vadd.f32 -1.0, %v4163_v21  ;;  %v3258_v25 = vld [vmem:[%s4700_s14 + $0x50] sm:$0xff] }
 0x2d7   : > { %v3440_v60 = vmul.f32 1.6732632, %v3809_v43  ;;  %v3810_v30 = vadd.f32 -1.0, %v4165_v23  ;;  %v3256_v23 = vld [vmem:[%s4700_s14 + $0x40] sm:$0xff] }
 0x2d8   : > { %v3506_v34 = vsel %vm3474_vm0, %v3282_v63, %v3442_v41  ;;  %v3443_v16 = vmul.f32 1.6732632, %v3812_v49 }
 0x2d9   : > { %v3538_v61 = vmul.f32 1.050701, %v3506_v34  ;;  %v3504_v4 = vsel %vm3472_vm1, %v3280_v20, %v3440_v60  ;;  %v3441_v58 = vmul.f32 1.6732632, %v3810_v30  ;;  %v3259_v60 = vld [vmem:[%s4700_s14 + $0x58] sm:$0xff] }
 0x2da   : > { %v3536_v8 = vmul.f32 1.050701, %v3504_v4  ;;  %v3507_v52 = vsel %vm3475_vm2, %v3283_v54, %v3443_v16 }
 0x2db   : > { %3570 = vst [vmem:[%s6459_s24 + $0x10] sm:$0xff] %v3538_v61  ;;  %v3539_v33 = vmul.f32 1.050701, %v3507_v52  ;;  %v3505_v55 = vsel %vm3473_vm3, %v3281_v22, %v3441_v58  ;;  %v3257_v61 = vld [vmem:[%s4700_s14 + $0x48] sm:$0xff] }
 0x2dc   : > { %3568 = vst [vmem:[%s6459_s24] sm:$0xff] %v3536_v8  ;;  %v3537_v57 = vmul.f32 1.050701, %v3505_v55 }
 0x2dd   : > { %3571 = vst [vmem:[%s6459_s24 + $0x18] sm:$0xff] %v3539_v33 }
 0x2de   : > { %3569 = vst [vmem:[%s6459_s24 + $0x8] sm:$0xff] %v3537_v57 }
 0x2e2   : > { %v3966_v48 = vpop.f32.mrb[4].mxu1 }
 0x2e3   : > { %v3146_v11 = vadd.f32 %v3966_v48, %v6447_v17  ;;  %v3137_v6 = vpop.f32.mrb[5].mxu1 }
 0x2e4   : > { %v3138_v15 = vadd.f32 %v6447_v17, %v3137_v6  ;;  %v3967_v42 = vpop.f32.mrb[6].mxu1 }
 0x2e5   : > { %v3286_v0 = vadd.f32 %v3254_v2, %v3146_v11  ;;  %v3149_v26 = vadd.f32 %v3967_v42, %v6447_v17  ;;  %v3140_v5 = vpop.f32.mrb[7].mxu1 }
 0x2e6   : > { %v3284_v13 = vadd.f32 %v3252_v47, %v3138_v15  ;;  %v3141_v28 = vadd.f32 %v6447_v17, %v3140_v5 }
 0x2e7   : > { %v3318_v24 = vmin.f32 %v3286_v0, 0.0  ;;  %v3287_v40 = vadd.f32 %v3255_v27, %v3149_v26  ;;  %vm3478_vm4 = vcmp.gt.f32.partialorder %v3286_v0, 0.0 }
 0x2e8   : > { %v3316_v7 = vmin.f32 %v3284_v13, 0.0  ;;  %v3285_v46 = vadd.f32 %v3253_v10, %v3141_v28  ;;  %vm3476_vm5 = vcmp.gt.f32.partialorder %v3284_v13, 0.0  ;;  %v3262_v28 = vld [vmem:[%s4700_s14 + $0x70] sm:$0xff] }
 0x2e9   : > { %v3356_v18 = vmul.f32 1.442695, %v3318_v24  ;;  %v3319_v50 = vmin.f32 %v3287_v40, 0.0  ;;  %vm3479_vm6 = vcmp.gt.f32.partialorder %v3287_v40, 0.0 }
 0x2ea   : > { %v3352_v62 = vmul.f32 1.442695, %v3316_v7  ;;  %v3317_v35 = vmin.f32 %v3285_v46, 0.0  ;;  %vm3477_vm7 = vcmp.gt.f32.partialorder %v3285_v46, 0.0 }
 0x2eb   : > { %4166 = vpow2.f32 %v3356_v18  ;;  %v3358_v29 = vmul.f32 1.442695, %v3319_v50 }
 0x2ec   : > { %4168 = vpow2.f32 %v3352_v62  ;;  %v3354_v9 = vmul.f32 1.442695, %v3317_v35  ;;  %v3260_v35 = vld [vmem:[%s4700_s14 + $0x60] sm:$0xff] }
 0x2ed   : > { %4170 = vpow2.f32 %v3358_v29 }
 0x2ee   : > { %4172 = vpow2.f32 %v3354_v9 }
 0x2f5   : > { %v4167_v44 = vpop.eup %4166 }
 0x2f6   : > { %v4169_v38 = vpop.eup %4168  ;;  %v3815_v53 = vadd.f32 -1.0, %v4167_v44 }
 0x2f7   : > { %v4171_v63 = vpop.eup %4170  ;;  %v3813_v39 = vadd.f32 -1.0, %v4169_v38 }
 0x2f8   : > { %v4173_v3 = vpop.eup %4172  ;;  %v3446_v59 = vmul.f32 1.6732632, %v3815_v53  ;;  %v3816_v20 = vadd.f32 -1.0, %v4171_v63  ;;  %v3263_v63 = vld [vmem:[%s4700_s14 + $0x78] sm:$0xff] }
 0x2f9   : > { %v3444_v51 = vmul.f32 1.6732632, %v3813_v39  ;;  %v3814_v37 = vadd.f32 -1.0, %v4173_v3 }
 0x2fa   : > { %v3510_v54 = vsel %vm3478_vm4, %v3286_v0, %v3446_v59  ;;  %v3447_v56 = vmul.f32 1.6732632, %v3816_v20 }
 0x2fb   : > { %v3542_v22 = vmul.f32 1.050701, %v3510_v54  ;;  %v3508_v12 = vsel %vm3476_vm5, %v3284_v13, %v3444_v51  ;;  %v3445_v32 = vmul.f32 1.6732632, %v3814_v37  ;;  %v3261_v37 = vld [vmem:[%s4700_s14 + $0x68] sm:$0xff] }
 0x2fc   : > { %v3540_v36 = vmul.f32 1.050701, %v3508_v12  ;;  %v3511_v45 = vsel %vm3479_vm6, %v3287_v40, %v3447_v56 }
 0x2fd   : > { %3574 = vst [vmem:[%s6459_s24 + $0x30] sm:$0xff] %v3542_v22  ;;  %v3543_v19 = vmul.f32 1.050701, %v3511_v45  ;;  %v3509_v31 = vsel %vm3477_vm7, %v3285_v46, %v3445_v32 }
 0x2fe   : > { %3572 = vst [vmem:[%s6459_s24 + $0x20] sm:$0xff] %v3540_v36  ;;  %v3541_v14 = vmul.f32 1.050701, %v3509_v31 }
 0x2ff   : > { %3575 = vst [vmem:[%s6459_s24 + $0x38] sm:$0xff] %v3543_v19 }
 0x300   : > { %3573 = vst [vmem:[%s6459_s24 + $0x28] sm:$0xff] %v3541_v14 }
 0x307   : > { %v3970_v1 = vpop.f32.mrb[8].mxu1 }
 0x308   : > { %v3162_v21 = vadd.f32 %v3970_v1, %v6447_v17  ;;  %v3153_v43 = vpop.f32.mrb[9].mxu1 }
 0x309   : > { %v3154_v41 = vadd.f32 %v6447_v17, %v3153_v43  ;;  %v3971_v49 = vpop.f32.mrb[10].mxu1 }
 0x30a   : > { %v3290_v30 = vadd.f32 %v3258_v25, %v3162_v21  ;;  %v3165_v34 = vadd.f32 %v3971_v49, %v6447_v17  ;;  %v3156_v16 = vpop.f32.mrb[11].mxu1 }
 0x30b   : > { %v3288_v4 = vadd.f32 %v3256_v23, %v3154_v41  ;;  %v3157_v58 = vadd.f32 %v6447_v17, %v3156_v16 }
 0x30c   : > { %v3322_v8 = vmin.f32 %v3290_v30, 0.0  ;;  %v3291_v52 = vadd.f32 %v3259_v60, %v3165_v34  ;;  %vm3482_vm8 = vcmp.gt.f32.partialorder %v3290_v30, 0.0 }
 0x30d   : > { %v3320_v33 = vmin.f32 %v3288_v4, 0.0  ;;  %v3289_v55 = vadd.f32 %v3257_v61, %v3157_v58  ;;  %vm3480_vm9 = vcmp.gt.f32.partialorder %v3288_v4, 0.0  ;;  %v3266_v61 = vld [vmem:[%s4700_s14 + $0x90] sm:$0xff] }
 0x30e   : > { %v3364_v57 = vmul.f32 1.442695, %v3322_v8  ;;  %v3323_v48 = vmin.f32 %v3291_v52, 0.0  ;;  %vm3483_vm10 = vcmp.gt.f32.partialorder %v3291_v52, 0.0 }
 0x30f   : > { %v3360_v2 = vmul.f32 1.442695, %v3320_v33  ;;  %v3321_v11 = vmin.f32 %v3289_v55, 0.0  ;;  %vm3481_vm11 = vcmp.gt.f32.partialorder %v3289_v55, 0.0 }
 0x310   : > { %4174 = vpow2.f32 %v3364_v57  ;;  %v3366_v6 = vmul.f32 1.442695, %v3323_v48 }
 0x311   : > { %4176 = vpow2.f32 %v3360_v2  ;;  %v3362_v47 = vmul.f32 1.442695, %v3321_v11 }
 0x312   : > { %4178 = vpow2.f32 %v3366_v6 }
 0x313   : > { %4180 = vpow2.f32 %v3362_v47 }
 0x31a   : > { %v4175_v15 = vpop.eup %4174 }
 0x31b   : > { %v4177_v42 = vpop.eup %4176  ;;  %v3819_v27 = vadd.f32 -1.0, %v4175_v15 }
 0x31c   : > { %v4179_v0 = vpop.eup %4178  ;;  %v3817_v26 = vadd.f32 -1.0, %v4177_v42 }
 0x31d   : > { %v4181_v5 = vpop.eup %4180  ;;  %v3450_v10 = vmul.f32 1.6732632, %v3819_v27  ;;  %v3820_v13 = vadd.f32 -1.0, %v4179_v0 }
 0x31e   : > { %v3448_v24 = vmul.f32 1.6732632, %v3817_v26  ;;  %v3818_v40 = vadd.f32 -1.0, %v4181_v5 }
 0x31f   : > { %v3974_v7 = vpop.f32.mrb[12].mxu1  ;;  %v3514_v46 = vsel %vm3482_vm8, %v3290_v30, %v3450_v10  ;;  %v3451_v18 = vmul.f32 1.6732632, %v3820_v13  ;;  %v3267_v13 = vld [vmem:[%s4700_s14 + $0x98] sm:$0xff] }
 0x320   : > { %v3178_v50 = vadd.f32 %v3974_v7, %v6447_v17  ;;  %v3169_v62 = vpop.f32.mrb[13].mxu1  ;;  %v3546_v29 = vmul.f32 1.050701, %v3514_v46  ;;  %v3512_v9 = vsel %vm3480_vm9, %v3288_v4, %v3448_v24  ;;  %v3449_v44 = vmul.f32 1.6732632, %v3818_v40 }
 0x321   : > { %v3170_v38 = vadd.f32 %v6447_v17, %v3169_v62  ;;  %v3975_v53 = vpop.f32.mrb[14].mxu1  ;;  %v3544_v39 = vmul.f32 1.050701, %v3512_v9  ;;  %v3515_v3 = vsel %vm3483_vm10, %v3291_v52, %v3451_v18 }
 0x322   : > { %v3294_v59 = vadd.f32 %v3262_v28, %v3178_v50  ;;  %v3181_v20 = vadd.f32 %v3975_v53, %v6447_v17  ;;  %v3172_v51 = vpop.f32.mrb[15].mxu1  ;;  %3578 = vst [vmem:[%s6459_s24 + $0x50] sm:$0xff] %v3546_v29  ;;  %v3547_v54 = vmul.f32 1.050701, %v3515_v3  ;;  %v3513_v56 = vsel %vm3481_vm11, %v3289_v55, %v3449_v44  ;;  %v3264_v55 = vld [vmem:[%s4700_s14 + $0x80] sm:$0xff]  ;;  %v3265_v50 = vld [vmem:[%s4700_s14 + $0x88] sm:$0xff] }
 0x323   : > { %v3292_v22 = vadd.f32 %v3260_v35, %v3170_v38  ;;  %v3173_v12 = vadd.f32 %v6447_v17, %v3172_v51  ;;  %3576 = vst [vmem:[%s6459_s24 + $0x40] sm:$0xff] %v3544_v39  ;;  %v3545_v32 = vmul.f32 1.050701, %v3513_v56  ;;  %v3268_v56 = vld [vmem:[%s4700_s14 + $0xa0] sm:$0xff] }
 0x324   : > { %v3326_v36 = vmin.f32 %v3294_v59, 0.0  ;;  %v3295_v45 = vadd.f32 %v3263_v63, %v3181_v20  ;;  %3579 = vst [vmem:[%s6459_s24 + $0x58] sm:$0xff] %v3547_v54  ;;  %vm3486_vm12 = vcmp.gt.f32.partialorder %v3294_v59, 0.0  ;;  %v3270_v20 = vld [vmem:[%s4700_s14 + $0xb0] sm:$0xff] }
 0x325   : > { %v3324_v19 = vmin.f32 %v3292_v22, 0.0  ;;  %v3293_v31 = vadd.f32 %v3261_v37, %v3173_v12  ;;  %3577 = vst [vmem:[%s6459_s24 + $0x48] sm:$0xff] %v3545_v32  ;;  %vm3484_vm13 = vcmp.gt.f32.partialorder %v3292_v22, 0.0 }
 0x326   : > { %v3372_v14 = vmul.f32 1.442695, %v3326_v36  ;;  %v3327_v1 = vmin.f32 %v3295_v45, 0.0  ;;  %vm3487_vm14 = vcmp.gt.f32.partialorder %v3295_v45, 0.0 }
 0x327   : > { %v3368_v25 = vmul.f32 1.442695, %v3324_v19  ;;  %v3325_v21 = vmin.f32 %v3293_v31, 0.0  ;;  %vm3485_vm15 = vcmp.gt.f32.partialorder %v3293_v31, 0.0 }
 0x328   : > { %4182 = vpow2.f32 %v3372_v14  ;;  %v3374_v43 = vmul.f32 1.442695, %v3327_v1 }
 0x329   : > { %4184 = vpow2.f32 %v3368_v25  ;;  %v3370_v23 = vmul.f32 1.442695, %v3325_v21 }
 0x32a   : > { %4186 = vpow2.f32 %v3374_v43 }
 0x32b   : > { %4188 = vpow2.f32 %v3370_v23 }
 0x332   : > { %v4183_v41 = vpop.eup %4182 }
 0x333   : > { %v4185_v49 = vpop.eup %4184  ;;  %v3823_v60 = vadd.f32 -1.0, %v4183_v41  ;;  %v3978_v16 = vpop.f32.mrb[16].mxu1 }
 0x334   : > { %v4187_v30 = vpop.eup %4186  ;;  %v3821_v34 = vadd.f32 -1.0, %v4185_v49  ;;  %v3194_v52 = vadd.f32 %v3978_v16, %v6447_v17  ;;  %v3185_v33 = vpop.f32.mrb[17].mxu1 }
 0x335   : > { %v4189_v4 = vpop.eup %4188  ;;  %v3454_v58 = vmul.f32 1.6732632, %v3823_v60  ;;  %v3824_v8 = vadd.f32 -1.0, %v4187_v30  ;;  %v3186_v2 = vadd.f32 %v6447_v17, %v3185_v33  ;;  %v3979_v11 = vpop.f32.mrb[18].mxu1 }
 0x336   : > { %v3452_v57 = vmul.f32 1.6732632, %v3821_v34  ;;  %v3822_v48 = vadd.f32 -1.0, %v4189_v4  ;;  %v3298_v15 = vadd.f32 %v3266_v61, %v3194_v52  ;;  %v3197_v42 = vadd.f32 %v3979_v11, %v6447_v17  ;;  %v3188_v27 = vpop.f32.mrb[19].mxu1  ;;  %v3269_v61 = vld [vmem:[%s4700_s14 + $0xa8] sm:$0xff] }
 0x337   : > { %v3518_v6 = vsel %vm3486_vm12, %v3294_v59, %v3454_v58  ;;  %v3455_v47 = vmul.f32 1.6732632, %v3824_v8  ;;  %v3296_v10 = vadd.f32 %v3264_v55, %v3186_v2  ;;  %v3189_v9 = vadd.f32 %v6447_v17, %v3188_v27 }
 0x338   : > { %v3550_v0 = vmul.f32 1.050701, %v3518_v6  ;;  %v3516_v26 = vsel %vm3484_vm13, %v3292_v22, %v3452_v57  ;;  %v3453_v5 = vmul.f32 1.6732632, %v3822_v48  ;;  %v3330_v40 = vmin.f32 %v3298_v15, 0.0 }
 0x339   : > { %v3548_v28 = vmul.f32 1.050701, %v3516_v26  ;;  %v3519_v24 = vsel %vm3487_vm14, %v3295_v45, %v3455_v47  ;;  %v3328_v18 = vmin.f32 %v3296_v10, 0.0  ;;  %v3299_v29 = vadd.f32 %v3267_v13, %v3197_v42  ;;  %v3271_v45 = vld [vmem:[%s4700_s14 + $0xb8] sm:$0xff]  ;;  %v3274_v13 = vld [vmem:[%s4700_s14 + $0xd0] sm:$0xff] }
 0x33a   : > { %3582 = vst [vmem:[%s6459_s24 + $0x70] sm:$0xff] %v3550_v0  ;;  %v3551_v7 = vmul.f32 1.050701, %v3519_v24  ;;  %v3517_v46 = vsel %vm3485_vm15, %v3293_v31, %v3453_v5  ;;  %v3380_v35 = vmul.f32 1.442695, %v3330_v40  ;;  %v3297_v53 = vadd.f32 %v3265_v50, %v3189_v9 }
 0x33b   : > { %3580 = vst [vmem:[%s6459_s24 + $0x60] sm:$0xff] %v3548_v28  ;;  %v3549_v62 = vmul.f32 1.050701, %v3517_v46  ;;  %v3376_v44 = vmul.f32 1.442695, %v3328_v18  ;;  %v3331_v38 = vmin.f32 %v3299_v29, 0.0 }
 0x33c   : > { %3583 = vst [vmem:[%s6459_s24 + $0x78] sm:$0xff] %v3551_v7  ;;  %4190 = vpow2.f32 %v3380_v35  ;;  %v3329_v39 = vmin.f32 %v3297_v53, 0.0  ;;  %vm3490_vm0 = vcmp.gt.f32.partialorder %v3298_v15, 0.0  ;;  %vm3488_vm1 = vcmp.gt.f32.partialorder %v3296_v10, 0.0  ;;  %v3272_v7 = vld [vmem:[%s4700_s14 + $0xc0] sm:$0xff] }
 0x33d   : > { %3581 = vst [vmem:[%s6459_s24 + $0x68] sm:$0xff] %v3549_v62  ;;  %4192 = vpow2.f32 %v3376_v44  ;;  %v3382_v63 = vmul.f32 1.442695, %v3331_v38  ;;  %vm3491_vm2 = vcmp.gt.f32.partialorder %v3299_v29, 0.0  ;;  %vm3489_vm3 = vcmp.gt.f32.partialorder %v3297_v53, 0.0  ;;  %v3275_v62 = vld [vmem:[%s4700_s14 + $0xd8] sm:$0xff] }
 0x33e   : > { %v3378_v3 = vmul.f32 1.442695, %v3329_v39 }
 0x33f   : > { %4194 = vpow2.f32 %v3382_v63 }
 0x340   : > { %4196 = vpow2.f32 %v3378_v3 }
 0x344   : > { %v3982_v59 = vpop.f32.mrb[20].mxu1 }
 0x345   : > { %v3210_v37 = vadd.f32 %v3982_v59, %v6447_v17  ;;  %v3201_v54 = vpop.f32.mrb[21].mxu1  ;;  %v3273_v59 = vld [vmem:[%s4700_s14 + $0xc8] sm:$0xff] }
 0x346   : > { %v4191_v51 = vpop.eup %4190  ;;  %v3202_v32 = vadd.f32 %v6447_v17, %v3201_v54  ;;  %v3983_v36 = vpop.f32.mrb[22].mxu1 }
 0x347   : > { %v4193_v22 = vpop.eup %4192  ;;  %v3827_v12 = vadd.f32 -1.0, %v4191_v51  ;;  %v6518_v31 = vadd.f32 %v3270_v20, %v3210_v37  ;;  %v3213_v14 = vadd.f32 %v3983_v36, %v6447_v17  ;;  %v3204_v1 = vpop.f32.mrb[23].mxu1 }
 0x348   : > { %v3825_v19 = vadd.f32 -1.0, %v4193_v22  ;;  %v6521_v21 = vadd.f32 %v3268_v56, %v3202_v32  ;;  %v3205_v60 = vadd.f32 %v6447_v17, %v3204_v1 }
 0x349   : > { %v3458_v25 = vmul.f32 1.6732632, %v3827_v12  ;;  %v4195_v43 = vpop.eup %4194  ;;  %v3334_v41 = vmin.f32 %v6518_v31, 0.0  ;;  %v6524_v49 = vadd.f32 %v3271_v45, %v3213_v14  ;;  %vm3494_vm4 = vcmp.gt.f32.partialorder %v6518_v31, 0.0 }
 0x34a   : > { %v3456_v23 = vmul.f32 1.6732632, %v3825_v19  ;;  %v3828_v34 = vadd.f32 -1.0, %v4195_v43  ;;  %v3332_v16 = vmin.f32 %v6521_v21, 0.0  ;;  %v4197_v4 = vpop.eup %4196  ;;  %v6531_v6 = vadd.f32 %v3269_v61, %v3205_v60 }
 0x34b   : > { %v3522_v30 = vsel %vm3490_vm0, %v3298_v15, %v3458_v25  ;;  %v3388_v52 = vmul.f32 1.442695, %v3334_v41  ;;  %v3335_v33 = vmin.f32 %v6524_v49, 0.0  ;;  %v3826_v48 = vadd.f32 -1.0, %v4197_v4 }
 0x34c   : > { %v3554_v58 = vmul.f32 1.050701, %v3522_v30  ;;  %v3520_v8 = vsel %vm3488_vm1, %v3296_v10, %v3456_v23  ;;  %v3459_v57 = vmul.f32 1.6732632, %v3828_v34  ;;  %v3384_v2 = vmul.f32 1.442695, %v3332_v16 }
 0x34d   : > { %v3552_v55 = vmul.f32 1.050701, %v3520_v8  ;;  %4198 = vpow2.f32 %v3388_v52  ;;  %v3390_v11 = vmul.f32 1.442695, %v3335_v33  ;;  %v3457_v15 = vmul.f32 1.6732632, %v3826_v48 }
 0x34e   : > { %3586 = vst [vmem:[%s6459_s24 + $0x90] sm:$0xff] %v3554_v58  ;;  %v3523_v47 = vsel %vm3491_vm2, %v3299_v29, %v3459_v57  ;;  %4200 = vpow2.f32 %v3384_v2  ;;  %v3333_v27 = vmin.f32 %v6531_v6, 0.0  ;;  %vm3492_vm5 = vcmp.gt.f32.partialorder %v6521_v21, 0.0  ;;  %v3278_v58 = vld [vmem:[%s4700_s14 + $0xf0] sm:$0xff]  ;;  %v3276_v57 = vld [vmem:[%s4700_s14 + $0xe0] sm:$0xff] }
 0x34f   : > { %3584 = vst [vmem:[%s6459_s24 + $0x80] sm:$0xff] %v3552_v55  ;;  %v3555_v42 = vmul.f32 1.050701, %v3523_v47  ;;  %v3521_v0 = vsel %vm3489_vm3, %v3297_v53, %v3457_v15  ;;  %4202 = vpow2.f32 %v3390_v11  ;;  %vm3495_vm6 = vcmp.gt.f32.partialorder %v6524_v49, 0.0 }
 0x350   : > { %v3553_v26 = vmul.f32 1.050701, %v3521_v0  ;;  %v3386_v5 = vmul.f32 1.442695, %v3333_v27  ;;  %vm3493_vm7 = vcmp.gt.f32.partialorder %v6531_v6, 0.0 }
 0x351   : > { %3587 = vst [vmem:[%s6459_s24 + $0x98] sm:$0xff] %v3555_v42 }
 0x352   : > { %3585 = vst [vmem:[%s6459_s24 + $0x88] sm:$0xff] %v3553_v26  ;;  %4204 = vpow2.f32 %v3386_v5 }
 0x357   : > { %v3986_v10 = vpop.f32.mrb[24].mxu1  ;;  %v4199_v28 = vpop.eup %4198 }
 0x358   : > { %v3226_v24 = vadd.f32 %v3986_v10, %v6447_v17  ;;  %v3217_v40 = vpop.f32.mrb[25].mxu1  ;;  %v3831_v46 = vadd.f32 -1.0, %v4199_v28  ;;  %v4201_v35 = vpop.eup %4200 }
 0x359   : > { %v3218_v18 = vadd.f32 %v6447_v17, %v3217_v40  ;;  %v3987_v50 = vpop.f32.mrb[26].mxu1  ;;  %v4203_v38 = vpop.eup %4202  ;;  %v3829_v63 = vadd.f32 -1.0, %v4201_v35  ;;  %v3277_v35 = vld [vmem:[%s4700_s14 + $0xe8] sm:$0xff] }
 0x35a   : > { %v6543_v29 = vadd.f32 %v3274_v13, %v3226_v24  ;;  %v3229_v9 = vadd.f32 %v3987_v50, %v6447_v17  ;;  %v3220_v44 = vpop.f32.mrb[27].mxu1  ;;  %v3462_v53 = vmul.f32 1.6732632, %v3831_v46  ;;  %v3832_v20 = vadd.f32 -1.0, %v4203_v38 }
 0x35b   : > { %v6546_v39 = vadd.f32 %v3272_v7, %v3218_v18  ;;  %v3221_v3 = vadd.f32 %v6447_v17, %v3220_v44  ;;  %v3460_v56 = vmul.f32 1.6732632, %v3829_v63 }
 0x35c   : > { %v3338_v51 = vmin.f32 %v6543_v29, 0.0  ;;  %v6552_v37 = vadd.f32 %v3275_v62, %v3229_v9  ;;  %v3526_v54 = vsel %vm3494_vm4, %v6518_v31, %v3462_v53  ;;  %v4205_v12 = vpop.eup %4204  ;;  %v3463_v36 = vmul.f32 1.6732632, %v3832_v20 }
 0x35d   : > { %v3336_v22 = vmin.f32 %v6546_v39, 0.0  ;;  %v3558_v32 = vmul.f32 1.050701, %v3526_v54  ;;  %v6557_v19 = vadd.f32 %v3273_v59, %v3221_v3  ;;  %v3524_v14 = vsel %vm3492_vm5, %v6521_v21, %v3460_v56 }
 0x35e   : > { %v3396_v45 = vmul.f32 1.442695, %v3338_v51  ;;  %v3830_v1 = vadd.f32 -1.0, %v4205_v12  ;;  %v3339_v43 = vmin.f32 %v6552_v37, 0.0  ;;  %v3556_v31 = vmul.f32 1.050701, %v3524_v14 }
 0x35f   : > { %v3392_v25 = vmul.f32 1.442695, %v3336_v22  ;;  %3590 = vst [vmem:[%s6459_s24 + $0xb0] sm:$0xff] %v3558_v32  ;;  %v3527_v23 = vsel %vm3495_vm6, %v6524_v49, %v3463_v36  ;;  %v3337_v21 = vmin.f32 %v6557_v19, 0.0  ;;  %vm3498_vm8 = vcmp.gt.f32.partialorder %v6543_v29, 0.0 }
 0x360   : > { %4206 = vpow2.f32 %v3396_v45  ;;  %v3559_v41 = vmul.f32 1.050701, %v3527_v23  ;;  %v3461_v60 = vmul.f32 1.6732632, %v3830_v1  ;;  %v3398_v30 = vmul.f32 1.442695, %v3339_v43 }
 0x361   : > { %4208 = vpow2.f32 %v3392_v25  ;;  %3588 = vst [vmem:[%s6459_s24 + $0xa0] sm:$0xff] %v3556_v31  ;;  %v3394_v61 = vmul.f32 1.442695, %v3337_v21  ;;  %vm3496_vm9 = vcmp.gt.f32.partialorder %v6546_v39, 0.0  ;;  %vm3499_vm10 = vcmp.gt.f32.partialorder %v6552_v37, 0.0 }
 0x362   : > { %3591 = vst [vmem:[%s6459_s24 + $0xb8] sm:$0xff] %v3559_v41  ;;  %v3525_v34 = vsel %vm3493_vm7, %v6531_v6, %v3461_v60  ;;  %4210 = vpow2.f32 %v3398_v30  ;;  %v3279_v6 = vld [vmem:[%s4700_s14 + $0xf8] sm:$0xff]  ;;  %vm3497_vm11 = vcmp.gt.f32.partialorder %v6557_v19, 0.0  ;;  %s3614_s14 = sshll.u32 %s6459_s24, 4  ;;  %s6599_s14 = int_to_ptr.vmem [resolvable:$true] %s3614_s14 }
 0x363   : > { %v3557_v16 = vmul.f32 1.050701, %v3525_v34  ;;  %4212 = vpow2.f32 %v3394_v61  ;;  %s4363_s26 = scalar_lea.vmem %s6599_s14, 4096  ;;  %p4370_p12 = scmp.lt.s32.totalorder %s6599_s14, %s4368_s22 }
 0x364   : > { %p4364_p6 = scmp.ne.s32.totalorder %s6599_s14, %s4363_s26  ;;  %p4371_p10 = scmp.lt.s32.totalorder %s4369_s25, %s4363_s26 }
 0x365   : > { %3589 = vst [vmem:[%s6459_s24 + $0xa8] sm:$0xff] %v3557_v16 }
 0x366   : > { %p4365_p3 = pnand %p4364_p6, %p4646_p5  ;;  %p4372_p1 = por %p4371_p10, %p4370_p12 }
 0x368   : > { %p4366_p7 = pneg %p4365_p3 }
 0x369   : > { %v3990_v4 = vpop.f32.mrb[28].mxu1 }
 0x36a   : > { %v4207_v49 = vpop.eup %4206  ;;  %v3242_v33 = vadd.f32 %v3990_v4, %v6447_v17  ;;  %v3233_v55 = vpop.f32.mrb[29].mxu1  ;;  %p4373_p4 = pnand %p4372_p1, %p4366_p7 }
 0x36b   : > { %v4209_v8 = vpop.eup %4208  ;;  %v3835_v52 = vadd.f32 -1.0, %v4207_v49  ;;  %v3234_v2 = vadd.f32 %v6447_v17, %v3233_v55  ;;  %v3991_v11 = vpop.f32.mrb[30].mxu1 }
 0x36c   : > { %v3833_v48 = vadd.f32 -1.0, %v4209_v8  ;;  %v4211_v47 = vpop.eup %4210  ;;  %v3310_v42 = vadd.f32 %v3278_v58, %v3242_v33  ;;  %v3245_v27 = vadd.f32 %v3991_v11, %v6447_v17  ;;  %v3236_v0 = vpop.f32.mrb[31].mxu1 }
 0x36d   : > { %v3466_v15 = vmul.f32 1.6732632, %v3835_v52  ;;  %v3836_v5 = vadd.f32 -1.0, %v4211_v47  ;;  %v3308_v10 = vadd.f32 %v3276_v57, %v3234_v2  ;;  %v3237_v40 = vadd.f32 %v6447_v17, %v3236_v0  ;;  %v4213_v7 = vpop.eup %4212 }
 0x36e   : > { %v3464_v26 = vmul.f32 1.6732632, %v3833_v48  ;;  %v3342_v28 = vmin.f32 %v3310_v42, 0.0  ;;  %v3311_v24 = vadd.f32 %v3279_v6, %v3245_v27  ;;  %v3834_v44 = vadd.f32 -1.0, %v4213_v7 }
 0x36f   : > { %v3530_v13 = vsel %vm3498_vm8, %v6543_v29, %v3466_v15  ;;  %v3467_v50 = vmul.f32 1.6732632, %v3836_v5  ;;  %v3340_v62 = vmin.f32 %v3308_v10, 0.0  ;;  %vm3502_vm12 = vcmp.gt.f32.partialorder %v3310_v42, 0.0 }
 0x370   : > { %v3562_v46 = vmul.f32 1.050701, %v3530_v13  ;;  %v3528_v18 = vsel %vm3496_vm9, %v6546_v39, %v3464_v26  ;;  %v3404_v38 = vmul.f32 1.442695, %v3342_v28  ;;  %v3343_v63 = vmin.f32 %v3311_v24, 0.0 }
 0x371   : > { %v3560_v9 = vmul.f32 1.050701, %v3528_v18  ;;  %v3531_v29 = vsel %vm3499_vm10, %v6552_v37, %v3467_v50  ;;  %v3400_v53 = vmul.f32 1.442695, %v3340_v62  ;;  %v3465_v3 = vmul.f32 1.6732632, %v3834_v44 }
 0x372   : > { %3594 = vst [vmem:[%s6459_s24 + $0xd0] sm:$0xff] %v3562_v46  ;;  %v3563_v17 = vmul.f32 1.050701, %v3531_v29  ;;  %4214 = vpow2.f32 %v3404_v38  ;;  %v3309_v39 = vadd.f32 %v3277_v35, %v3237_v40  ;;  %v3406_v59 = vmul.f32 1.442695, %v3343_v63 }
 0x373   : > { %3592 = vst [vmem:[%s6459_s24 + $0xc0] sm:$0xff] %v3560_v9  ;;  %4216 = vpow2.f32 %v3400_v53  ;;  %v3529_v20 = vsel %vm3497_vm11, %v6557_v19, %v3465_v3  ;;  %vm3500_vm13 = vcmp.gt.f32.partialorder %v3308_v10, 0.0  ;;  %vm3503_vm14 = vcmp.gt.f32.partialorder %v3311_v24, 0.0 }
 0x374   : > { %3595 = vst [vmem:[%s6459_s24 + $0xd8] sm:$0xff] %v3563_v17  ;;  %v3341_v51 = vmin.f32 %v3309_v39, 0.0  ;;  %v3561_v54 = vmul.f32 1.050701, %v3529_v20  ;;  %4218 = vpow2.f32 %v3406_v59  ;;  %vm3501_vm15 = vcmp.gt.f32.partialorder %v3309_v39, 0.0 }
 0x376   : > { %v3402_v56 = vmul.f32 1.442695, %v3341_v51  ;;  %3593 = vst [vmem:[%s6459_s24 + $0xc8] sm:$0xff] %v3561_v54 }
 0x378   : > { %4220 = vpow2.f32 %v3402_v56 }
 0x37c   : > { %v4215_v37 = vpop.eup %4214 }
 0x37d   : > { %v4217_v22 = vpop.eup %4216  ;;  %v3839_v12 = vadd.f32 -1.0, %v4215_v37 }
 0x37e   : > { %v3837_v32 = vadd.f32 -1.0, %v4217_v22  ;;  %v4219_v36 = vpop.eup %4218 }
 0x37f   : > { %v3470_v45 = vmul.f32 1.6732632, %v3839_v12  ;;  %v3840_v1 = vadd.f32 -1.0, %v4219_v36 }
 0x380   : > { %v3468_v14 = vmul.f32 1.6732632, %v3837_v32 }
 0x381   : > { %v3534_v19 = vsel %vm3502_vm12, %v3310_v42, %v3470_v45  ;;  %v3471_v23 = vmul.f32 1.6732632, %v3840_v1 }
 0x382   : > { %v4221_v25 = vpop.eup %4220  ;;  %v3566_v43 = vmul.f32 1.050701, %v3534_v19  ;;  %v3532_v31 = vsel %vm3500_vm13, %v3308_v10, %v3468_v14 }
 0x383   : > { %v3564_v41 = vmul.f32 1.050701, %v3532_v31  ;;  %v3838_v60 = vadd.f32 -1.0, %v4221_v25  ;;  %v3535_v30 = vsel %vm3503_vm14, %v3311_v24, %v3471_v23 }
 0x384   : > { %3598 = vst [vmem:[%s6459_s24 + $0xf0] sm:$0xff] %v3566_v43  ;;  %v3567_v21 = vmul.f32 1.050701, %v3535_v30 }
 0x385   : > { %3596 = vst [vmem:[%s6459_s24 + $0xe0] sm:$0xff] %v3564_v41  ;;  %v3469_v34 = vmul.f32 1.6732632, %v3838_v60 }
 0x386   : > { %3599 = vst [vmem:[%s6459_s24 + $0xf8] sm:$0xff] %v3567_v21 }
 0x387   : > { %v3533_v16 = vsel %vm3501_vm15, %v3309_v39, %v3469_v34 }
 0x388   : > { %v3565_v61 = vmul.f32 1.050701, %v3533_v16 }
 0x38a   : > { %3597 = vst [vmem:[%s6459_s24 + $0xe8] sm:$0xff] %v3565_v61 }
 0x38b   : > { %4376 = shalt.err (!%p4373_p4)
}
 0x38c   : > { %s4377_s18 = scalar_lea.hbm %s6597_s30, 4096  ;;  %s4381_s23 = scalar_lea.hbm %s6707_s17, 8192 }
 0x38d   : > { %p4378_p9 = scmp.ne.s32.totalorder %s6597_s30, %s4377_s18  ;;  %p4382_p8 = scmp.lt.u32.totalorder %s6597_s30, %s6707_s17 }
 0x38e   : > { %p4383_p13 = scmp.lt.u32.totalorder %s4381_s23, %s4377_s18  ;;  %p4385_p6 = scmp.lt.u32.totalorder %s4377_s18, %s6597_s30 }
 0x38f   : > { %p4379_p0 = pnand %p4378_p9, %p4646_p5 }
 0x390   : > { %p4384_p2 = por %p4383_p13, %p4382_p8 }
 0x391   : > { %p4380_p11 = pneg %p4379_p0 }
 0x392   : > { %p4386_p3 = por %p4385_p6, %p4384_p2 }
 0x394   : > { %p4387_p7 = pnand %p4386_p3, %p4380_p11 }
 0x396   : > { %4390 = shalt.err (!%p4387_p7)
}
 0x397   : > { %s4451_s29 = smov 128   ;;  %s4452_s15 = smov 8  }
 0x398   : > { %4006 = dma.vmem_to_hbm [thread:$0]  (%p4646_p5), %s6599_s14, 4096, %s6597_s30, %s3601_s13, %s4451_s29, %s4451_s29, %s4452_s15  }
 0x399 PF: > { %s6708_s26 = sld [smem:[#allocation16_spill]]  ;;  %s6709_s19 = sld [smem:[#allocation17_spill]] }
 0x39a   : > { %p6711_p10 = scmp.ge.s32.totalorder %s4437_s12, 2 }
 0x39f   : > { %s3629_s22 = sand.u32 1, %s6708_s26   ;;  %p6710_p12 = scmp.ne.s32.totalorder %s6709_s19, 0 }
 0x3a0   : > { %s3630_s25 = scalar_lea.sflag [#allocation5], %s3629_s22 }
 0x3a1   : > { %p4023_p1 = pnand %p6711_p10, %p6710_p12 }
 0x3a3   : > { %4420 = dma.done.wait (!%p4023_p1), %s3630_s25, 4096  }
 0x3a4   : > { %4422 = vsyncadd (!%p4023_p1), %s3630_s25, 4294963200  ;;  %p24_p4 = scmp.ge.s32.totalorder %s4614_s27, 4   ;;  %s6712_s30 = smov %s4429_s10 }
 0x3a5   : > { %s6713_s10 = smov %s4433_s11  ;;  %s6714_s11 = smov %s4642_s20 }
 0x3a6   : > { %s6715_s12 = smov %s4614_s27  ;;  %26 = sbr.rel (!%p24_p4) target bundleno = 10 (0xa), region = 131 }
 0x3ad   :  { %3635 = vsyncpa [#allocation4], 1 }
 0x3ae   :  { %3637 = vsyncpa [#allocation4 + $0x1], 1 }
 0x3af   :  { %3638 = vsyncpa [#allocation7], 1 }
 0x3b0   :  { %3639 = vsyncpa [#allocation10], 1 }
 0x3b1   :  { %3640 = vsyncpa [#allocation5], 1 }
 0x3b2   :  { %3642 = vsyncpa [#allocation5 + $0x1], 1 }

</bundles_post_ra>
